<compile_context>
chip_gen: v5e
topology: v5e:2x2
jax: 0.10.0
libtpu: 0.0.40
codegen_flags: <defaults>
</compile_context>

<pallas_src>
import functools

import jax
import jax.numpy as jnp
import numpy as np
from jax import lax
from jax.experimental import pallas as pl
from jax.experimental.pallas import tpu as pltpu


# ------------------------- fused per-block kernel -----------------------------
def _dyn_conv2d_kernel(x_ref, w1_ref, w2_ref, b2_ref, wk_ref, bck_ref, o_ref,
                       pad_ref, *, h, w, h_out, w_out, kh, kw, c_in, c_pad,
                       c_out, n_experts, spad, tile_h, inv_hw, inv_t):
    # x_ref  : (TB, H, W, C_in)      bf16 unpadded NHWC input block.
    # wk_ref : (K, C_out, Rp)        f32 expert weights, Rp = kh*kw*c_pad,
    #                                r = (dy*kw+dx)*c_pad + c (zero rows for c>=c_in).
    # bck_ref: (C_out, K)            f32 expert biases (channels-major).
    # o_ref  : (TB, C_out, H_out*W_out)  lane-dense output.
    # pad_ref: (TB, Hp, Wp, c_pad)   bf16 VMEM scratch (spatial + channel padded).
    tb = x_ref.shape[0]
    xb = x_ref[...]                                          # bf16, stays bf16

    # ---- stage the zero-padded image in VMEM (no HBM pad pass) --------------
    # Full zero every step: the scratch is per-TensorCore and a pl.when(pid==0)
    # init would be skipped on the second core under "parallel" semantics.
    pad_ref[...] = jnp.zeros_like(pad_ref)
    pad_ref[:, spad:spad + h, spad:spad + w, 0:c_in] = xb

    # ---- attention: avg-pool (f32 accumulation) -> fc1 -> relu -> fc2 -------
    pooled = jnp.sum(xb.reshape(tb, h * w, c_in), axis=1,
                     dtype=jnp.float32) * inv_hw             # (TB, C_in) f32
    hid = jnp.maximum(
        jnp.dot(pooled, w1_ref[...], preferred_element_type=jnp.float32), 0.0)
    logits = (jnp.dot(hid, w2_ref[...], preferred_element_type=jnp.float32)
              + b2_ref[...]) * inv_t
    m = jnp.max(logits, axis=-1, keepdims=True)
    e = jnp.exp(logits - m)
    attn = e * pl.reciprocal(jnp.sum(e, axis=-1, keepdims=True), approx=True)

    # ---- aggregate expert biases for all TB samples on the MXU --------------
    aggb_t = lax.dot_general(bck_ref[...], attn, (((1,), (1,)), ((), ())),
                             preferred_element_type=jnp.float32)  # (C_out, TB)

    # ---- per-sample: aggregate expert weights, row-striped im2col conv ------
    for t in range(tb):
        aggw = attn[t:t + 1, 0:1] * wk_ref[0]                # (C_out, Rp) f32
        for k in range(1, n_experts):
            aggw = aggw + attn[t:t + 1, k:k + 1] * wk_ref[k]
        aggw = aggw.astype(jnp.bfloat16)
        bias_t = aggb_t[:, t:t + 1]                          # (C_out, 1)

        for y0 in range(0, h_out, tile_h):                   # bounded im2col slab
            th = min(tile_h, h_out - y0)
            cols = []
            for dy in range(kh):
                for dx in range(kw):
                    patch = pad_ref[t, y0 + dy:y0 + dy + th,
                                    dx:dx + w_out, :]        # (th, W_out, c_pad) bf16
                    cols.append(patch.reshape(th * w_out, c_pad))
            # c_pad % 128 == 0 -> lane-aligned, unmasked concatenation.
            patches = jnp.concatenate(cols, axis=-1)         # (th*W_out, Rp)
            out_s = lax.dot_general(aggw, patches, (((1,), (1,)), ((), ())),
                                    preferred_element_type=jnp.float32)
            out_s = out_s + bias_t                           # (C_out, th*W_out)
            # NOTE: could store bf16 if the consumer tolerates it (halves writeback).
            o_ref[t, :, y0 * w_out:(y0 + th) * w_out] = out_s.astype(o_ref.dtype)


# ------------------------------ parameters ------------------------------------
def init_params(key, in_planes, out_planes, kernel_size, ratio, K):
    hidden = K if in_planes == 3 else int(in_planes * ratio) + 1
    k1, k2, k3, k4, k5 = jax.random.split(key, 5)
    w1 = jax.random.normal(k1, (in_planes, hidden), jnp.float32) * (2.0 / in_planes) ** 0.5
    w2 = jax.random.normal(k2, (hidden, K), jnp.float32) * (2.0 / max(hidden, 1)) ** 0.5
    b2 = jax.random.normal(k3, (1, K), jnp.float32) * 0.1
    fan_in = in_planes * kernel_size * kernel_size
    weight = jax.random.normal(
        k4, (K, out_planes, in_planes, kernel_size, kernel_size), jnp.float32
    ) * (1.0 / fan_in) ** 0.5
    bias = jax.random.normal(k5, (K, out_planes), jnp.float32) * 0.1
    return dict(w1=w1, w2=w2, b2=b2, weight=weight, bias=bias)


# ------------------------------ helpers ----------------------------------------
def _pick_block_batch(batch, bytes_per_sample, budget=8 * 2 ** 20):
    """Largest TB dividing batch that fits the VMEM budget and keeps >=2 grid steps."""
    cap = max(1, min(batch, budget // max(bytes_per_sample, 1)))
    tb = 1
    for cand in range(1, cap + 1):
        if batch % cand == 0 and (batch // cand >= 2 or batch <= 1):
            tb = cand
    return tb


# ------------------------------ wrapper ----------------------------------------
def dynamic_conv2d(x_nchw, params, *, padding=1, temperature=34.0):
    B, C_in, H, W = x_nchw.shape
    K, C_out, _, KH, KW = params["weight"].shape
    hidden = params["w1"].shape[1]
    Hp, Wp = H + 2 * padding, W + 2 * padding
    H_out, W_out = Hp - KH + 1, Wp - KW + 1
    HWo = H_out * W_out

    LANE = 128
    C_pad = ((C_in + LANE - 1) // LANE) * LANE            # channel pad in VMEM only
    Rp = KH * KW * C_pad

    # Single wrapper-side HBM pass: fused transpose + bf16 downcast.
    # (Spatial padding is done inside the kernel's VMEM scratch.)
    x_nhwc = jnp.transpose(x_nchw, (0, 2, 3, 1)).astype(jnp.bfloat16)

    # (K,O,I,kh,kw) -> (K,O,kh,kw,I) -> channel-pad -> (K,O,Rp), r=(dy*kw+dx)*C_pad+c
    wk = jnp.transpose(params["weight"], (0, 1, 3, 4, 2))
    wk = jnp.pad(wk, ((0, 0), (0, 0), (0, 0), (0, 0), (0, C_pad - C_in)))
    wk = wk.reshape(K, C_out, Rp).astype(jnp.float32)
    bias_ck = params["bias"].T.astype(jnp.float32)        # (C_out, K)

    per_sample = H * W * C_in * 2 + Hp * Wp * C_pad * 2 + C_out * HWo * 4
    TB = _pick_block_batch(B, per_sample)
    # In-kernel row-stripe height: keeps the bf16 im2col slab around ~2 MiB.
    tile_h = max(1, min(H_out, (2 * 2 ** 20) // max(W_out * Rp * 2, 1)))

    est = (2 * TB * H * W * C_in * 2            # x block (double buffered)
           + 2 * TB * C_out * HWo * 4           # output block
           + TB * Hp * Wp * C_pad * 2           # padded-image scratch
           + 2 * K * C_out * Rp * 4             # resident expert weights
           + tile_h * W_out * Rp * 2            # im2col stripe
           + C_out * Rp * 6                     # aggw f32 + bf16 copy
           + (1 << 20))                         # misc temporaries
    vmem_limit = int(min(64 * 2 ** 20, max(16 * 2 ** 20, 2 * est)))

    kernel = functools.partial(
        _dyn_conv2d_kernel, h=H, w=W, h_out=H_out, w_out=W_out, kh=KH, kw=KW,
        c_in=C_in, c_pad=C_pad, c_out=C_out, n_experts=K, spad=padding,
        tile_h=tile_h, inv_hw=1.0 / (H * W), inv_t=1.0 / temperature)

    out_flat = pl.pallas_call(
        kernel,
        out_shape=jax.ShapeDtypeStruct((B, C_out, HWo), jnp.float32),
        grid=(B // TB,),
        in_specs=[
            pl.BlockSpec((TB, H, W, C_in), lambda b: (b, 0, 0, 0)),
            pl.BlockSpec((C_in, hidden), lambda b: (0, 0)),
            pl.BlockSpec((hidden, K), lambda b: (0, 0)),
            pl.BlockSpec((1, K), lambda b: (0, 0)),
            pl.BlockSpec((K, C_out, Rp), lambda b: (0, 0, 0)),
            pl.BlockSpec((C_out, K), lambda b: (0, 0)),
        ],
        out_specs=pl.BlockSpec((TB, C_out, HWo), lambda b: (b, 0, 0)),
        scratch_shapes=[pltpu.VMEM((TB, Hp, Wp, C_pad), jnp.bfloat16)],
        compiler_params=pltpu.CompilerParams(
            dimension_semantics=("parallel",),
            vmem_limit_bytes=vmem_limit),
    )(x_nhwc, params["w1"], params["w2"], params["b2"], wk, bias_ck)

    # (B, C_out, H_out*W_out) -> NCHW for free (output is already lane-dense).
    return out_flat.reshape(B, C_out, H_out, W_out)


# --------------------------- pure-JAX reference --------------------------------
def reference(x_nchw, params, *, padding=1, temperature=34.0):
    B = x_nchw.shape[0]
    pooled = jnp.mean(x_nchw, axis=(2, 3))                               # (B, C_in)
    h = jnp.maximum(pooled @ params["w1"], 0.0)
    logits = h @ params["w2"] + params["b2"][0]
    attn = jax.nn.softmax(logits / temperature, axis=1)                  # (B, K)
    aggw = jnp.einsum("bk,koihw->boihw", attn, params["weight"])
    aggb = attn @ params["bias"]                                         # (B, O)
    outs = []
    for b in range(B):
        o = lax.conv_general_dilated(
            x_nchw[b:b + 1], aggw[b], window_strides=(1, 1),
            padding=((padding, padding), (padding, padding)),
            dimension_numbers=("NCHW", "OIHW", "NCHW"),
            precision=lax.Precision.HIGHEST)
        outs.append(o + aggb[b][None, :, None, None])
    return jnp.concatenate(outs, axis=0)


if __name__ == "__main__":
    key = jax.random.PRNGKey(0)
    kx, kp = jax.random.split(key)
    B, C_in, H, W = 2, 4, 16, 16
    C_out, ksize, K, ratio = 8, 3, 4, 0.25
    temperature = 34.0

    x = jax.random.normal(kx, (B, C_in, H, W), jnp.float32)
    params = init_params(kp, C_in, C_out, ksize, ratio, K)

    out = dynamic_conv2d(x, params, padding=1, temperature=temperature)
    out = jax.block_until_ready(out)

    ref = reference(x, params, padding=1, temperature=temperature)
    assert out.shape == (B, C_out, H, W), out.shape
    # bf16 image / conv operands (f32 accumulation) -> slightly looser tolerance.
    np.testing.assert_allclose(np.asarray(out), np.asarray(ref), rtol=5e-2, atol=5e-2)
    print("KERNEL_OK")
</pallas_src>

<mosaic_0001>
module attributes {stable_mosaic.version = 11 : i64} {
  func.func @_dyn_conv2d_kernel(%arg0: i32, %arg1: memref<1x16x16x4xbf16, #tpu.memory_space<vmem>>, %arg2: memref<4x2xf32, #tpu.memory_space<vmem>>, %arg3: memref<2x4xf32, #tpu.memory_space<vmem>>, %arg4: memref<1x4xf32, #tpu.memory_space<vmem>>, %arg5: memref<4x8x1152xf32, #tpu.memory_space<vmem>>, %arg6: memref<8x4xf32, #tpu.memory_space<vmem>>, %arg7: memref<1x8x256xf32, #tpu.memory_space<vmem>>, %arg8: memref<1x18x18x128xbf16, #tpu.memory_space<vmem>>) attributes {dimension_semantics = [#tpu.dimension_semantics<parallel>], iteration_bounds = array<i64: 2>, scalar_prefetch = 0 : i64, scratch_operands = 1 : i64, tpu.core_type = #tpu.core_type<tc>, window_params = [{transform_indices = @transform_0, window_bounds = array<i64: 1, 16, 16, 4>}, {pipeline_mode = #tpu.pipeline_mode<synchronous>, transform_indices = @transform_1, window_bounds = array<i64: 4, 2>}, {pipeline_mode = #tpu.pipeline_mode<synchronous>, transform_indices = @transform_2, window_bounds = array<i64: 2, 4>}, {pipeline_mode = #tpu.pipeline_mode<synchronous>, transform_indices = @transform_3, window_bounds = array<i64: 1, 4>}, {pipeline_mode = #tpu.pipeline_mode<synchronous>, transform_indices = @transform_4, window_bounds = array<i64: 4, 8, 1152>}, {pipeline_mode = #tpu.pipeline_mode<synchronous>, transform_indices = @transform_5, window_bounds = array<i64: 8, 4>}, {transform_indices = @transform_6, window_bounds = array<i64: 1, 8, 256>}]} {
    %c0 = arith.constant 0 : index
    %c0_0 = arith.constant 0 : index
    %c0_1 = arith.constant 0 : index
    %c0_2 = arith.constant 0 : index
    %0 = vector.load %arg1[%c0, %c0_0, %c0_1, %c0_2] : memref<1x16x16x4xbf16, #tpu.memory_space<vmem>>, vector<1x16x16x4xbf16>
    %cst = arith.constant 0.000000e+00 : bf16
    %1 = vector.broadcast %cst : bf16 to vector<1x18x18x128xbf16>
    %c0_3 = arith.constant 0 : index
    %c0_4 = arith.constant 0 : index
    %c0_5 = arith.constant 0 : index
    %c0_6 = arith.constant 0 : index
    %2 = vector.load %arg8[%c0_3, %c0_4, %c0_5, %c0_6] : memref<1x18x18x128xbf16, #tpu.memory_space<vmem>>, vector<1x18x18x128xbf16>
    tpu.vector_store %arg8[%c0_3, %c0_4, %c0_5, %c0_6], %1 {strides = array<i32>} : memref<1x18x18x128xbf16, #tpu.memory_space<vmem>>, vector<1x18x18x128xbf16>,
    %c0_7 = arith.constant 0 : index
    %c1 = arith.constant 1 : index
    %c1_8 = arith.constant 1 : index
    %c0_9 = arith.constant 0 : index
    %3 = vector.load %arg8[%c0_7, %c1, %c1_8, %c0_9] : memref<1x18x18x128xbf16, #tpu.memory_space<vmem>>, vector<1x16x16x4xbf16>
    tpu.vector_store %arg8[%c0_7, %c1, %c1_8, %c0_9], %0 {strides = array<i32>} : memref<1x18x18x128xbf16, #tpu.memory_space<vmem>>, vector<1x16x16x4xbf16>,
    %4 = vector.shape_cast %0 : vector<1x16x16x4xbf16> to vector<1x256x4xbf16>
    %5 = arith.extf %4 : vector<1x256x4xbf16> to vector<1x256x4xf32>
    %cst_10 = arith.constant dense<0.000000e+00> : vector<1x4xf32>
    %6 = vector.multi_reduction <add>, %5, %cst_10 [1] : vector<1x256x4xf32> to vector<1x4xf32>
    %cst_11 = arith.constant 3.906250e-03 : f32
    %7 = vector.broadcast %cst_11 : f32 to vector<1x4xf32>
    %8 = arith.mulf %6, %7 : vector<1x4xf32>
    %c0_12 = arith.constant 0 : index
    %c0_13 = arith.constant 0 : index
    %9 = vector.load %arg2[%c0_12, %c0_13] : memref<4x2xf32, #tpu.memory_space<vmem>>, vector<4x2xf32>
    %cst_14 = arith.constant dense<0.000000e+00> : vector<1x2xf32>
    %10 = tpu.matmul %8, %9, %cst_14 {dimension_numbers = #tpu.dot_dimension_numbers<[1], [0], [0], [1], [0, 0, 1, 1], [], []>} : vector<1x4xf32>, vector<4x2xf32>, vector<1x2xf32> -> vector<1x2xf32>
    %cst_15 = arith.constant 0.000000e+00 : f32
    %11 = vector.broadcast %cst_15 : f32 to vector<1x2xf32>
    %12 = arith.maximumf %10, %11 : vector<1x2xf32>
    %c0_16 = arith.constant 0 : index
    %c0_17 = arith.constant 0 : index
    %13 = vector.load %arg3[%c0_16, %c0_17] : memref<2x4xf32, #tpu.memory_space<vmem>>, vector<2x4xf32>
    %cst_18 = arith.constant dense<0.000000e+00> : vector<1x4xf32>
    %14 = tpu.matmul %12, %13, %cst_18 {dimension_numbers = #tpu.dot_dimension_numbers<[1], [0], [0], [1], [0, 0, 1, 1], [], []>} : vector<1x2xf32>, vector<2x4xf32>, vector<1x4xf32> -> vector<1x4xf32>
    %c0_19 = arith.constant 0 : index
    %c0_20 = arith.constant 0 : index
    %15 = vector.load %arg4[%c0_19, %c0_20] : memref<1x4xf32, #tpu.memory_space<vmem>>, vector<1x4xf32>
    %16 = arith.addf %14, %15 : vector<1x4xf32>
    %cst_21 = arith.constant 0.0294117648 : f32
    %17 = vector.broadcast %cst_21 : f32 to vector<1x4xf32>
    %18 = arith.mulf %16, %17 : vector<1x4xf32>
    %cst_22 = arith.constant dense<0xFF800000> : vector<1xf32>
    %19 = vector.multi_reduction <maximumf>, %18, %cst_22 [1] : vector<1x4xf32> to vector<1xf32>
    %20 = vector.shape_cast %19 : vector<1xf32> to vector<1x1xf32>
    %21 = vector.broadcast %20 : vector<1x1xf32> to vector<1x4xf32>
    %22 = arith.subf %18, %21 : vector<1x4xf32>
    %23 = math.exp %22 : vector<1x4xf32>
    %cst_23 = arith.constant dense<0.000000e+00> : vector<1xf32>
    %24 = vector.multi_reduction <add>, %23, %cst_23 [1] : vector<1x4xf32> to vector<1xf32>
    %25 = vector.shape_cast %24 : vector<1xf32> to vector<1x1xf32>
    %26 = tpu.reciprocal %25 {approx = true} : vector<1x1xf32> -> vector<1x1xf32>
    %27 = vector.broadcast %26 : vector<1x1xf32> to vector<1x4xf32>
    %28 = arith.mulf %23, %27 : vector<1x4xf32>
    %c0_24 = arith.constant 0 : index
    %c0_25 = arith.constant 0 : index
    %29 = vector.load %arg6[%c0_24, %c0_25] : memref<8x4xf32, #tpu.memory_space<vmem>>, vector<8x4xf32>
    %cst_26 = arith.constant dense<0.000000e+00> : vector<8x1xf32>
    %30 = tpu.matmul %29, %28, %cst_26 {dimension_numbers = #tpu.dot_dimension_numbers<[1], [1], [0], [0], [0, 0, 1, 0], [], []>} : vector<8x4xf32>, vector<1x4xf32>, vector<8x1xf32> -> vector<8x1xf32>
    %31 = vector.extract_strided_slice %28 {offsets = [0, 0], sizes = [1, 1], strides = [1, 1]} : vector<1x4xf32> to vector<1x1xf32>
    %c0_27 = arith.constant 0 : index
    %c0_28 = arith.constant 0 : index
    %c0_29 = arith.constant 0 : index
    %32 = vector.load %arg5[%c0_27, %c0_28, %c0_29] : memref<4x8x1152xf32, #tpu.memory_space<vmem>>, vector<1x8x1152xf32>
    %33 = vector.shape_cast %32 : vector<1x8x1152xf32> to vector<8x1152xf32>
    %34 = vector.broadcast %31 : vector<1x1xf32> to vector<8x1152xf32>
    %35 = arith.mulf %34, %33 : vector<8x1152xf32>
    %36 = vector.extract_strided_slice %28 {offsets = [0, 1], sizes = [1, 1], strides = [1, 1]} : vector<1x4xf32> to vector<1x1xf32>
    %c1_30 = arith.constant 1 : index
    %c0_31 = arith.constant 0 : index
    %c0_32 = arith.constant 0 : index
    %37 = vector.load %arg5[%c1_30, %c0_31, %c0_32] : memref<4x8x1152xf32, #tpu.memory_space<vmem>>, vector<1x8x1152xf32>
    %38 = vector.shape_cast %37 : vector<1x8x1152xf32> to vector<8x1152xf32>
    %39 = vector.broadcast %36 : vector<1x1xf32> to vector<8x1152xf32>
    %40 = arith.mulf %39, %38 : vector<8x1152xf32>
    %41 = arith.addf %35, %40 : vector<8x1152xf32>
    %42 = vector.extract_strided_slice %28 {offsets = [0, 2], sizes = [1, 1], strides = [1, 1]} : vector<1x4xf32> to vector<1x1xf32>
    %c2 = arith.constant 2 : index
    %c0_33 = arith.constant 0 : index
    %c0_34 = arith.constant 0 : index
    %43 = vector.load %arg5[%c2, %c0_33, %c0_34] : memref<4x8x1152xf32, #tpu.memory_space<vmem>>, vector<1x8x1152xf32>
    %44 = vector.shape_cast %43 : vector<1x8x1152xf32> to vector<8x1152xf32>
    %45 = vector.broadcast %42 : vector<1x1xf32> to vector<8x1152xf32>
    %46 = arith.mulf %45, %44 : vector<8x1152xf32>
    %47 = arith.addf %41, %46 : vector<8x1152xf32>
    %48 = vector.extract_strided_slice %28 {offsets = [0, 3], sizes = [1, 1], strides = [1, 1]} : vector<1x4xf32> to vector<1x1xf32>
    %c3 = arith.constant 3 : index
    %c0_35 = arith.constant 0 : index
    %c0_36 = arith.constant 0 : index
    %49 = vector.load %arg5[%c3, %c0_35, %c0_36] : memref<4x8x1152xf32, #tpu.memory_space<vmem>>, vector<1x8x1152xf32>
    %50 = vector.shape_cast %49 : vector<1x8x1152xf32> to vector<8x1152xf32>
    %51 = vector.broadcast %48 : vector<1x1xf32> to vector<8x1152xf32>
    %52 = arith.mulf %51, %50 : vector<8x1152xf32>
    %53 = arith.addf %47, %52 : vector<8x1152xf32>
    %54 = arith.truncf %53 : vector<8x1152xf32> to vector<8x1152xbf16>
    %c0_37 = arith.constant 0 : index
    %c0_38 = arith.constant 0 : index
    %c0_39 = arith.constant 0 : index
    %c0_40 = arith.constant 0 : index
    %55 = vector.load %arg8[%c0_37, %c0_38, %c0_39, %c0_40] : memref<1x18x18x128xbf16, #tpu.memory_space<vmem>>, vector<1x16x16x128xbf16>
    %56 = vector.shape_cast %55 : vector<1x16x16x128xbf16> to vector<16x16x128xbf16>
    %57 = vector.shape_cast %56 : vector<16x16x128xbf16> to vector<256x128xbf16>
    %c0_41 = arith.constant 0 : index
    %c0_42 = arith.constant 0 : index
    %c1_43 = arith.constant 1 : index
    %c0_44 = arith.constant 0 : index
    %58 = vector.load %arg8[%c0_41, %c0_42, %c1_43, %c0_44] : memref<1x18x18x128xbf16, #tpu.memory_space<vmem>>, vector<1x16x16x128xbf16>
    %59 = vector.shape_cast %58 : vector<1x16x16x128xbf16> to vector<16x16x128xbf16>
    %60 = vector.shape_cast %59 : vector<16x16x128xbf16> to vector<256x128xbf16>
    %c0_45 = arith.constant 0 : index
    %c0_46 = arith.constant 0 : index
    %c2_47 = arith.constant 2 : index
    %c0_48 = arith.constant 0 : index
    %61 = vector.load %arg8[%c0_45, %c0_46, %c2_47, %c0_48] : memref<1x18x18x128xbf16, #tpu.memory_space<vmem>>, vector<1x16x16x128xbf16>
    %62 = vector.shape_cast %61 : vector<1x16x16x128xbf16> to vector<16x16x128xbf16>
    %63 = vector.shape_cast %62 : vector<16x16x128xbf16> to vector<256x128xbf16>
    %c0_49 = arith.constant 0 : index
    %c1_50 = arith.constant 1 : index
    %c0_51 = arith.constant 0 : index
    %c0_52 = arith.constant 0 : index
    %64 = vector.load %arg8[%c0_49, %c1_50, %c0_51, %c0_52] : memref<1x18x18x128xbf16, #tpu.memory_space<vmem>>, vector<1x16x16x128xbf16>
    %65 = vector.shape_cast %64 : vector<1x16x16x128xbf16> to vector<16x16x128xbf16>
    %66 = vector.shape_cast %65 : vector<16x16x128xbf16> to vector<256x128xbf16>
    %c0_53 = arith.constant 0 : index
    %c1_54 = arith.constant 1 : index
    %c1_55 = arith.constant 1 : index
    %c0_56 = arith.constant 0 : index
    %67 = vector.load %arg8[%c0_53, %c1_54, %c1_55, %c0_56] : memref<1x18x18x128xbf16, #tpu.memory_space<vmem>>, vector<1x16x16x128xbf16>
    %68 = vector.shape_cast %67 : vector<1x16x16x128xbf16> to vector<16x16x128xbf16>
    %69 = vector.shape_cast %68 : vector<16x16x128xbf16> to vector<256x128xbf16>
    %c0_57 = arith.constant 0 : index
    %c1_58 = arith.constant 1 : index
    %c2_59 = arith.constant 2 : index
    %c0_60 = arith.constant 0 : index
    %70 = vector.load %arg8[%c0_57, %c1_58, %c2_59, %c0_60] : memref<1x18x18x128xbf16, #tpu.memory_space<vmem>>, vector<1x16x16x128xbf16>
    %71 = vector.shape_cast %70 : vector<1x16x16x128xbf16> to vector<16x16x128xbf16>
    %72 = vector.shape_cast %71 : vector<16x16x128xbf16> to vector<256x128xbf16>
    %c0_61 = arith.constant 0 : index
    %c2_62 = arith.constant 2 : index
    %c0_63 = arith.constant 0 : index
    %c0_64 = arith.constant 0 : index
    %73 = vector.load %arg8[%c0_61, %c2_62, %c0_63, %c0_64] : memref<1x18x18x128xbf16, #tpu.memory_space<vmem>>, vector<1x16x16x128xbf16>
    %74 = vector.shape_cast %73 : vector<1x16x16x128xbf16> to vector<16x16x128xbf16>
    %75 = vector.shape_cast %74 : vector<16x16x128xbf16> to vector<256x128xbf16>
    %c0_65 = arith.constant 0 : index
    %c2_66 = arith.constant 2 : index
    %c1_67 = arith.constant 1 : index
    %c0_68 = arith.constant 0 : index
    %76 = vector.load %arg8[%c0_65, %c2_66, %c1_67, %c0_68] : memref<1x18x18x128xbf16, #tpu.memory_space<vmem>>, vector<1x16x16x128xbf16>
    %77 = vector.shape_cast %76 : vector<1x16x16x128xbf16> to vector<16x16x128xbf16>
    %78 = vector.shape_cast %77 : vector<16x16x128xbf16> to vector<256x128xbf16>
    %c0_69 = arith.constant 0 : index
    %c2_70 = arith.constant 2 : index
    %c2_71 = arith.constant 2 : index
    %c0_72 = arith.constant 0 : index
    %79 = vector.load %arg8[%c0_69, %c2_70, %c2_71, %c0_72] : memref<1x18x18x128xbf16, #tpu.memory_space<vmem>>, vector<1x16x16x128xbf16>
    %80 = vector.shape_cast %79 : vector<1x16x16x128xbf16> to vector<16x16x128xbf16>
    %81 = vector.shape_cast %80 : vector<16x16x128xbf16> to vector<256x128xbf16>
    %82 = tpu.concatenate %57, %60, %63, %66, %69, %72, %75, %78, %81 in 1 : vector<256x128xbf16>, vector<256x128xbf16>, vector<256x128xbf16>, vector<256x128xbf16>, vector<256x128xbf16>, vector<256x128xbf16>, vector<256x128xbf16>, vector<256x128xbf16>, vector<256x128xbf16> -> vector<256x1152xbf16>
    %cst_73 = arith.constant dense<0.000000e+00> : vector<8x256xf32>
    %83 = tpu.matmul %54, %82, %cst_73 {dimension_numbers = #tpu.dot_dimension_numbers<[1], [1], [0], [0], [0, 0, 1, 0], [], []>} : vector<8x1152xbf16>, vector<256x1152xbf16>, vector<8x256xf32> -> vector<8x256xf32>
    %84 = vector.broadcast %30 : vector<8x1xf32> to vector<8x256xf32>
    %85 = arith.addf %83, %84 : vector<8x256xf32>
    %c0_74 = arith.constant 0 : index
    %c0_75 = arith.constant 0 : index
    %c0_76 = arith.constant 0 : index
    %86 = vector.load %arg7[%c0_74, %c0_75, %c0_76] : memref<1x8x256xf32, #tpu.memory_space<vmem>>, vector<1x8x256xf32>
    %87 = vector.shape_cast %86 : vector<1x8x256xf32> to vector<8x256xf32>
    %88 = vector.shape_cast %85 : vector<8x256xf32> to vector<1x8x256xf32>
    tpu.vector_store %arg7[%c0_74, %c0_75, %c0_76], %88 {strides = array<i32>} : memref<1x8x256xf32, #tpu.memory_space<vmem>>, vector<1x8x256xf32>,
    return
  }
  func.func @transform_0(%arg0: i32) -> (i32, i32, i32, i32) {
    %c0_i32 = arith.constant 0 : i32
    %c0_i32_0 = arith.constant 0 : i32
    %c0_i32_1 = arith.constant 0 : i32
    %c0_i32_2 = arith.constant 0 : i32
    return %arg0, %c0_i32, %c0_i32_0, %c0_i32_1 : i32, i32, i32, i32
  }
  func.func @transform_1(%arg0: i32) -> (i32, i32) {
    %c0_i32 = arith.constant 0 : i32
    %c0_i32_0 = arith.constant 0 : i32
    %c0_i32_1 = arith.constant 0 : i32
    return %c0_i32, %c0_i32_0 : i32, i32
  }
  func.func @transform_2(%arg0: i32) -> (i32, i32) {
    %c0_i32 = arith.constant 0 : i32
    %c0_i32_0 = arith.constant 0 : i32
    %c0_i32_1 = arith.constant 0 : i32
    return %c0_i32, %c0_i32_0 : i32, i32
  }
  func.func @transform_3(%arg0: i32) -> (i32, i32) {
    %c0_i32 = arith.constant 0 : i32
    %c0_i32_0 = arith.constant 0 : i32
    %c0_i32_1 = arith.constant 0 : i32
    return %c0_i32, %c0_i32_0 : i32, i32
  }
  func.func @transform_4(%arg0: i32) -> (i32, i32, i32) {
    %c0_i32 = arith.constant 0 : i32
    %c0_i32_0 = arith.constant 0 : i32
    %c0_i32_1 = arith.constant 0 : i32
    %c0_i32_2 = arith.constant 0 : i32
    return %c0_i32, %c0_i32_0, %c0_i32_1 : i32, i32, i32
  }
  func.func @transform_5(%arg0: i32) -> (i32, i32) {
    %c0_i32 = arith.constant 0 : i32
    %c0_i32_0 = arith.constant 0 : i32
    %c0_i32_1 = arith.constant 0 : i32
    return %c0_i32, %c0_i32_0 : i32, i32
  }
  func.func @transform_6(%arg0: i32) -> (i32, i32, i32) {
    %c0_i32 = arith.constant 0 : i32
    %c0_i32_0 = arith.constant 0 : i32
    %c0_i32_1 = arith.constant 0 : i32
    return %arg0, %c0_i32, %c0_i32_0 : i32, i32, i32
  }
}

</mosaic_0001>

<bundles_post_ra>
// kernel: tpu_custom_call.1
= control target key start
LH: loop header
LB: loop body
LE: loop exit
PB: predicated region body
PF: predicated region fallthrough
CT: control target
= control target key end

     0   :  { %11 = vsyncpa [#allocation4], 0  ;;  %s5737_s0 = inlined_call_operand.vmem [shape: bf16[2,16,16,4], index: 0, kind: input, shape index: {}]   ;;  %s5738_s1 = inlined_call_operand.vmem [shape: f32[4,2], index: 1, kind: input, shape index: {}]   ;;  %s5739_s2 = inlined_call_operand.vmem [shape: f32[2,4], index: 2, kind: input, shape index: {}]   ;;  %s5740_s3 = inlined_call_operand.vmem [shape: f32[1,4], index: 3, kind: input, shape index: {}]   ;;  %s5741_s4 = inlined_call_operand.vmem [shape: f32[4,8,1152], index: 4, kind: input, shape index: {}]   ;;  %s5742_s5 = inlined_call_operand.vmem [shape: f32[8,4], index: 5, kind: input, shape index: {}]   ;;  %s5743_s6 = inlined_call_operand.hbm [shape: f32[2,8,256], index: 6, kind: output, shape index: {}]  }
   0x1   :  { %13 = vsyncpa [#allocation4 + $0x1], 0  ;;  %s4356_s21 = smov 0   ;;  %s4358_s22 = smov 0  }
   0x2   :  { %s4360_s23 = smov 0   ;;  %s4362_s24 = smov 0  }
   0x3 LB: > { %s4377_s25 = sadd.s32 4294967295, %s4315_s24   ;;  %s3857_s26 = sadd.s32 4294967294, %s4315_s24   ;;  %s4315_s24 = sphi %s4362_s24, %s5811_s24   ;;  %s4311_s23 = sphi %s4360_s23, %s5810_s23   ;;  %s4307_s22 = sphi %s4358_s22, %s5809_s22   ;;  %s4303_s21 = sphi %s4356_s21, %s5808_s21  }
   0x4   : > { %s4381_s27 = sadd.s32 1, %s4315_s24   ;;  %s157_s28 = sadd.s32 1, %s4311_s23 }
   0x5   : > { %s154_s29 = ssub.s32 %s4315_s24, %s4381_s27  ;;  %p167_p0 = scmp.ne.s32.totalorder %s4311_s23, %s4307_s22 }
   0x6   : > { %p155_p1 = scmp.eq.s32.totalorder %s154_s29, 0  ;;  %p168_p2 = scmp.eq.s32.totalorder %s4377_s25, 1 }
   0x7   : > { %p173_p3 = scmp.ne.s32.totalorder %s4307_s22, %s4303_s21  ;;  %p174_p4 = scmp.eq.s32.totalorder %s3857_s26, 1 }
   0x8   : > { %s4392_s30 = scalar_select %p155_p1, %s4311_s23, %s157_s28  }
   0x9   : > { %p4394_p5 = por %p168_p2, %p167_p0  ;;  %p4398_p6 = por %p174_p4, %p173_p3 }
   0xa   : > { %p3860_p7 = scmp.ge.s32.totalorder %s4315_s24, 1  ;;  %p215_p8 = scmp.lt.s32.totalorder %s4315_s24, 3 }
   0xc   : > { %p216_p9 = pnand %p3860_p7, %p215_p8 }
   0xe   : > { %219 = sbr.rel (%p216_p9) target bundleno = 1198 (0x4ae), region = 44 }
  0x13   : > { %v882_v0 = vld [vmem:[%s5738_s1] sm:$0xf]  ;;  %vm886_vm0 = vcmask 1043456   ;;  %v4317_v1 = vmov 0   ;;  %p245_p10 = scmp.lt.s32.totalorder %s4377_s25, 1  ;;  %vm661_vm2 = vcmask 27648  }
  0x14   : > { %3864 = vmatpush.msk.msra.mxu0 %vm886_vm0, %v882_v0  ;;  %322 = vst [vmem:[#allocation2 + $0x9c] sm:$0xf] %v4317_v1  ;;  %vm662_vm1 = vsmask.f32 7938  ;;  %vm811_vm4 = vcmask 31744   ;;  %vm917_vm5 = vcmask 1041408  }
  0x15   : > { %325 = vst [vmem:[#allocation2 + $0xa8] sm:$0xf] %v4317_v1  ;;  %s246_s11 = scalar_select %p245_p10, %s4377_s25, 1  ;;  %vm4457_vm3 = vmand %vm661_vm2, %vm662_vm1  ;;  %vm913_vm6 = vcmask 15360   ;;  %vm669_vm7 = vcmask 24576   ;;  %vm1589_vm14 = vcmask 1042432  }
  0x16   : > { %328 = vst [vmem:[#allocation2 + $0xb4] sm:$0xf] %v4317_v1  ;;  %s4318_s20 = smov 125   ;;  %s4319_s26 = smov 127   ;;  %vm337_vm8 = vsmask.f32 256 }
  0x17   : > { %331 = vst [vmem:[#allocation2 + $0xc0] sm:$0xf] %v4317_v1  ;;  %s4140_s12 = sshll.u32 %s246_s11, 7  ;;  %vm338_vm9 = vsmask.f32 4368  ;;  %s4320_s28 = smov 126   ;;  %vm4751_vm11 = vmand %vm669_vm7, %vm337_vm8 }
  0x18   : > { %283 = vst [vmem:[#allocation2] sm:$0xf] %v4317_v1  ;;  %s4420_s15 = scalar_lea.vmem %s5737_s0, %s4140_s12  ;;  %vm4724_vm10 = vmor %vm337_vm8, %vm338_vm9  ;;  %vm1138_vm12 = vsmask.f32 3328  ;;  %vm1139_vm13 = vsmask.f32 7440 }
  0x19   : > { %284 = vst [vmem:[#allocation2 + $0x4] sm:$0xf] %v4317_v1  ;;  %v4424_v2 = vld [vmem:[%s4420_s15 + $0x68] sm:$0xf]  ;;  %v4428_v3 = vld [vmem:[%s4420_s15 + $0x70] sm:$0xf]  ;;  %vm4793_vm1 = vmor %vm1138_vm12, %vm1139_vm13 }
  0x1a   : > { %285 = vst [vmem:[#allocation2 + $0x8] sm:$0x1] %v4317_v1  ;;  %v562_v4 = vshrl.u32 %v4424_v2, 16  ;;  %v565_v5 = vshll.u32 %v4424_v2, 16  ;;  %v251_v6 = vld [vmem:[%s4420_s15] sm:$0xf] }
  0x1b   : > { %286 = vst [vmem:[#allocation2 + $0xc] sm:$0xf] %v4317_v1  ;;  %v579_v7 = vshrl.u32 %v4428_v3, 16  ;;  %v582_v8 = vshll.u32 %v4428_v3, 16  ;;  %v252_v9 = vld [vmem:[%s4420_s15 + $0x4] sm:$0xf]  ;;  %v779_v19 = vunpack.c.l.bf16 %v251_v6 }
  0x1c   : > { %287 = vst [vmem:[#allocation2 + $0x10] sm:$0xf] %v4317_v1  ;;  %v4438_v10 = vrot.slane %v562_v4, 7  ;;  %v253_v11 = vld [vmem:[%s4420_s15 + $0x8] sm:$0xf]  ;;  %v780_v20 = vunpack.c.l.bf16 %v252_v9  ;;  %vm1590_vm15 = vcmask 1046532  }
  0x1d   : > { %288 = vst [vmem:[#allocation2 + $0x14] sm:$0x1] %v4317_v1  ;;  %v4442_v12 = vrot.slane %v579_v7, 7  ;;  %v254_v13 = vld [vmem:[%s4420_s15 + $0xc] sm:$0xf]  ;;  %v781_v26 = vunpack.c.l.bf16 %v253_v11  ;;  %v812_v32 = vsel %vm811_vm4, %v779_v19, 0.0  ;;  %vm4784_vm0 = vmor %vm1589_vm14, %vm1590_vm15 }
  0x1e   : > { %289 = vst [vmem:[#allocation2 + $0x18] sm:$0xf] %v4317_v1  ;;  %v567_v14 = vor.u32 %v565_v5, %v4438_v10  ;;  %v758_v15 = vld [vmem:[#allocation2 + $0xa8] sm:$0xf]  ;;  %v4449_v16 = vld [vmem:[%s4420_s15 + $0x78] sm:$0xf]  ;;  %v782_v30 = vunpack.c.l.bf16 %v254_v13 }
  0x1f   : > { %290 = vst [vmem:[#allocation2 + $0x1c] sm:$0xf] %v4317_v1  ;;  %v584_v17 = vor.u32 %v582_v8, %v4442_v12  ;;  %v765_v18 = vld [vmem:[#allocation2 + $0xb4] sm:$0xf]  ;;  %v596_v21 = vshrl.u32 %v4449_v16, 16  ;;  %v599_v22 = vshll.u32 %v4449_v16, 16 }
  0x20   : > { %291 = vst [vmem:[#allocation2 + $0x20] sm:$0x1] %v4317_v1  ;;  %v4463_v24 = vld [vmem:[%s4420_s15 + $0x10] sm:$0xf]  ;;  %v759_v25 = vsel %vm4457_vm3, %v567_v14, %v758_v15  ;;  %v4469_v27 = vld [vmem:[%s4420_s15 + $0x14] sm:$0xf] }
  0x21   : > { %292 = vst [vmem:[#allocation2 + $0x24] sm:$0xf] %v4317_v1  ;;  %v4471_v28 = vrot.slane %v596_v21, 7  ;;  %v766_v29 = vsel %vm4457_vm3, %v584_v17, %v765_v18  ;;  %v772_v31 = vld [vmem:[#allocation2 + $0xc0] sm:$0xf]  ;;  %v813_v33 = vsel %vm811_vm4, %v780_v20, 0.0  ;;  %v783_v35 = vunpack.c.l.bf16 %v4463_v24 }
  0x22   : > { %293 = vst [vmem:[#allocation2 + $0x28] sm:$0xf] %v4317_v1  ;;  %v4481_v36 = vld [vmem:[%s4420_s15 + $0x18] sm:$0xf]  ;;  %v814_v37 = vadd.f32 %v813_v33, %v812_v32  ;;  %v815_v38 = vsel %vm811_vm4, %v781_v26, 0.0  ;;  %v784_v40 = vunpack.c.l.bf16 %v4469_v27  ;;  %v817_v41 = vsel %vm811_vm4, %v782_v30, 0.0 }
  0x23   : > { %294 = vst [vmem:[#allocation2 + $0x2c] sm:$0x1] %v4317_v1  ;;  %v601_v34 = vor.u32 %v599_v22, %v4471_v28  ;;  %v4491_v42 = vld [vmem:[%s4420_s15 + $0x1c] sm:$0xf]  ;;  %v785_v44 = vunpack.c.l.bf16 %v4481_v36  ;;  %v819_v45 = vsel %vm811_vm4, %v783_v35, 0.0  ;;  %s242_s11 = sand.u32 1, %s4307_s22  }
  0x24   : > { %295 = vst [vmem:[#allocation2 + $0x30] sm:$0xf] %v4317_v1  ;;  %v816_v43 = vadd.f32 %v815_v38, %v814_v37  ;;  %v4497_v46 = vld [vmem:[%s4420_s15 + $0x20] sm:$0xf]  ;;  %v786_v48 = vunpack.c.l.bf16 %v4491_v42  ;;  %v821_v49 = vsel %vm811_vm4, %v784_v40, 0.0  ;;  %s3861_s12 = sshll.u32 %s242_s11, 4 }
  0x25   : > { %296 = vst [vmem:[#allocation2 + $0x34] sm:$0xf] %v4317_v1  ;;  %v773_v39 = vsel %vm4457_vm3, %v601_v34, %v772_v31  ;;  %v4504_v50 = vld [vmem:[%s4420_s15 + $0x24] sm:$0xf]  ;;  %v787_v52 = vunpack.c.l.bf16 %v4497_v46  ;;  %v823_v53 = vsel %vm811_vm4, %v785_v44, 0.0  ;;  %s244_s13 = scalar_lea.vmem [#allocation3], %s3861_s12 }
  0x26   : > { %5758 = vst [vmem:[#allocation6_spill] sm:$0xff] %v4471_v28  ;;  %v818_v47 = vadd.f32 %v817_v41, %v816_v43  ;;  %v4511_v54 = vld [vmem:[%s4420_s15 + $0x28] sm:$0xf]  ;;  %v788_v56 = vunpack.c.l.bf16 %v4504_v50  ;;  %v825_v57 = vsel %vm811_vm4, %v786_v48, 0.0  ;;  %v4518_v58 = vld [vmem:[%s4420_s15 + $0x2c] sm:$0xf] }
  0x27   : > { %760 = vst [vmem:[#allocation2 + $0xa8] sm:$0xf] %v759_v25  ;;  %v789_v60 = vunpack.c.l.bf16 %v4511_v54  ;;  %v827_v61 = vsel %vm811_vm4, %v787_v52, 0.0  ;;  %v4525_v62 = vld [vmem:[%s4420_s15 + $0x30] sm:$0xf]  ;;  %v790_v0 = vunpack.c.l.bf16 %v4518_v58  ;;  %s4189_s14 = sshll.u32 %s4377_s25, 4 }
  0x28   : > { %767 = vst [vmem:[#allocation2 + $0xb4] sm:$0xf] %v766_v29  ;;  %v820_v51 = vadd.f32 %v819_v45, %v818_v47  ;;  %v829_v4 = vsel %vm811_vm4, %v788_v56, 0.0  ;;  %v4532_v5 = vld [vmem:[%s4420_s15 + $0x34] sm:$0xf]  ;;  %v791_v7 = vunpack.c.l.bf16 %v4525_v62  ;;  %s3795_s18 = sshll.u32 %s244_s13, 4  ;;  %s3796_s18 = int_to_ptr.vmem [resolvable:$true] %s3795_s18 }
  0x29   : > { %297 = vst [vmem:[#allocation2 + $0x38] sm:$0x1] %v4317_v1  ;;  %v831_v8 = vsel %vm811_vm4, %v789_v60, 0.0  ;;  %v4539_v9 = vld [vmem:[%s4420_s15 + $0x38] sm:$0xf]  ;;  %v792_v13 = vunpack.c.l.bf16 %v4532_v5  ;;  %v833_v14 = vsel %vm811_vm4, %v790_v0, 0.0 }
  0x2a   : > { %298 = vst [vmem:[#allocation2 + $0x3c] sm:$0xf] %v4317_v1  ;;  %v822_v55 = vadd.f32 %v821_v49, %v820_v51  ;;  %v4546_v15 = vld [vmem:[%s4420_s15 + $0x3c] sm:$0xf]  ;;  %v793_v18 = vunpack.c.l.bf16 %v4539_v9  ;;  %v835_v19 = vsel %vm811_vm4, %v791_v7, 0.0  ;;  %s4273_s9 = scalar_lea.hbm %s5743_s6, 32 }
  0x2b   : > { %299 = vst [vmem:[#allocation2 + $0x40] sm:$0xf] %v4317_v1  ;;  %v4553_v20 = vld [vmem:[%s4420_s15 + $0x40] sm:$0xf]  ;;  %v794_v26 = vunpack.c.l.bf16 %v4546_v15  ;;  %v837_v29 = vsel %vm811_vm4, %v792_v13, 0.0 }
  0x2c   : > { %774 = vst [vmem:[#allocation2 + $0xc0] sm:$0xf] %v773_v39  ;;  %v824_v59 = vadd.f32 %v823_v53, %v822_v55  ;;  %v4556_v21 = vld [vmem:[%s4420_s15 + $0x60] sm:$0xf]  ;;  %v4564_v30 = vld [vmem:[%s4420_s15 + $0x44] sm:$0xf]  ;;  %v795_v32 = vunpack.c.l.bf16 %v4553_v20 }
  0x2d   : > { %300 = vst [vmem:[#allocation2 + $0x44] sm:$0x1] %v4317_v1  ;;  %v545_v25 = vshrl.u32 %v4556_v21, 16  ;;  %v839_v33 = vsel %vm811_vm4, %v793_v18, 0.0  ;;  %v4571_v34 = vld [vmem:[%s4420_s15 + $0x48] sm:$0xf]  ;;  %v796_v39 = vunpack.c.l.bf16 %v4564_v30 }
  0x2e   : > { %301 = vst [vmem:[#allocation2 + $0x48] sm:$0xf] %v4317_v1  ;;  %v826_v63 = vadd.f32 %v825_v57, %v824_v59  ;;  %v548_v38 = vshll.u32 %v4556_v21, 16  ;;  %v841_v40 = vsel %vm811_vm4, %v794_v26, 0.0  ;;  %v4581_v41 = vld [vmem:[%s4420_s15 + $0x4c] sm:$0xf]  ;;  %v797_v44 = vunpack.c.l.bf16 %v4571_v34 }
  0x2f   : > { %302 = vst [vmem:[#allocation2 + $0x4c] sm:$0xf] %v4317_v1  ;;  %v4574_v37 = vrot.slane %v545_v25, 7  ;;  %v843_v45 = vsel %vm811_vm4, %v795_v32, 0.0  ;;  %v4588_v47 = vld [vmem:[%s4420_s15 + $0x50] sm:$0xf]  ;;  %v798_v51 = vunpack.c.l.bf16 %v4581_v41 }
  0x30   : > { %303 = vst [vmem:[#allocation2 + $0x50] sm:$0x1] %v4317_v1  ;;  %v828_v6 = vadd.f32 %v827_v61, %v826_v63  ;;  %v845_v52 = vsel %vm811_vm4, %v796_v39, 0.0  ;;  %v4596_v53 = vld [vmem:[%s4420_s15 + $0x54] sm:$0xf]  ;;  %v799_v57 = vunpack.c.l.bf16 %v4588_v47  ;;  %v847_v59 = vsel %vm811_vm4, %v797_v44, 0.0 }
  0x31   : > { %304 = vst [vmem:[#allocation2 + $0x54] sm:$0xf] %v4317_v1  ;;  %v550_v49 = vor.u32 %v548_v38, %v4574_v37  ;;  %v751_v55 = vld [vmem:[#allocation2 + $0x9c] sm:$0xf]  ;;  %v4603_v60 = vld [vmem:[%s4420_s15 + $0x58] sm:$0xf]  ;;  %v800_v0 = vunpack.c.l.bf16 %v4596_v53  ;;  %v807_v44 = vunpack.c.l.bf16 %v4428_v3 }
  0x32   : > { %305 = vst [vmem:[#allocation2 + $0x58] sm:$0xf] %v4317_v1  ;;  %v830_v11 = vadd.f32 %v829_v4, %v828_v6  ;;  %v849_v4 = vsel %vm811_vm4, %v798_v51, 0.0  ;;  %v4612_v6 = vld [vmem:[%s4420_s15 + $0x5c] sm:$0xf] }
  0x33   : > { %306 = vst [vmem:[#allocation2 + $0x5c] sm:$0x1] %v4317_v1  ;;  %v752_v63 = vsel %vm4457_vm3, %v550_v49, %v751_v55  ;;  %v4621_v18 = vld [vmem:[%s4420_s15 + $0x64] sm:$0xf]  ;;  %v809_v55 = vunpack.c.l.bf16 %v4449_v16 }
  0x34   : > { %307 = vst [vmem:[#allocation2 + $0x60] sm:$0xf] %v4317_v1  ;;  %v832_v17 = vadd.f32 %v831_v8, %v830_v11  ;;  %v801_v8 = vunpack.c.l.bf16 %v4603_v60  ;;  %v851_v11 = vsel %vm811_vm4, %v799_v57, 0.0 }
  0x35   : > { %308 = vst [vmem:[#allocation2 + $0x64] sm:$0xf] %v4317_v1 }
  0x36   : > { %309 = vst [vmem:[#allocation2 + $0x68] sm:$0x1] %v4317_v1  ;;  %v834_v22 = vadd.f32 %v833_v14, %v832_v17  ;;  %v802_v14 = vunpack.c.l.bf16 %v4612_v6  ;;  %v853_v17 = vsel %vm811_vm4, %v800_v0, 0.0  ;;  %v855_v25 = vsel %vm811_vm4, %v801_v8, 0.0 }
  0x37   : > { %310 = vst [vmem:[#allocation2 + $0x6c] sm:$0xf] %v4317_v1 }
  0x38   : > { %311 = vst [vmem:[#allocation2 + $0x70] sm:$0xf] %v4317_v1  ;;  %v836_v31 = vadd.f32 %v835_v19, %v834_v22  ;;  %v803_v22 = vunpack.c.l.bf16 %v4556_v21 }
  0x39   : > { %312 = vst [vmem:[#allocation2 + $0x74] sm:$0x1] %v4317_v1 }
  0x3a   : > { %313 = vst [vmem:[#allocation2 + $0x78] sm:$0xf] %v4317_v1  ;;  %v838_v35 = vadd.f32 %v837_v29, %v836_v31  ;;  %v804_v29 = vunpack.c.l.bf16 %v4621_v18  ;;  %v4628_v31 = vld [vmem:[%s4420_s15 + $0x6c] sm:$0xf] }
  0x3b   : > { %314 = vst [vmem:[#allocation2 + $0x7c] sm:$0xf] %v4317_v1  ;;  %v806_v39 = vunpack.c.l.bf16 %v4628_v31 }
  0x3c   : > { %315 = vst [vmem:[#allocation2 + $0x80] sm:$0x1] %v4317_v1  ;;  %v840_v43 = vadd.f32 %v839_v33, %v838_v35  ;;  %v805_v33 = vunpack.c.l.bf16 %v4424_v2  ;;  %v859_v35 = vsel %vm811_vm4, %v803_v22, 0.0  ;;  %v861_v21 = vsel %vm811_vm4, %v804_v29, 0.0  ;;  %v4642_v2 = vld [vmem:[%s4420_s15 + $0x7c] sm:$0xf] }
  0x3d   : > { %316 = vst [vmem:[#allocation2 + $0x84] sm:$0xf] %v4317_v1  ;;  %v865_v51 = vsel %vm811_vm4, %v806_v39, 0.0 }
  0x3e   : > { %317 = vst [vmem:[#allocation2 + $0x88] sm:$0xf] %v4317_v1  ;;  %v842_v48 = vadd.f32 %v841_v40, %v840_v43  ;;  %v4635_v40 = vld [vmem:[%s4420_s15 + $0x74] sm:$0xf] }
  0x3f   : > { %318 = vst [vmem:[#allocation2 + $0x8c] sm:$0x1] %v4317_v1  ;;  %v808_v49 = vunpack.c.l.bf16 %v4635_v40 }
  0x40   : > { %319 = vst [vmem:[#allocation2 + $0x90] sm:$0xf] %v4317_v1  ;;  %v844_v56 = vadd.f32 %v843_v45, %v842_v48  ;;  %v863_v45 = vsel %vm811_vm4, %v805_v33, 0.0 }
  0x41   : > { %320 = vst [vmem:[#allocation2 + $0x94] sm:$0xf] %v4317_v1 }
  0x42   : > { %5759 = vst [vmem:[#allocation7_spill] sm:$0xff] %v4571_v34  ;;  %v846_v61 = vadd.f32 %v845_v52, %v844_v56  ;;  %v867_v56 = vsel %vm811_vm4, %v807_v44, 0.0 }
  0x43   : > { %321 = vst [vmem:[#allocation2 + $0x98] sm:$0x1] %v4317_v1 }
  0x44   : > { %323 = vst [vmem:[#allocation2 + $0xa0] sm:$0xf] %v4317_v1  ;;  %v848_v7 = vadd.f32 %v847_v59, %v846_v61  ;;  %v810_v59 = vunpack.c.l.bf16 %v4642_v2  ;;  %v869_v61 = vsel %vm811_vm4, %v808_v49, 0.0 }
  0x45   : > { %5760 = vst [vmem:[#allocation8_spill] sm:$0xff] %v4581_v41 }
  0x46   : > { %324 = vst [vmem:[#allocation2 + $0xa4] sm:$0x1] %v4317_v1  ;;  %v850_v13 = vadd.f32 %v849_v4, %v848_v7  ;;  %v873_v4 = vsel %vm811_vm4, %v810_v59, 0.0  ;;  %v502_v59 = vshrl.u32 %v4581_v41, 16 }
  0x47   : > { %326 = vst [vmem:[#allocation2 + $0xac] sm:$0xf] %v4317_v1 }
  0x48   : > { %327 = vst [vmem:[#allocation2 + $0xb0] sm:$0x1] %v4317_v1  ;;  %v852_v19 = vadd.f32 %v851_v11, %v850_v13 }
  0x49   : > { %329 = vst [vmem:[#allocation2 + $0xb8] sm:$0xf] %v4317_v1 }
  0x4a   : > { %330 = vst [vmem:[#allocation2 + $0xbc] sm:$0x1] %v4317_v1  ;;  %v854_v26 = vadd.f32 %v853_v17, %v852_v19 }
  0x4b   : > { %332 = vst [vmem:[#allocation2 + $0xc4] sm:$0xf] %v4317_v1 }
  0x4c   : > { %333 = vst [vmem:[#allocation2 + $0xc8] sm:$0x1] %v4317_v1  ;;  %v856_v32 = vadd.f32 %v855_v25, %v854_v26  ;;  %v911_v25 = vld [vmem:[%s5739_s2] sm:$0x3] }
  0x4d   : > { %334 = vst [vmem:[#allocation2 + $0xcc] sm:$0xf] %v4317_v1  ;;  %3866 = vmatpush.msk.msra.mxu1 %vm917_vm5, %v911_v25  ;;  %v553_v25 = vshrl.u32 %v4621_v18, 16 }
  0x4e   : > { %335 = vst [vmem:[#allocation2 + $0xd0] sm:$0xf] %v4317_v1 }
  0x4f   : > { %336 = vst [vmem:[#allocation2 + $0xd4] sm:$0x1] %v4317_v1  ;;  %v857_v1 = vsel %vm811_vm4, %v802_v14, 0.0 }
  0x50   : > { %753 = vst [vmem:[#allocation2 + $0x9c] sm:$0xf] %v752_v63  ;;  %v858_v38 = vadd.f32 %v857_v1, %v856_v32  ;;  %v871_v63 = vsel %vm811_vm4, %v809_v55, 0.0  ;;  %v912_v1 = vld [vmem:[%s5740_s3] sm:$0x1]  ;;  %v519_v55 = vshrl.u32 %v4596_v53, 16 }
  0x52   : > { %v860_v43 = vadd.f32 %v859_v35, %v858_v38 }
  0x54   : > { %v862_v48 = vadd.f32 %v861_v21, %v860_v43 }
  0x56   : > { %v864_v52 = vadd.f32 %v863_v45, %v862_v48 }
  0x58   : > { %v866_v57 = vadd.f32 %v865_v51, %v864_v52  ;;  %v511_v51 = vshrl.u32 %v4588_v47, 16 }
  0x5a   : > { %v868_v3 = vadd.f32 %v867_v56, %v866_v57  ;;  %v477_v56 = vshrl.u32 %v4553_v20, 16  ;;  %v485_v57 = vshrl.u32 %v4564_v30, 16 }
  0x5c   : > { %v870_v0 = vadd.f32 %v869_v61, %v868_v3  ;;  %v494_v61 = vshrl.u32 %v4571_v34, 16 }
  0x5e   : > { %v872_v7 = vadd.f32 %v871_v63, %v870_v0  ;;  %v4671_v63 = vrot.slane %v511_v51, 7  ;;  %v514_v0 = vshll.u32 %v4588_v47, 16 }
  0x60   : > { %v874_v8 = vadd.f32 %v873_v4, %v872_v7  ;;  %5761 = vst [vmem:[#allocation9_spill] sm:$0xff] %v4671_v63  ;;  %v4675_v7 = vrot.slane %v519_v55, 7  ;;  %v454_v55 = vshll.u32 %v4532_v5, 16 }
  0x62   : > { %v875_v11 = vrot.slane %v874_v8, 4  ;;  %5762 = vst [vmem:[#allocation10_spill] sm:$0xff] %v4675_v7 }
  0x64   : > { %v876_v13 = vadd.f32 %v875_v11, %v874_v8  ;;  %v522_v8 = vshll.u32 %v4596_v53, 16  ;;  %v528_v11 = vshrl.u32 %v4603_v60, 16  ;;  %v409_v53 = vshrl.u32 %v4497_v46, 16 }
  0x66   : > { %v877_v14 = vrot.slane %v876_v13, 2 }
  0x68   : > { %v878_v17 = vadd.f32 %v877_v14, %v876_v13  ;;  %v4679_v13 = vrot.slane %v477_v56, 7  ;;  %v4681_v14 = vrot.slane %v485_v57, 7  ;;  %v434_v56 = vshrl.u32 %v4518_v58, 16 }
  0x6a   : > { %v879_v16 = vrot.slane %v878_v17, 1 }
  0x6c   : > { %v880_v19 = vadd.f32 %v879_v16, %v878_v17  ;;  %v4684_v16 = vrot.slane %v502_v59, 7  ;;  %v713_v17 = vld [vmem:[#allocation2 + $0x5c] sm:$0x1] }
  0x6e   : > { %v881_v22 = vmul.f32 0.00390625, %v880_v19  ;;  %5763 = vst [vmem:[#allocation11_spill] sm:$0xff] %v4684_v16  ;;  %v4686_v19 = vrot.slane %v494_v61, 7  ;;  %v573_v61 = vshll.u32 %v4628_v31, 16 }
  0x70   : > { %3865 = vmatmul.msk.f32.vlgmr.msra.gmra.mxu0 %vm811_vm4, %v881_v22  ;;  %5764 = vst [vmem:[#allocation12_spill] sm:$0xff] %v4686_v19  ;;  %v536_v22 = vshrl.u32 %v4612_v6, 16 }
  0xed   : > { %v907_v26 = vpop.f32.mrf.mxu0 }
  0xee   : > { %v910_v29 = vmax.f32 %v907_v26, 0.0 }
  0xf0   : > { %3867 = vmatmul.msk.f32.vlgmr.msra.gmra.mxu1 %vm913_vm6, %v910_v29  ;;  %v4694_v29 = vor.u32 %v514_v0, %v4671_v63 }
  0xf2   : > { %5765 = vst [vmem:[#allocation13_spill] sm:$0xff] %v4694_v29 }
 0x16d   : > { %v938_v32 = vpop.f32.mrf.mxu1 }
 0x16e   : > { %v939_v33 = vadd.f32 %v938_v32, %v912_v1  ;;  %v531_v1 = vshll.u32 %v4603_v60, 16  ;;  %v539_v60 = vshll.u32 %v4612_v6, 16  ;;  %v468_v32 = vshrl.u32 %v4546_v15, 16 }
 0x170   : > { %v941_v35 = vmul.f32 0.029411765, %v939_v33  ;;  %v4699_v33 = vor.u32 %v522_v8, %v4675_v7 }
 0x172   : > { %v943_v38 = vsel %vm669_vm7, %v941_v35, -inf }
 0x173   : > { %944 = vmax.xlane.f32.xlu0 %v943_v38  ;;  %v570_v38 = vshrl.u32 %v4628_v31, 16  ;;  %v604_v31 = vshrl.u32 %v4642_v2, 16 }
 0x175   : > { %v4719_v59 = vrot.slane %v570_v38, 7  ;;  %v4761_v26 = vrot.slane %v604_v31, 7  ;;  %v460_v31 = vshrl.u32 %v4539_v9, 16 }
 0x177   : > { %5770 = vst [vmem:[#allocation14_spill] sm:$0xff] %v4761_v26 }
 0x1e6   : > { %v945_v39 = vpop.xlane.xlu0 %944 }
 0x1e7   : > { %v946_v21 = vsub.f32 %v941_v35, %v945_v39  ;;  %v4701_v35 = vrot.slane %v528_v11, 7  ;;  %v443_v39 = vshrl.u32 %v4525_v62, 16 }
 0x1e9   : > { %v947_v43 = vmul.f32 1.442695, %v946_v21  ;;  %v451_v21 = vshrl.u32 %v4532_v5, 16  ;;  %v4717_v57 = vor.u32 %v531_v1, %v4701_v35  ;;  %v4776_v1 = vrot.slane %v468_v32, 7 }
 0x1eb   : > { %4241 = vpow2.f32 %v947_v43  ;;  %v4707_v43 = vrot.slane %v536_v22, 7  ;;  %v453_v51 = vrot.slane %v451_v21, 7  ;;  %v471_v22 = vshll.u32 %v4546_v15, 16 }
 0x1ed   : > { %v456_v5 = vor.u32 %v454_v55, %v453_v51  ;;  %v4731_v11 = vor.u32 %v539_v60, %v4707_v43 }
 0x1f1   : > { %v4242_v44 = vpop.eup %4241 }
 0x1f2   : > { %v949_v45 = vsel %vm669_vm7, %v4242_v44, 0.0 }
 0x1f3   : > { %950 = vadd.xlane.f32.xlu0 %v949_v45  ;;  %v556_v45 = vshll.u32 %v4621_v18, 16 }
 0x266   : > { %v951_v48 = vpop.xlane.xlu0 %950 }
 0x267   : > { %4243 = vrcp.f32 %v951_v48  ;;  %v445_v48 = vrot.slane %v443_v39, 7 }
 0x269   : > { %v449_v0 = vrot.slane %v445_v48, 4 }
 0x26b   : > { %v457_v39 = vsel %vm4724_vm10, %v449_v0, %v456_v5 }
 0x26c   : > { %712 = vst.msk [vmem:[#allocation2 + $0x58] sm:$0xf] %vm661_vm2, %v457_v39  ;;  %v463_v39 = vshll.u32 %v4539_v9, 16 }
 0x26d   : > { %v4244_v49 = vpop.eup %4243 }
 0x26e   : > { %v4660_v52 = vmul.f32 %v4244_v49, %v4242_v44  ;;  %v4710_v44 = vrot.slane %v553_v25, 7  ;;  %v446_v49 = vshll.u32 %v4525_v62, 16  ;;  %v587_v62 = vshrl.u32 %v4635_v40, 16  ;;  %v709_v25 = vld [vmem:[#allocation2 + $0x54] sm:$0xf] }
 0x270   : > { %1058 = vrot.lane.b32.xlu2 %v4660_v52, %s4318_s20  ;;  %992 = vrot.lane.b32.xlu1 %v4660_v52, %s4319_s26  ;;  %4190 = vpush %v4660_v52  ;;  %v448_v18 = vor.u32 %v446_v49, %v445_v48  ;;  %v4737_v38 = vor.u32 %v556_v45, %v4710_v44  ;;  %v4756_v5 = vrot.slane %v587_v62, 7  ;;  %v955_v62 = vperm.slane %v4660_v52, 0  ;;  %s3782_s20 = scalar_lea.sflag [#allocation4], %s242_s11 }
 0x271   : > { %v4746_v49 = vor.u32 %v573_v61, %v4719_v59  ;;  %v429_v48 = vshll.u32 %v4511_v54, 16  ;;  %v473_v61 = vor.u32 %v471_v22, %v4776_v1 }
 0x272   : > { %v710_v21 = vsel %vm4457_vm3, %v448_v18, %v709_v25  ;;  %v458_v18 = vrot.slane %v453_v51, 4  ;;  %v426_v25 = vshrl.u32 %v4511_v54, 16 }
 0x273   : > { %711 = vst [vmem:[#allocation2 + $0x54] sm:$0xf] %v710_v21  ;;  %v954_v21 = vld [vmem:[%s5742_s5] sm:$0xff]  ;;  %v1105_v3 = vld [vmem:[#allocation2 + $0x58] sm:$0xf] }
 0x274   : > { %v714_v51 = vsel %vm4751_vm11, %v458_v18, %v713_v17  ;;  %v428_v8 = vrot.slane %v426_v25, 7  ;;  %v436_v17 = vrot.slane %v434_v56, 7  ;;  %v437_v18 = vshll.u32 %v4518_v58, 16 }
 0x275   : > { %715 = vst [vmem:[#allocation2 + $0x5c] sm:$0x1] %v714_v51  ;;  %v4779_v51 = vmul.f32 %v955_v62, %v954_v21  ;;  %v1319_v56 = vshll.u32 %v1105_v3, 16  ;;  %v1323_v21 = vshrl.u32 %v1105_v3, 16  ;;  %v1643_v62 = vrot.slane %v1105_v3, 5 }
 0x276   : > { %v431_v0 = vor.u32 %v429_v48, %v428_v8  ;;  %v432_v9 = vrot.slane %v428_v8, 4  ;;  %v716_v48 = vld [vmem:[#allocation2 + $0x60] sm:$0xf]  ;;  %v441_v41 = vrot.slane %v436_v17, 4 }
 0x277   : > { %v1321_v34 = vrot.slane %v1319_v56, 5  ;;  %v1325_v19 = vrot.slane %v1323_v21, 4 }
 0x278   : > { %1025 = vrot.lane.b32.xlu1 %v4660_v52, %s4320_s28  ;;  %v462_v52 = vrot.slane %v460_v31, 7 }
 0x279   : > { %v1326_v22 = vor.u32 %v1325_v19, %v1321_v34 }
 0x27a   : > { %v1104_v55 = vld [vmem:[#allocation2 + $0x54] sm:$0xf]  ;;  %v465_v58 = vor.u32 %v463_v39, %v462_v52  ;;  %v466_v31 = vrot.slane %v462_v52, 4  ;;  %v706_v52 = vld [vmem:[#allocation2 + $0x50] sm:$0x1] }
 0x27b   : > { %v1532_v60 = vld [vmem:[#allocation2 + $0x54] sm:$0xe]  ;;  %v1310_v15 = vshrl.u32 %v1104_v55, 16  ;;  %v1313_v25 = vshll.u32 %v1104_v55, 16  ;;  %v702_v55 = vld [vmem:[#allocation2 + $0x48] sm:$0xf] }
 0x27c   : > { %v4148_v4 = vld [vmem:[#allocation2 + $0x54] sm:$0xff]  ;;  %v3902_v32 = vrot.slane %v1532_v60, 9  ;;  %v1129_v16 = vld [vmem:[#allocation2 + $0x5c] sm:$0x1]  ;;  %v1645_v60 = vrot.slane %v1643_v62, 4  ;;  %v1327_v21 = vrot.slane %v1326_v22, 4 }
 0x27d   : > { %3545 = vmatpush.bf16.xpose.msra.mxu2 %v4148_v4  ;;  %v1312_v8 = vrot.slane %v1310_v15, 4  ;;  %v1315_v47 = vrot.slane %v1313_v25, 5  ;;  %v1329_v29 = vshll.u32 %v1129_v16, 16  ;;  %v1646_v63 = vrot.slane %v1129_v16, 5 }
 0x27e   : > { %v1644_v7 = vsel %vm4784_vm0, %v3902_v32, %v1643_v62  ;;  %v474_v15 = vsel %vm4724_vm10, %v466_v31, %v473_v61  ;;  %v717_v25 = vsel %vm4457_vm3, %v465_v58, %v716_v48  ;;  %v439_v32 = vor.u32 %v437_v18, %v436_v17  ;;  %v695_v48 = vld [vmem:[#allocation2 + $0x3c] sm:$0xf] }
 0x27f   : > { %v1316_v39 = vor.u32 %v1315_v47, %v1312_v8  ;;  %v3079_v3 = vunpack.c.l.b16 %v1644_v7  ;;  %v1331_v47 = vrot.slane %v1329_v29, 5  ;;  %v1647_v7 = vsel %vm4784_vm0, %v1645_v60, %v1646_v63  ;;  %718 = vst [vmem:[#allocation2 + $0x60] sm:$0xf] %v717_v25 }
 0x280   : > { %v703_v16 = vsel %vm4457_vm3, %v431_v0, %v702_v55  ;;  %v3080_v62 = vunpack.c.l.b16 %v1647_v7  ;;  %719 = vst.msk [vmem:[#allocation2 + $0x64] sm:$0xf] %vm661_vm2, %v474_v15  ;;  %v440_v19 = vsel %vm4724_vm10, %v432_v9, %v439_v32  ;;  %v707_v61 = vsel %vm4751_vm11, %v441_v41, %v706_v52  ;;  %v699_v15 = vld [vmem:[#allocation2 + $0x44] sm:$0x1] }
 0x281   : > { %v1317_v56 = vrot.slane %v1316_v39, 4  ;;  %704 = vst [vmem:[#allocation2 + $0x48] sm:$0xf] %v703_v16  ;;  %v411_v17 = vrot.slane %v409_v53, 7  ;;  %v412_v63 = vshll.u32 %v4497_v46, 16  ;;  %v417_v18 = vshrl.u32 %v4504_v50, 16 }
 0x282   : > { %v1332_v0 = vsel %vm4793_vm1, %v1327_v21, %v1331_v47  ;;  %v3104_v31 = vpack.c.b16 %v3080_v62, %v3079_v3  ;;  %705 = vst.msk [vmem:[#allocation2 + $0x4c] sm:$0xf] %vm661_vm2, %v440_v19  ;;  %v420_v9 = vshll.u32 %v4504_v50, 16  ;;  %v392_v46 = vshrl.u32 %v4481_v36, 16  ;;  %v688_v62 = vld [vmem:[#allocation2 + $0x30] sm:$0xf] }
 0x283   : > { %v1322_v29 = vsel %vm4793_vm1, %v1317_v56, %v1321_v34  ;;  %v3016_v41 = vunpack.c.l.b16 %v1332_v0  ;;  %708 = vst [vmem:[#allocation2 + $0x50] sm:$0x1] %v707_v61  ;;  %v414_v8 = vor.u32 %v412_v63, %v411_v17  ;;  %v415_v34 = vrot.slane %v411_v17, 4 }
 0x284   : > { %v3015_v58 = vunpack.c.l.b16 %v1322_v29  ;;  %v419_v55 = vrot.slane %v417_v18, 7  ;;  %3571 = vmatpush.bf16.xpose.msrb.mxu0 %v3104_v31  ;;  %v395_v53 = vshll.u32 %v4481_v36, 16  ;;  %v400_v60 = vshrl.u32 %v4491_v42, 16 }
 0x285   : > { %v403_v39 = vshll.u32 %v4491_v42, 16  ;;  %v696_v50 = vsel %vm4457_vm3, %v414_v8, %v695_v48  ;;  %v394_v56 = vrot.slane %v392_v46, 7  ;;  %v957_v42 = vsel %vm811_vm4, %v4779_v51, 0.0 }
 0x286   : > { %v3040_v3 = vpack.c.b16 %v3016_v41, %v3015_v58  ;;  %v422_v52 = vor.u32 %v420_v9, %v419_v55  ;;  %v424_v22 = vrot.slane %v419_v55, 4  ;;  %697 = vst [vmem:[#allocation2 + $0x3c] sm:$0xf] %v696_v50  ;;  %v4826_v47 = vrot.slane %v400_v60, 7 }
 0x287   : > { %v475_v7 = vrot.slane %v4776_v1, 4  ;;  %v4164_v16 = vld [vmem:[#allocation2 + $0x60] sm:$0xff]  ;;  %v5775_v19 = vshll.u32 %v4635_v40, 16  ;;  %v5776_v29 = vshll.u32 %v4642_v2, 16  ;;  %v397_v0 = vor.u32 %v395_v53, %v394_v56 }
 0x288   : > { %3558 = vmatpush.bf16.xpose.msra.mxu3 %v3040_v3  ;;  %v423_v21 = vsel %vm4724_vm10, %v415_v34, %v422_v52  ;;  %v1102_v63 = vld [vmem:[#allocation2 + $0x48] sm:$0xf]  ;;  %v700_v18 = vsel %vm4751_vm11, %v424_v22, %v699_v15  ;;  %3584 = vmatpush.bf16.xpose.msrb.mxu1 %v4164_v16  ;;  %v405_v41 = vor.u32 %v403_v39, %v4826_v47  ;;  %v4163_v16 = vld [vmem:[#allocation2 + $0x54] sm:$0xff] }
 0x289   : > { %v4837_v61 = vor.u32 %v5775_v19, %v4756_v5  ;;  %v4842_v17 = vor.u32 %v5776_v29, %v4761_v26  ;;  %v1531_v51 = vld [vmem:[#allocation2 + $0x48] sm:$0xe]  ;;  %698 = vst.msk [vmem:[#allocation2 + $0x40] sm:$0xf] %vm661_vm2, %v423_v21  ;;  %v1103_v31 = vld [vmem:[#allocation2 + $0x4c] sm:$0xf]  ;;  %v689_v46 = vsel %vm4457_vm3, %v397_v0, %v688_v62 }
 0x28a   : > { %v4147_v58 = vld [vmem:[#allocation2 + $0x48] sm:$0xff]  ;;  %v1286_v9 = vshrl.u32 %v1102_v63, 16  ;;  %v1289_v40 = vshll.u32 %v1102_v63, 16  ;;  %v3901_v48 = vrot.slane %v1531_v51, 9  ;;  %v1128_v8 = vld [vmem:[#allocation2 + $0x50] sm:$0x1] }
 0x28b   : > { %5777 = vst [vmem:[#allocation15_spill] sm:$0xff] %v4842_v17  ;;  %v1295_v2 = vshll.u32 %v1103_v31, 16  ;;  %v1299_v34 = vshrl.u32 %v1103_v31, 16  ;;  %v1636_v55 = vrot.slane %v1103_v31, 5  ;;  %3546 = vmatpush.bf16.xpose.msra.mxu2 %v4147_v58  ;;  %v1305_v53 = vshll.u32 %v1128_v8, 16 }
 0x28c   : > { %v1288_v60 = vrot.slane %v1286_v9, 4  ;;  %v1291_v3 = vrot.slane %v1289_v40, 5  ;;  %v1639_v52 = vrot.slane %v1128_v8, 5  ;;  %701 = vst [vmem:[#allocation2 + $0x44] sm:$0x1] %v700_v18 }
 0x28d   : > { %v1297_v22 = vrot.slane %v1295_v2, 5  ;;  %v1301_v50 = vrot.slane %v1299_v34, 4  ;;  %v1637_v15 = vsel %vm4784_vm0, %v3901_v48, %v1636_v55  ;;  %v1638_v39 = vrot.slane %v1636_v55, 4  ;;  %690 = vst [vmem:[#allocation2 + $0x30] sm:$0xf] %v689_v46 }
 0x28e   : > { %v1292_v21 = vor.u32 %v1291_v3, %v1288_v60  ;;  %v1307_v19 = vrot.slane %v1305_v53, 5  ;;  %v3077_v29 = vunpack.c.l.b16 %v1637_v15  ;;  %v1100_v63 = vld [vmem:[#allocation2 + $0x3c] sm:$0xf] }
 0x28f   : > { %v1530_v62 = vld [vmem:[#allocation2 + $0x3c] sm:$0xe]  ;;  %v1302_v51 = vor.u32 %v1301_v50, %v1297_v22  ;;  %v1640_v0 = vsel %vm4784_vm0, %v1638_v39, %v1639_v52  ;;  %v1262_v58 = vshrl.u32 %v1100_v63, 16  ;;  %v1265_v18 = vshll.u32 %v1100_v63, 16 }
 0x290   : > { %v1293_v31 = vrot.slane %v1292_v21, 4  ;;  %v3078_v9 = vunpack.c.l.b16 %v1640_v0  ;;  %v4146_v40 = vld [vmem:[#allocation2 + $0x3c] sm:$0xff]  ;;  %v3900_v48 = vrot.slane %v1530_v62, 9  ;;  %3585 = vmatpush.bf16.xpose.msrb.mxu1 %v4163_v16 }
 0x291   : > { %v1101_v8 = vld [vmem:[#allocation2 + $0x40] sm:$0xf]  ;;  %v1303_v34 = vrot.slane %v1302_v51, 4  ;;  %v1264_v55 = vrot.slane %v1262_v58, 4  ;;  %v1267_v46 = vrot.slane %v1265_v18, 5 }
 0x292   : > { %v1271_v60 = vshll.u32 %v1101_v8, 16  ;;  %v3103_v3 = vpack.c.b16 %v3078_v9, %v3077_v29  ;;  %v1275_v53 = vshrl.u32 %v1101_v8, 16  ;;  %v1629_v52 = vrot.slane %v1101_v8, 5  ;;  %v4162_v8 = vld [vmem:[#allocation2 + $0x48] sm:$0xff] }
 0x293   : > { %v1308_v50 = vsel %vm4793_vm1, %v1303_v34, %v1307_v19  ;;  %v1127_v39 = vld [vmem:[#allocation2 + $0x44] sm:$0x1]  ;;  %v1268_v21 = vor.u32 %v1267_v46, %v1264_v55  ;;  %3547 = vmatpush.bf16.xpose.msra.mxu2 %v4146_v40 }
 0x294   : > { %v3014_v63 = vunpack.c.l.b16 %v1308_v50  ;;  %3572 = vmatpush.bf16.xpose.msrb.mxu0 %v3103_v3  ;;  %v1277_v62 = vrot.slane %v1275_v53, 4  ;;  %v1098_v29 = vld [vmem:[#allocation2 + $0x30] sm:$0xf]  ;;  %v1631_v0 = vrot.slane %v1629_v52, 4  ;;  %v1632_v58 = vrot.slane %v1127_v39, 5 }
 0x295   : > { %v1269_v51 = vrot.slane %v1268_v21, 4  ;;  %v1238_v55 = vshrl.u32 %v1098_v29, 16  ;;  %v1529_v46 = vld [vmem:[#allocation2 + $0x30] sm:$0xe] }
 0x296   : > { %v1633_v34 = vsel %vm4784_vm0, %v1631_v0, %v1632_v58  ;;  %v375_v58 = vshrl.u32 %v4463_v24, 16  ;;  %v2317_v36 = vld [vmem:[#allocation2 + $0x30] sm:$0xf] }
 0x297   : > { %v3076_v3 = vunpack.c.l.b16 %v1633_v34 }
 0x298   : > { %3586 = vmatpush.bf16.xpose.msrb.mxu1 %v4162_v8 }
 0x299   : > { %958 = vadd.xlane.f32.xlu2 %v957_v42  ;;  %v398_v42 = vrot.slane %v394_v56, 4  ;;  %v1298_v56 = vsel %vm4793_vm1, %v1293_v31, %v1297_v22  ;;  %v1630_v22 = vsel %vm4784_vm0, %v3900_v48, %v1629_v52  ;;  %v407_v48 = vrot.slane %v4826_v47, 4 }
 0x29a   : > { %v3013_v15 = vunpack.c.l.b16 %v1298_v56  ;;  %v3075_v9 = vunpack.c.l.b16 %v1630_v22  ;;  %v1241_v52 = vshll.u32 %v1098_v29, 16 }
 0x29b   : > { %v406_v2 = vsel %vm4724_vm10, %v398_v42, %v405_v41  ;;  %v1273_v41 = vrot.slane %v1271_v60, 5  ;;  %v1281_v42 = vshll.u32 %v1127_v39, 16 }
 0x29c   : > { %691 = vst.msk [vmem:[#allocation2 + $0x34] sm:$0xf] %vm661_vm2, %v406_v2  ;;  %v3039_v19 = vpack.c.b16 %v3014_v63, %v3013_v15  ;;  %v692_v2 = vld [vmem:[#allocation2 + $0x38] sm:$0x1]  ;;  %v1240_v15 = vrot.slane %v1238_v55, 4  ;;  %v3102_v63 = vpack.c.b16 %v3076_v3, %v3075_v9  ;;  %v1243_v47 = vrot.slane %v1241_v52, 5 }
 0x29d   : > { %v1278_v18 = vor.u32 %v1277_v62, %v1273_v41  ;;  %v1283_v31 = vrot.slane %v1281_v42, 5  ;;  %v1274_v40 = vsel %vm4793_vm1, %v1269_v51, %v1273_v41  ;;  %v693_v50 = vsel %vm4751_vm11, %v407_v48, %v692_v2  ;;  %v4161_v55 = vld [vmem:[#allocation2 + $0x3c] sm:$0xff]  ;;  %v681_v3 = vld [vmem:[#allocation2 + $0x24] sm:$0xf]  ;;  %v685_v52 = vld [vmem:[#allocation2 + $0x2c] sm:$0x1] }
 0x29e   : > { %3559 = vmatpush.bf16.xpose.msra.mxu3 %v3039_v19  ;;  %v3011_v56 = vunpack.c.l.b16 %v1274_v40  ;;  %694 = vst [vmem:[#allocation2 + $0x38] sm:$0x1] %v693_v50  ;;  %v3899_v62 = vrot.slane %v1529_v46, 9  ;;  %3573 = vmatpush.bf16.xpose.msrb.mxu0 %v3102_v63  ;;  %v1244_v29 = vor.u32 %v1243_v47, %v1240_v15  ;;  %v378_v19 = vshll.u32 %v4463_v24, 16  ;;  %v4245_v50 = vld [vmem:[%s4420_s15 + $0x8] sm:$0xf] }
 0x29f   : > { %v1279_v60 = vrot.slane %v1278_v18, 4  ;;  %v383_v18 = vshrl.u32 %v4469_v27, 16  ;;  %v377_v46 = vrot.slane %v375_v58, 7  ;;  %v386_v24 = vshll.u32 %v4469_v27, 16 }
 0x2a0   : > { %v1245_v34 = vrot.slane %v1244_v29, 4  ;;  %v361_v15 = vshll.u32 %v4245_v50, 16  ;;  %3587 = vmatpush.bf16.xpose.msrb.mxu1 %v4161_v55 }
 0x2a1   : > { %s4191_s10 = spop %4190  ;;  %v1284_v41 = vsel %vm4793_vm1, %v1279_v60, %v1283_v31  ;;  %v385_v60 = vrot.slane %v383_v18, 7 }
 0x2a2   : > { %v4863_v16 = vstv %s4191_s10  ;;  %v3012_v42 = vunpack.c.l.b16 %v1284_v41  ;;  %v381_v41 = vrot.slane %v377_v46, 4 }
 0x2a3   : > { %v1099_v53 = vld [vmem:[#allocation2 + $0x34] sm:$0xf]  ;;  %v390_v63 = vrot.slane %v385_v60, 4 }
 0x2a4   : > { %v1247_v39 = vshll.u32 %v1099_v53, 16  ;;  %v1251_v21 = vshrl.u32 %v1099_v53, 16  ;;  %v1622_v0 = vrot.slane %v1099_v53, 5  ;;  %v3038_v2 = vpack.c.b16 %v3012_v42, %v3011_v56  ;;  %v4145_v31 = vld [vmem:[#allocation2 + $0x30] sm:$0xff] }
 0x2a5   : > { %3548 = vmatpush.bf16.xpose.msra.mxu2 %v4145_v31  ;;  %v358_v56 = vshrl.u32 %v4245_v50, 16  ;;  %v1126_v47 = vld [vmem:[#allocation2 + $0x38] sm:$0x1]  ;;  %v388_v42 = vor.u32 %v386_v24, %v385_v60 }
 0x2a6   : > { %v1249_v22 = vrot.slane %v1247_v39, 5  ;;  %v1253_v51 = vrot.slane %v1251_v21, 4  ;;  %v1623_v8 = vsel %vm4784_vm0, %v3899_v62, %v1622_v0  ;;  %v1624_v40 = vrot.slane %v1622_v0, 4  ;;  %3560 = vmatpush.bf16.xpose.msra.mxu3 %v3038_v2  ;;  %v4246_v0 = vld [vmem:[%s4420_s15 + $0xc] sm:$0xf] }
 0x2a7   : > { %v3073_v48 = vunpack.c.l.b16 %v1623_v8  ;;  %v380_v21 = vor.u32 %v378_v19, %v377_v46  ;;  %v366_v29 = vshrl.u32 %v4246_v0, 16  ;;  %v1257_v58 = vshll.u32 %v1126_v47, 16 }
 0x2a8   : > { %v1254_v9 = vor.u32 %v1253_v51, %v1249_v22  ;;  %v1250_v39 = vsel %vm4793_vm1, %v1245_v34, %v1249_v22  ;;  %v360_v51 = vrot.slane %v358_v56, 7  ;;  %v1625_v27 = vrot.slane %v1126_v47, 5  ;;  %v674_v22 = vld [vmem:[#allocation2 + $0x18] sm:$0xf]  ;;  %v678_v34 = vld [vmem:[#allocation2 + $0x20] sm:$0x1] }
 0x2a9   : > { %v3009_v62 = vunpack.c.l.b16 %v1250_v39  ;;  %v682_v18 = vsel %vm4457_vm3, %v380_v21, %v681_v3  ;;  %v686_v2 = vsel %vm4751_vm11, %v390_v63, %v685_v52  ;;  %v389_v19 = vsel %vm4724_vm10, %v381_v41, %v388_v42  ;;  %v4247_v3 = vld [vmem:[%s4420_s15] sm:$0xf]  ;;  %v4160_v21 = vld [vmem:[#allocation2 + $0x30] sm:$0xff] }
 0x2aa   : > { %v1255_v53 = vrot.slane %v1254_v9, 4  ;;  %683 = vst [vmem:[#allocation2 + $0x24] sm:$0xf] %v682_v18  ;;  %v363_v31 = vor.u32 %v361_v15, %v360_v51  ;;  %v364_v9 = vrot.slane %v360_v51, 4  ;;  %v368_v8 = vrot.slane %v366_v29, 7  ;;  %3588 = vmatpush.bf16.xpose.msrb.mxu1 %v4160_v21 }
 0x2ab   : > { %v1259_v46 = vrot.slane %v1257_v58, 5  ;;  %v1626_v55 = vsel %vm4784_vm0, %v1624_v40, %v1625_v27  ;;  %684 = vst.msk [vmem:[#allocation2 + $0x28] sm:$0xf] %vm661_vm2, %v389_v19  ;;  %v369_v60 = vshll.u32 %v4246_v0, 16  ;;  %v341_v24 = vshrl.u32 %v4247_v3, 16  ;;  %v960_v27 = vld [vmem:[%s5741_s4] sm:$0xff] }
 0x2ac   : > { %v3074_v52 = vunpack.c.l.b16 %v1626_v55  ;;  %687 = vst [vmem:[#allocation2 + $0x2c] sm:$0x1] %v686_v2  ;;  %v373_v50 = vrot.slane %v368_v8, 4  ;;  %v675_v56 = vsel %vm4457_vm3, %v363_v31, %v674_v22  ;;  %v344_v15 = vshll.u32 %v4247_v3, 16  ;;  %v4248_v40 = vld [vmem:[%s4420_s15 + $0x4] sm:$0xf] }
 0x2ad   : > { %v1260_v39 = vsel %vm4793_vm1, %v1255_v53, %v1259_v46  ;;  %v371_v41 = vor.u32 %v369_v60, %v368_v8  ;;  %676 = vst [vmem:[#allocation2 + $0x18] sm:$0xf] %v675_v56  ;;  %v343_v63 = vrot.slane %v341_v24, 7  ;;  %v349_v47 = vshrl.u32 %v4248_v40, 16  ;;  %v664_v58 = vld [vmem:[#allocation2 + $0xc] sm:$0xf] }
 0x2ae   : > { %v3010_v42 = vunpack.c.l.b16 %v1260_v39  ;;  %v3101_v51 = vpack.c.b16 %v3074_v52, %v3073_v48  ;;  %v679_v0 = vsel %vm4751_vm11, %v373_v50, %v678_v34  ;;  %v352_v29 = vshll.u32 %v4248_v40, 16 }
 0x2af   : > { %v372_v53 = vsel %vm4724_vm10, %v364_v9, %v371_v41  ;;  %680 = vst [vmem:[#allocation2 + $0x20] sm:$0x1] %v679_v0  ;;  %v346_v18 = vor.u32 %v344_v15, %v343_v63  ;;  %v347_v2 = vrot.slane %v343_v63, 4  ;;  %v4906_v22 = vrot.slane %v349_v47, 7 }
 0x2b0   : > { %v3037_v19 = vpack.c.b16 %v3010_v42, %v3009_v62  ;;  %3574 = vmatpush.bf16.xpose.msrb.mxu0 %v3101_v51  ;;  %677 = vst.msk [vmem:[#allocation2 + $0x1c] sm:$0xf] %vm661_vm2, %v372_v53  ;;  %v5778_v48 = vshll.u32 %v4553_v20, 16  ;;  %v483_v8 = vrot.slane %v4679_v13, 4  ;;  %v5779_v34 = vshll.u32 %v4564_v30, 16 }
 0x2b1   : > { %v1096_v46 = vld [vmem:[#allocation2 + $0x24] sm:$0xf]  ;;  %v354_v60 = vor.u32 %v352_v29, %v4906_v22  ;;  %v356_v62 = vrot.slane %v4906_v22, 4  ;;  %v665_v3 = vsel %vm4457_vm3, %v346_v18, %v664_v58  ;;  %v4923_v20 = vmul.f32 %v4863_v16, %v960_v27 }
 0x2b2   : > { %v4912_v31 = vor.u32 %v5778_v48, %v4679_v13  ;;  %v490_v9 = vor.u32 %v5779_v34, %v4681_v14  ;;  %v1528_v55 = vld [vmem:[#allocation2 + $0x24] sm:$0xe]  ;;  %3561 = vmatpush.bf16.xpose.msra.mxu3 %v3037_v19  ;;  %v1097_v13 = vld [vmem:[#allocation2 + $0x28] sm:$0xf]  ;;  %v1214_v52 = vshrl.u32 %v1096_v46, 16  ;;  %v1217_v50 = vshll.u32 %v1096_v46, 16 }
 0x2b3   : > { %v4144_v24 = vld [vmem:[#allocation2 + $0x24] sm:$0xff]  ;;  %v3898_v30 = vrot.slane %v1528_v55, 9  ;;  %v1125_v15 = vld [vmem:[#allocation2 + $0x2c] sm:$0x1]  ;;  %v1223_v39 = vshll.u32 %v1097_v13, 16  ;;  %v1227_v21 = vshrl.u32 %v1097_v13, 16  ;;  %v355_v63 = vsel %vm4724_vm10, %v347_v2, %v354_v60 }
 0x2b4   : > { %v4927_v56 = vsel %vm4724_vm10, %v483_v8, %v490_v9  ;;  %v1615_v41 = vrot.slane %v1097_v13, 5  ;;  %3549 = vmatpush.bf16.xpose.msra.mxu2 %v4144_v24  ;;  %v1216_v40 = vrot.slane %v1214_v52, 4  ;;  %v1219_v47 = vrot.slane %v1217_v50, 5  ;;  %v1094_v0 = vld [vmem:[#allocation2 + $0x18] sm:$0xf]  ;;  %v4159_v18 = vld [vmem:[#allocation2 + $0x24] sm:$0xff] }
 0x2b5   : > { %v1233_v42 = vshll.u32 %v1125_v15, 16  ;;  %v1618_v51 = vrot.slane %v1125_v15, 5  ;;  %v1225_v29 = vrot.slane %v1223_v39, 5  ;;  %v1229_v58 = vrot.slane %v1227_v21, 4  ;;  %666 = vst [vmem:[#allocation2 + $0xc] sm:$0xf] %v665_v3  ;;  %3589 = vmatpush.bf16.xpose.msrb.mxu1 %v4159_v18 }
 0x2b6   : > { %v1616_v27 = vsel %vm4784_vm0, %v3898_v30, %v1615_v41  ;;  %v1617_v53 = vrot.slane %v1615_v41, 4  ;;  %v1220_v19 = vor.u32 %v1219_v47, %v1216_v40  ;;  %v1124_v34 = vld [vmem:[#allocation2 + $0x20] sm:$0x1]  ;;  %v1190_v9 = vshrl.u32 %v1094_v0, 16  ;;  %v1527_v13 = vld [vmem:[#allocation2 + $0x18] sm:$0xe] }
 0x2b7   : > { %v1235_v48 = vrot.slane %v1233_v42, 5  ;;  %v3071_v8 = vunpack.c.l.b16 %v1616_v27  ;;  %v1230_v2 = vor.u32 %v1229_v58, %v1225_v29  ;;  %v1095_v55 = vld [vmem:[#allocation2 + $0x1c] sm:$0xf]  ;;  %v1193_v60 = vshll.u32 %v1094_v0, 16  ;;  %668 = vst.msk [vmem:[#allocation2 + $0x10] sm:$0xf] %vm661_vm2, %v355_v63 }
 0x2b8   : > { %v1619_v46 = vsel %vm4784_vm0, %v1617_v53, %v1618_v51  ;;  %v1209_v24 = vshll.u32 %v1124_v34, 16  ;;  %v1221_v52 = vrot.slane %v1220_v19, 4  ;;  %v4143_v15 = vld [vmem:[#allocation2 + $0x18] sm:$0xff]  ;;  %v1192_v30 = vrot.slane %v1190_v9, 4  ;;  %v671_v3 = vld [vmem:[#allocation2 + $0x14] sm:$0x1] }
 0x2b9   : > { %v3072_v50 = vunpack.c.l.b16 %v1619_v46  ;;  %v1199_v39 = vshll.u32 %v1095_v55, 16  ;;  %v1231_v21 = vrot.slane %v1230_v2, 4  ;;  %v1195_v41 = vrot.slane %v1193_v60, 5  ;;  %v4938_v27 = vld [vmem:[#allocation2] sm:$0xf] }
 0x2ba   : > { %v1203_v40 = vshrl.u32 %v1095_v55, 16  ;;  %v1211_v47 = vrot.slane %v1209_v24, 5  ;;  %v1226_v42 = vsel %vm4793_vm1, %v1221_v52, %v1225_v29  ;;  %v3897_v58 = vrot.slane %v1527_v13, 9  ;;  %v720_v53 = vld [vmem:[#allocation2 + $0x68] sm:$0x1] }
 0x2bb   : > { %v3100_v51 = vpack.c.b16 %v3072_v50, %v3071_v8  ;;  %v1201_v0 = vrot.slane %v1199_v39, 5  ;;  %v1236_v19 = vsel %vm4793_vm1, %v1231_v21, %v1235_v48  ;;  %v3007_v9 = vunpack.c.l.b16 %v1226_v42  ;;  %v4158_v8 = vld [vmem:[#allocation2 + $0x18] sm:$0xff]  ;;  %726 = vst.msk [vmem:[#allocation2 + $0x70] sm:$0xf] %vm661_vm2, %v4927_v56 }
 0x2bc   : > { %v1196_v63 = vor.u32 %v1195_v41, %v1192_v30  ;;  %v1205_v2 = vrot.slane %v1203_v40, 4  ;;  %v3008_v46 = vunpack.c.l.b16 %v1236_v19  ;;  %3550 = vmatpush.bf16.xpose.msra.mxu2 %v4143_v15  ;;  %v1608_v18 = vrot.slane %v1095_v55, 5  ;;  %v1092_v52 = vld [vmem:[#allocation2 + $0xc] sm:$0xf] }
 0x2bd   : > { %3575 = vmatpush.bf16.xpose.msrb.mxu0 %v3100_v51  ;;  %v1611_v60 = vrot.slane %v1124_v34, 5  ;;  %v672_v29 = vsel %vm4751_vm11, %v356_v62, %v671_v3  ;;  %v1142_v48 = vshrl.u32 %v4938_v27, 16  ;;  %v721_v50 = vsel %vm4751_vm11, %v475_v7, %v720_v53  ;;  %v1526_v40 = vld [vmem:[#allocation2 + $0xc] sm:$0xe]  ;;  %3590 = vmatpush.bf16.xpose.msrb.mxu1 %v4158_v8 }
 0x2be   : > { %v1197_v24 = vrot.slane %v1196_v63, 4  ;;  %v1206_v13 = vor.u32 %v1205_v2, %v1201_v0  ;;  %673 = vst [vmem:[#allocation2 + $0x14] sm:$0x1] %v672_v29  ;;  %v3036_v15 = vpack.c.b16 %v3008_v46, %v3007_v9  ;;  %v1609_v34 = vsel %vm4784_vm0, %v3897_v58, %v1608_v18  ;;  %v1093_v21 = vld [vmem:[#allocation2 + $0x10] sm:$0xf] }
 0x2bf   : > { %v1610_v22 = vrot.slane %v1608_v18, 4  ;;  %v1166_v55 = vshrl.u32 %v1092_v52, 16  ;;  %v3069_v39 = vunpack.c.l.b16 %v1609_v34  ;;  %v1169_v41 = vshll.u32 %v1092_v52, 16  ;;  %v4142_v7 = vld [vmem:[#allocation2 + $0xc] sm:$0xff]  ;;  %722 = vst [vmem:[#allocation2 + $0x68] sm:$0x1] %v721_v50 }
 0x2c0   : > { %v1202_v62 = vsel %vm4793_vm1, %v1197_v24, %v1201_v0  ;;  %v1207_v30 = vrot.slane %v1206_v13, 4  ;;  %3562 = vmatpush.bf16.xpose.msra.mxu3 %v3036_v15  ;;  %v1175_v51 = vshll.u32 %v1093_v21, 16  ;;  %v1179_v0 = vshrl.u32 %v1093_v21, 16  ;;  %v1091_v24 = vld [vmem:[#allocation2 + $0x4] sm:$0xf] }
 0x2c1   : > { %v3005_v3 = vunpack.c.l.b16 %v1202_v62  ;;  %v1612_v1 = vsel %vm4784_vm0, %v1610_v22, %v1611_v60  ;;  %v1168_v42 = vrot.slane %v1166_v55, 4  ;;  %v1171_v19 = vrot.slane %v1169_v41, 5  ;;  %v1122_v62 = vld [vmem:[#allocation2 + $0x8] sm:$0x1]  ;;  %v2136_v32 = vld [vmem:[#allocation2 + $0xc] sm:$0xe] }
 0x2c2   : > { %v1212_v58 = vsel %vm4793_vm1, %v1207_v30, %v1211_v47  ;;  %v3070_v53 = vunpack.c.l.b16 %v1612_v1  ;;  %v1177_v63 = vrot.slane %v1175_v51, 5  ;;  %v3896_v2 = vrot.slane %v1526_v40, 9  ;;  %v4157_v30 = vld [vmem:[#allocation2 + $0xc] sm:$0xff]  ;;  %v1525_v40 = vld [vmem:[#allocation2] sm:$0xe] }
 0x2c3   : > { %v3006_v9 = vunpack.c.l.b16 %v1212_v58  ;;  %v1601_v46 = vrot.slane %v1093_v21, 5  ;;  %v1172_v60 = vor.u32 %v1171_v19, %v1168_v42  ;;  %v1181_v29 = vrot.slane %v1179_v0, 4  ;;  %v4141_v58 = vld [vmem:[#allocation2] sm:$0xff] }
 0x2c4   : > { %v3099_v18 = vpack.c.b16 %v3070_v53, %v3069_v39  ;;  %v1144_v13 = vrot.slane %v1142_v48, 4  ;;  %3551 = vmatpush.bf16.xpose.msra.mxu2 %v4142_v7  ;;  %v1145_v8 = vshll.u32 %v4938_v27, 16  ;;  %v1151_v41 = vshll.u32 %v1091_v24, 16  ;;  %v1718_v0 = vld [vmem:[#allocation2 + $0x60] sm:$0xf] }
 0x2c5   : > { %v3035_v52 = vpack.c.b16 %v3006_v9, %v3005_v3  ;;  %v1123_v50 = vld [vmem:[#allocation2 + $0x14] sm:$0x1]  ;;  %v1602_v47 = vsel %vm4784_vm0, %v3896_v2, %v1601_v46  ;;  %v1603_v15 = vrot.slane %v1601_v46, 4  ;;  %v1173_v56 = vrot.slane %v1172_v60, 4  ;;  %3591 = vmatpush.bf16.xpose.msrb.mxu1 %v4157_v30  ;;  %v2143_v30 = vld [vmem:[#allocation2 + $0x60] sm:$0xe] }
 0x2c6   : > { %3576 = vmatpush.bf16.xpose.msrb.mxu0 %v3099_v18  ;;  %v1182_v34 = vor.u32 %v1181_v29, %v1177_v63  ;;  %v1185_v22 = vshll.u32 %v1123_v50, 16  ;;  %v1604_v55 = vrot.slane %v1123_v50, 5  ;;  %v3067_v39 = vunpack.c.l.b16 %v1602_v47 }
 0x2c7   : > { %v1147_v21 = vrot.slane %v1145_v8, 5  ;;  %v1155_v48 = vshrl.u32 %v1091_v24, 16  ;;  %v1178_v3 = vsel %vm4793_vm1, %v1173_v56, %v1177_v63  ;;  %v1153_v19 = vrot.slane %v1151_v41, 5  ;;  %v1719_v8 = vld [vmem:[#allocation2 + $0x64] sm:$0xf] }
 0x2c8   : > { %v1183_v1 = vrot.slane %v1182_v34, 4  ;;  %v1187_v7 = vrot.slane %v1185_v22, 5  ;;  %v1605_v27 = vsel %vm4784_vm0, %v1603_v15, %v1604_v55  ;;  %3563 = vmatpush.bf16.xpose.msra.mxu3 %v3035_v52  ;;  %v3003_v42 = vunpack.c.l.b16 %v1178_v3 }
 0x2c9   : > { %v3068_v51 = vunpack.c.l.b16 %v1605_v27  ;;  %v1148_v53 = vor.u32 %v1147_v21, %v1144_v13  ;;  %v1157_v2 = vrot.slane %v1155_v48, 4  ;;  %v1161_v46 = vshll.u32 %v1122_v62, 16  ;;  %v1743_v21 = vld [vmem:[#allocation2 + $0x68] sm:$0x1] }
 0x2ca   : > { %v1188_v9 = vsel %vm4793_vm1, %v1183_v1, %v1187_v7  ;;  %v3895_v18 = vrot.slane %v1525_v40, 9  ;;  %v1594_v50 = vrot.slane %v1091_v24, 5  ;;  %v1597_v52 = vrot.slane %v1122_v62, 5 }
 0x2cb   : > { %v3004_v63 = vunpack.c.l.b16 %v1188_v9  ;;  %v3098_v60 = vpack.c.b16 %v3068_v51, %v3067_v39  ;;  %v1149_v29 = vrot.slane %v1148_v53, 4  ;;  %v1158_v47 = vor.u32 %v1157_v2, %v1153_v19  ;;  %v727_v53 = vld [vmem:[#allocation2 + $0x74] sm:$0x1] }
 0x2cc   : > { %v1163_v15 = vrot.slane %v1161_v46, 5  ;;  %v1921_v56 = vshrl.u32 %v1718_v0, 16  ;;  %3552 = vmatpush.bf16.xpose.msra.mxu2 %v4141_v58  ;;  %v1595_v22 = vsel %vm4784_vm0, %v3895_v18, %v1594_v50  ;;  %v1596_v55 = vrot.slane %v1594_v50, 4  ;;  %v723_v58 = vld [vmem:[#allocation2 + $0x6c] sm:$0xf] }
 0x2cd   : > { %v3034_v34 = vpack.c.b16 %v3004_v63, %v3003_v42  ;;  %v1154_v13 = vsel %vm4793_vm1, %v1149_v29, %v1153_v19  ;;  %v1159_v39 = vrot.slane %v1158_v47, 4  ;;  %v3065_v24 = vunpack.c.l.b16 %v1595_v22  ;;  %v2328_v18 = vld [vmem:[#allocation2 + $0x70] sm:$0xf] }
 0x2ce   : > { %3577 = vmatpush.bf16.xpose.msrb.mxu0 %v3098_v60  ;;  %v3001_v41 = vunpack.c.l.b16 %v1154_v13  ;;  %v1923_v48 = vrot.slane %v1921_v56, 4  ;;  %v1598_v62 = vsel %vm4784_vm0, %v1596_v55, %v1597_v52  ;;  %v1924_v40 = vshll.u32 %v1718_v0, 16  ;;  %v1716_v56 = vld [vmem:[#allocation2 + $0x54] sm:$0xf] }
 0x2cf   : > { %v1930_v3 = vshll.u32 %v1719_v8, 16  ;;  %v1934_v1 = vshrl.u32 %v1719_v8, 16  ;;  %v1164_v7 = vsel %vm4793_vm1, %v1159_v39, %v1163_v15  ;;  %v3066_v27 = vunpack.c.l.b16 %v1598_v62 }
 0x2d0   : > { %v1940_v42 = vshll.u32 %v1743_v21, 16  ;;  %v3918_v51 = vrot.slane %v2143_v30, 9  ;;  %3564 = vmatpush.bf16.xpose.msra.mxu3 %v3034_v34  ;;  %v3002_v19 = vunpack.c.l.b16 %v1164_v7  ;;  %v1926_v9 = vrot.slane %v1924_v40, 5 }
 0x2d1   : > { %v1932_v2 = vrot.slane %v1930_v3, 5  ;;  %v1936_v46 = vrot.slane %v1934_v1, 4  ;;  %v3097_v63 = vpack.c.b16 %v3066_v27, %v3065_v24  ;;  %v2251_v29 = vrot.slane %v1719_v8, 5  ;;  %v1742_v27 = vld [vmem:[#allocation2 + $0x5c] sm:$0x1] }
 0x2d2   : > { %v1942_v60 = vrot.slane %v1940_v42, 5  ;;  %v2254_v0 = vrot.slane %v1743_v21, 5  ;;  %v3033_v50 = vpack.c.b16 %v3002_v19, %v3001_v41  ;;  %v1927_v47 = vor.u32 %v1926_v9, %v1923_v48  ;;  %v1717_v48 = vld [vmem:[#allocation2 + $0x58] sm:$0xf]  ;;  %v2142_v42 = vld [vmem:[#allocation2 + $0x54] sm:$0xe] }
 0x2d3   : > { %v1937_v52 = vor.u32 %v1936_v46, %v1932_v2  ;;  %v724_v15 = vsel %vm4457_vm3, %v4912_v31, %v723_v58  ;;  %v2252_v34 = vsel %vm4784_vm0, %v3918_v51, %v2251_v29  ;;  %v2253_v13 = vrot.slane %v2251_v29, 4  ;;  %v961_v9 = vld [vmem:[%s5741_s4 + $0x8] sm:$0xff] }
 0x2d4   : > { %725 = vst [vmem:[#allocation2 + $0x6c] sm:$0xf] %v724_v15  ;;  %v5780_v22 = vrot.slane %v4681_v14, 4  ;;  %v2539_v8 = vshll.u32 %v2328_v18, 16  ;;  %v1928_v21 = vrot.slane %v1927_v47, 4  ;;  %v3287_v39 = vunpack.c.l.b16 %v2252_v34 }
 0x2d5   : > { %v1938_v30 = vrot.slane %v1937_v52, 4  ;;  %v2543_v41 = vshrl.u32 %v2328_v18, 16  ;;  %v2255_v31 = vsel %vm4784_vm0, %v2253_v13, %v2254_v0  ;;  %v1897_v62 = vshrl.u32 %v1716_v56, 16  ;;  %v2325_v52 = vld [vmem:[#allocation2 + $0x60] sm:$0xf] }
 0x2d6   : > { %v728_v55 = vsel %vm4751_vm11, %v5780_v22, %v727_v53  ;;  %3578 = vmatpush.bf16.xpose.msrb.mxu0 %v3097_v63  ;;  %v4989_v24 = vrot.slane %v2539_v8, 5  ;;  %v1900_v40 = vshll.u32 %v1716_v56, 16  ;;  %v1933_v14 = vsel %vm4793_vm1, %v1928_v21, %v1932_v2 }
 0x2d7   : > { %729 = vst [vmem:[#allocation2 + $0x74] sm:$0x1] %v728_v55  ;;  %v1943_v3 = vsel %vm4793_vm1, %v1938_v30, %v1942_v60  ;;  %v3288_v1 = vunpack.c.l.b16 %v2255_v31  ;;  %v2545_v7 = vrot.slane %v2543_v41, 4  ;;  %v3223_v51 = vunpack.c.l.b16 %v1933_v14 }
 0x2d8   : > { %v3224_v58 = vunpack.c.l.b16 %v1943_v3  ;;  %v1899_v53 = vrot.slane %v1897_v62, 4  ;;  %v1902_v19 = vrot.slane %v1900_v40, 5  ;;  %3565 = vmatpush.bf16.xpose.msra.mxu3 %v3033_v50  ;;  %v1906_v2 = vshll.u32 %v1717_v48, 16 }
 0x2d9   : > { %v3312_v46 = vpack.c.b16 %v3288_v1, %v3287_v39  ;;  %v2546_v18 = vor.u32 %v2545_v7, %v4989_v24  ;;  %v1910_v63 = vshrl.u32 %v1717_v48, 16  ;;  %v1916_v0 = vshll.u32 %v1742_v27, 16 }
 0x2da   : > { %v3248_v29 = vpack.c.b16 %v3224_v58, %v3223_v51  ;;  %v1903_v60 = vor.u32 %v1902_v19, %v1899_v53  ;;  %v3917_v47 = vrot.slane %v2142_v42, 9  ;;  %v1908_v13 = vrot.slane %v1906_v2, 5  ;;  %v5007_v42 = vld [vmem:[#allocation2 + $0x64] sm:$0xf] }
 0x2db   : > { %v4180_v15 = vld [vmem:[#allocation2 + $0x6c] sm:$0xff]  ;;  %v2547_v34 = vrot.slane %v2546_v18, 4  ;;  %v1912_v22 = vrot.slane %v1910_v63, 4  ;;  %v5000_v55 = vmul.f32 %v4863_v16, %v961_v9  ;;  %v1918_v39 = vrot.slane %v1916_v0, 5 }
 0x2dc   : > { %v2327_v56 = vld [vmem:[#allocation2 + $0x6c] sm:$0xf]  ;;  %3597 = vmatpush.bf16.xpose.msrb.mxu2 %v3248_v29  ;;  %v1904_v30 = vrot.slane %v1903_v60, 4  ;;  %v2244_v40 = vrot.slane %v1717_v48, 5  ;;  %v2247_v14 = vrot.slane %v1742_v27, 5  ;;  %v2506_v51 = vshrl.u32 %v2325_v52, 16 }
 0x2dd   : > { %v2530_v8 = vshrl.u32 %v2327_v56, 16  ;;  %v2533_v21 = vshll.u32 %v2327_v56, 16  ;;  %v1913_v62 = vor.u32 %v1912_v22, %v1908_v13  ;;  %v4179_v48 = vld [vmem:[#allocation2 + $0x60] sm:$0xff]  ;;  %v5015_v60 = vld [vmem:[#allocation2 + $0x68] sm:$0x1]  ;;  %v2509_v0 = vshll.u32 %v2325_v52, 16 }
 0x2de   : > { %v5002_v50 = vld [vmem:[#allocation2 + $0x74] sm:$0x1]  ;;  %3623 = vmatpush.bf16.xpose.msra.mxu0 %v4180_v15  ;;  %v1909_v7 = vsel %vm4793_vm1, %v1904_v30, %v1908_v13  ;;  %v2245_v9 = vsel %vm4784_vm0, %v3917_v47, %v2244_v40  ;;  %v2246_v18 = vrot.slane %v2244_v40, 4  ;;  %v2508_v27 = vrot.slane %v2506_v51, 4  ;;  %v1714_v56 = vld [vmem:[#allocation2 + $0x48] sm:$0xf] }
 0x2df   : > { %v2549_v31 = vshll.u32 %v5002_v50, 16  ;;  %v2532_v3 = vrot.slane %v2530_v8, 4  ;;  %v2535_v1 = vrot.slane %v2533_v21, 5  ;;  %v1914_v53 = vrot.slane %v1913_v62, 4 }
 0x2e0   : > { %3610 = vmatpush.bf16.xpose.msrb.mxu3 %v3312_v46  ;;  %v3221_v19 = vunpack.c.l.b16 %v1909_v7  ;;  %v3285_v2 = vunpack.c.l.b16 %v2245_v9  ;;  %v2515_v15 = vshll.u32 %v5007_v42, 16  ;;  %v2248_v8 = vsel %vm4784_vm0, %v2246_v18, %v2247_v14  ;;  %v1059_v9 = vpop.permute.xlu2 %1058 }
 0x2e1   : > { %v2551_v58 = vrot.slane %v2549_v31, 5  ;;  %v2536_v46 = vor.u32 %v2535_v1, %v2532_v3  ;;  %v1919_v29 = vsel %vm4793_vm1, %v1914_v53, %v1918_v39  ;;  %v3286_v21 = vunpack.c.l.b16 %v2248_v8  ;;  %v1715_v31 = vld [vmem:[#allocation2 + $0x4c] sm:$0xf]  ;;  %v2141_v53 = vld [vmem:[#allocation2 + $0x48] sm:$0xe] }
 0x2e2   : > { %v993_v41 = vpop.permute.xlu1 %992  ;;  %v3222_v47 = vunpack.c.l.b16 %v1919_v29  ;;  %v2511_v30 = vrot.slane %v2509_v0, 5  ;;  %v2525_v62 = vshll.u32 %v5015_v60, 16  ;;  %v1873_v40 = vshrl.u32 %v1714_v56, 16 }
 0x2e3   : > { %4192 = vpush %v993_v41  ;;  %v2552_v63 = vsel %vm4793_vm1, %v2547_v34, %v2551_v58  ;;  %v2537_v13 = vrot.slane %v2536_v46, 4  ;;  %v2517_v41 = vrot.slane %v2515_v15, 5  ;;  %v2519_v34 = vshrl.u32 %v5007_v42, 16  ;;  %v1741_v58 = vld [vmem:[#allocation2 + $0x50] sm:$0x1] }
 0x2e4   : > { %v3432_v22 = vunpack.c.l.b16 %v2552_v63  ;;  %v3247_v52 = vpack.c.b16 %v3222_v47, %v3221_v19  ;;  %v3311_v7 = vpack.c.b16 %v3286_v21, %v3285_v2  ;;  %v2512_v51 = vor.u32 %v2511_v30, %v2508_v27 }
 0x2e5   : > { %v2542_v39 = vsel %vm4793_vm1, %v2537_v13, %v4989_v24  ;;  %v2521_v14 = vrot.slane %v2519_v34, 4  ;;  %v2527_v46 = vrot.slane %v2525_v62, 5  ;;  %v1875_v18 = vrot.slane %v1873_v40, 4  ;;  %v4178_v34 = vld [vmem:[#allocation2 + $0x54] sm:$0xff] }
 0x2e6   : > { %v3431_v1 = vunpack.c.l.b16 %v2542_v39  ;;  %3624 = vmatpush.bf16.xpose.msra.mxu0 %v4179_v48  ;;  %3598 = vmatpush.bf16.xpose.msrb.mxu2 %v3247_v52  ;;  %v1876_v63 = vshll.u32 %v1714_v56, 16  ;;  %v1882_v29 = vshll.u32 %v1715_v31, 16  ;;  %v2513_v19 = vrot.slane %v2512_v51, 4  ;;  %v2323_v56 = vld [vmem:[#allocation2 + $0x54] sm:$0xf] }
 0x2e7   : > { %v2522_v0 = vor.u32 %v2521_v14, %v2517_v41  ;;  %v1886_v15 = vshrl.u32 %v1715_v31, 16  ;;  %v1892_v48 = vshll.u32 %v1741_v58, 16  ;;  %v3916_v27 = vrot.slane %v2141_v53, 9  ;;  %v2324_v40 = vld [vmem:[#allocation2 + $0x58] sm:$0xf] }
 0x2e8   : > { %v3456_v24 = vpack.c.b16 %v3432_v22, %v3431_v1  ;;  %3611 = vmatpush.bf16.xpose.msrb.mxu3 %v3311_v7  ;;  %v1878_v13 = vrot.slane %v1876_v63, 5  ;;  %v1884_v2 = vrot.slane %v1882_v29, 5  ;;  %v2518_v47 = vsel %vm4793_vm1, %v2513_v19, %v2517_v41 }
 0x2e9   : > { %v2523_v8 = vrot.slane %v2522_v0, 4  ;;  %v1888_v21 = vrot.slane %v1886_v15, 4  ;;  %v2237_v30 = vrot.slane %v1715_v31, 5  ;;  %v3429_v39 = vunpack.c.l.b16 %v2518_v47  ;;  %v1712_v15 = vld [vmem:[#allocation2 + $0x3c] sm:$0xf] }
 0x2ea   : > { %v1026_v3 = vpop.permute.xlu1 %1025  ;;  %3636 = vmatpush.bf16.xpose.msra.mxu1 %v3456_v24  ;;  %v1879_v52 = vor.u32 %v1878_v13, %v1875_v18  ;;  %v1894_v22 = vrot.slane %v1892_v48, 5  ;;  %v2240_v62 = vrot.slane %v1741_v58, 5  ;;  %v2350_v18 = vld [vmem:[#allocation2 + $0x5c] sm:$0x1]  ;;  %v2485_v58 = vshll.u32 %v2323_v56, 16 }
 0x2eb   : > { %4194 = vpush %v1026_v3  ;;  %v2528_v3 = vsel %vm4793_vm1, %v2523_v8, %v2527_v46  ;;  %v1889_v1 = vor.u32 %v1888_v21, %v1884_v2  ;;  %v2238_v7 = vsel %vm4784_vm0, %v3916_v27, %v2237_v30  ;;  %v2239_v51 = vrot.slane %v2237_v30, 4  ;;  %v1713_v13 = vld [vmem:[#allocation2 + $0x40] sm:$0xf] }
 0x2ec   : > { %4196 = vpush %v1059_v9  ;;  %v3430_v14 = vunpack.c.l.b16 %v2528_v3  ;;  %v1880_v41 = vrot.slane %v1879_v52, 4  ;;  %v3283_v53 = vunpack.c.l.b16 %v2238_v7  ;;  %v2482_v9 = vshrl.u32 %v2323_v56, 16  ;;  %v1740_v56 = vld [vmem:[#allocation2 + $0x44] sm:$0x1]  ;;  %v4177_v7 = vld [vmem:[#allocation2 + $0x48] sm:$0xff] }
 0x2ed   : > { %v1890_v31 = vrot.slane %v1889_v1, 4  ;;  %v2241_v63 = vsel %vm4784_vm0, %v2239_v51, %v2240_v62  ;;  %v2491_v29 = vshll.u32 %v2324_v40, 16  ;;  %v2487_v47 = vrot.slane %v2485_v58, 5  ;;  %v2140_v1 = vld [vmem:[#allocation2 + $0x3c] sm:$0xe] }
 0x2ee   : > { %3625 = vmatpush.bf16.xpose.msra.mxu0 %v4178_v34  ;;  %v3455_v24 = vpack.c.b16 %v3430_v14, %v3429_v39  ;;  %v1885_v46 = vsel %vm4793_vm1, %v1880_v41, %v1884_v2  ;;  %v3284_v19 = vunpack.c.l.b16 %v2241_v63  ;;  %v2484_v0 = vrot.slane %v2482_v9, 4 }
 0x2ef   : > { %v1895_v48 = vsel %vm4793_vm1, %v1890_v31, %v1894_v22  ;;  %v3219_v27 = vunpack.c.l.b16 %v1885_v46  ;;  %v2493_v8 = vrot.slane %v2491_v29, 5  ;;  %v2495_v34 = vshrl.u32 %v2324_v40, 16 }
 0x2f0   : > { %v3220_v21 = vunpack.c.l.b16 %v1895_v48  ;;  %v3310_v30 = vpack.c.b16 %v3284_v19, %v3283_v53  ;;  %v2501_v52 = vshll.u32 %v2350_v18, 16  ;;  %v2488_v39 = vor.u32 %v2487_v47, %v2484_v0 }
 0x2f1   : > { %v1849_v62 = vshrl.u32 %v1712_v15, 16  ;;  %v1852_v3 = vshll.u32 %v1712_v15, 16  ;;  %v1858_v2 = vshll.u32 %v1713_v13, 16  ;;  %v2497_v14 = vrot.slane %v2495_v34, 4 }
 0x2f2   : > { %3637 = vmatpush.bf16.xpose.msra.mxu1 %v3455_v24  ;;  %v3246_v51 = vpack.c.b16 %v3220_v21, %v3219_v27  ;;  %3612 = vmatpush.bf16.xpose.msrb.mxu3 %v3310_v30  ;;  %v2503_v41 = vrot.slane %v2501_v52, 5  ;;  %v1862_v22 = vshrl.u32 %v1713_v13, 16  ;;  %v2489_v9 = vrot.slane %v2488_v39, 4  ;;  %v2321_v24 = vld [vmem:[#allocation2 + $0x48] sm:$0xf] }
 0x2f3   : > { %v1851_v31 = vrot.slane %v1849_v62, 4  ;;  %v1854_v63 = vrot.slane %v1852_v3, 5  ;;  %v1860_v58 = vrot.slane %v1858_v2, 5  ;;  %v2498_v40 = vor.u32 %v2497_v14, %v2493_v8 }
 0x2f4   : > { %3599 = vmatpush.bf16.xpose.msrb.mxu2 %v3246_v51  ;;  %v1864_v53 = vrot.slane %v1862_v22, 4  ;;  %v1868_v18 = vshll.u32 %v1740_v56, 16  ;;  %v3915_v29 = vrot.slane %v2140_v1, 9  ;;  %v2494_v46 = vsel %vm4793_vm1, %v2489_v9, %v2493_v8  ;;  %v5043_v8 = vld [vmem:[#allocation2 + $0x4c] sm:$0xf]  ;;  %v4176_v9 = vld [vmem:[#allocation2 + $0x3c] sm:$0xff] }
 0x2f5   : > { %v1855_v19 = vor.u32 %v1854_v63, %v1851_v31  ;;  %v2230_v0 = vrot.slane %v1713_v13, 5  ;;  %v2233_v15 = vrot.slane %v1740_v56, 5  ;;  %v2499_v48 = vrot.slane %v2498_v40, 4  ;;  %v5049_v51 = vld [vmem:[#allocation2 + $0x50] sm:$0x1] }
 0x2f6   : > { %3626 = vmatpush.bf16.xpose.msra.mxu0 %v4177_v7  ;;  %v3427_v27 = vunpack.c.l.b16 %v2494_v46  ;;  %v1865_v47 = vor.u32 %v1864_v53, %v1860_v58  ;;  %v1870_v21 = vrot.slane %v1868_v18, 5  ;;  %v2458_v39 = vshrl.u32 %v2321_v24, 16  ;;  %v1710_v22 = vld [vmem:[#allocation2 + $0x30] sm:$0xf] }
 0x2f7   : > { %v1856_v30 = vrot.slane %v1855_v19, 4  ;;  %v2231_v34 = vsel %vm4784_vm0, %v3915_v29, %v2230_v0  ;;  %v2232_v52 = vrot.slane %v2230_v0, 4  ;;  %v2504_v62 = vsel %vm4793_vm1, %v2499_v48, %v2503_v41 }
 0x2f8   : > { %v1866_v3 = vrot.slane %v1865_v47, 4  ;;  %v3281_v2 = vunpack.c.l.b16 %v2231_v34  ;;  %v2461_v13 = vshll.u32 %v2321_v24, 16  ;;  %v3428_v56 = vunpack.c.l.b16 %v2504_v62  ;;  %v1711_v24 = vld [vmem:[#allocation2 + $0x34] sm:$0xf] }
 0x2f9   : > { %v1861_v1 = vsel %vm4793_vm1, %v1856_v30, %v1860_v58  ;;  %v2234_v7 = vsel %vm4784_vm0, %v2232_v52, %v2233_v15  ;;  %v2460_v14 = vrot.slane %v2458_v39, 4  ;;  %v2467_v29 = vshll.u32 %v5043_v8, 16  ;;  %v1739_v15 = vld [vmem:[#allocation2 + $0x38] sm:$0x1]  ;;  %v2139_v52 = vld [vmem:[#allocation2 + $0x30] sm:$0xe] }
 0x2fa   : > { %v1871_v41 = vsel %vm4793_vm1, %v1866_v3, %v1870_v21  ;;  %v3217_v31 = vunpack.c.l.b16 %v1861_v1  ;;  %v3282_v63 = vunpack.c.l.b16 %v2234_v7  ;;  %v2463_v40 = vrot.slane %v2461_v13, 5 }
 0x2fb   : > { %v3454_v53 = vpack.c.b16 %v3428_v56, %v3427_v27  ;;  %v3218_v18 = vunpack.c.l.b16 %v1871_v41  ;;  %v2471_v58 = vshrl.u32 %v5043_v8, 16  ;;  %v2477_v0 = vshll.u32 %v5049_v51, 16 }
 0x2fc   : > { %v3309_v46 = vpack.c.b16 %v3282_v63, %v3281_v2  ;;  %v2464_v19 = vor.u32 %v2463_v40, %v2460_v14  ;;  %v1825_v48 = vshrl.u32 %v1710_v22, 16  ;;  %v2469_v30 = vrot.slane %v2467_v29, 5 }
 0x2fd   : > { %3638 = vmatpush.bf16.xpose.msra.mxu1 %v3454_v53  ;;  %v3245_v47 = vpack.c.b16 %v3218_v18, %v3217_v31  ;;  %v2473_v21 = vrot.slane %v2471_v58, 4  ;;  %v1828_v34 = vshll.u32 %v1710_v22, 16  ;;  %v2479_v39 = vrot.slane %v2477_v0, 5  ;;  %v2319_v53 = vld [vmem:[#allocation2 + $0x3c] sm:$0xf]  ;;  %v4175_v18 = vld [vmem:[#allocation2 + $0x30] sm:$0xff] }
 0x2fe   : > { %3627 = vmatpush.bf16.xpose.msra.mxu0 %v4176_v9  ;;  %3613 = vmatpush.bf16.xpose.msrb.mxu3 %v3309_v46  ;;  %v2465_v27 = vrot.slane %v2464_v19, 4  ;;  %v1827_v62 = vrot.slane %v1825_v48, 4  ;;  %v1834_v3 = vshll.u32 %v1711_v24, 16  ;;  %v1838_v56 = vshrl.u32 %v1711_v24, 16  ;;  %v5060_v0 = vld [vmem:[#allocation2 + $0x40] sm:$0xf] }
 0x2ff   : > { %3600 = vmatpush.bf16.xpose.msrb.mxu2 %v3245_v47  ;;  %v2474_v13 = vor.u32 %v2473_v21, %v2469_v30  ;;  %v1830_v2 = vrot.slane %v1828_v34, 5  ;;  %v1844_v1 = vshll.u32 %v1739_v15, 16  ;;  %v3914_v41 = vrot.slane %v2139_v52, 9 }
 0x300   : > { %v2470_v7 = vsel %vm4793_vm1, %v2465_v27, %v2469_v30  ;;  %v1836_v14 = vrot.slane %v1834_v3, 5  ;;  %v2223_v31 = vrot.slane %v1711_v24, 5  ;;  %v1840_v9 = vrot.slane %v1838_v56, 4  ;;  %v1708_v56 = vld [vmem:[#allocation2 + $0x24] sm:$0xf] }
 0x301   : > { %v2475_v63 = vrot.slane %v2474_v13, 4  ;;  %v3425_v22 = vunpack.c.l.b16 %v2470_v7  ;;  %v1831_v40 = vor.u32 %v1830_v2, %v1827_v62  ;;  %v1846_v29 = vrot.slane %v1844_v1, 5 }
 0x302   : > { %v2224_v58 = vsel %vm4784_vm0, %v3914_v41, %v2223_v31  ;;  %v2225_v46 = vrot.slane %v2223_v31, 4  ;;  %v2226_v19 = vrot.slane %v1739_v15, 5  ;;  %v1841_v30 = vor.u32 %v1840_v9, %v1836_v14  ;;  %v2348_v15 = vld [vmem:[#allocation2 + $0x44] sm:$0x1]  ;;  %v1709_v31 = vld [vmem:[#allocation2 + $0x28] sm:$0xf] }
 0x303   : > { %v2480_v48 = vsel %vm4793_vm1, %v2475_v63, %v2479_v39  ;;  %v1832_v47 = vrot.slane %v1831_v40, 4  ;;  %v3279_v24 = vunpack.c.l.b16 %v2224_v58  ;;  %v2434_v52 = vshrl.u32 %v2319_v53, 16 }
 0x304   : > { %v3426_v21 = vunpack.c.l.b16 %v2480_v48  ;;  %v2227_v34 = vsel %vm4784_vm0, %v2225_v46, %v2226_v19  ;;  %v2437_v27 = vshll.u32 %v2319_v53, 16  ;;  %v1842_v3 = vrot.slane %v1841_v30, 4  ;;  %v1738_v19 = vld [vmem:[#allocation2 + $0x2c] sm:$0x1] }
 0x305   : > { %v1837_v62 = vsel %vm4793_vm1, %v1832_v47, %v1836_v14  ;;  %v3280_v13 = vunpack.c.l.b16 %v2227_v34  ;;  %v2443_v2 = vshll.u32 %v5060_v0, 16  ;;  %v2436_v7 = vrot.slane %v2434_v52, 4  ;;  %v2138_v47 = vld [vmem:[#allocation2 + $0x24] sm:$0xe] }
 0x306   : > { %3628 = vmatpush.bf16.xpose.msra.mxu0 %v4175_v18  ;;  %v3453_v39 = vpack.c.b16 %v3426_v21, %v3425_v22  ;;  %v3215_v1 = vunpack.c.l.b16 %v1837_v62  ;;  %v2439_v41 = vrot.slane %v2437_v27, 5  ;;  %v1847_v63 = vsel %vm4793_vm1, %v1842_v3, %v1846_v29  ;;  %v4174_v34 = vld [vmem:[#allocation2 + $0x24] sm:$0xff] }
 0x307   : > { %v3308_v40 = vpack.c.b16 %v3280_v13, %v3279_v24  ;;  %v2445_v9 = vrot.slane %v2443_v2, 5  ;;  %v2447_v53 = vshrl.u32 %v5060_v0, 16  ;;  %v3216_v14 = vunpack.c.l.b16 %v1847_v63 }
 0x308   : > { %3639 = vmatpush.bf16.xpose.msra.mxu1 %v3453_v39  ;;  %v2440_v58 = vor.u32 %v2439_v41, %v2436_v7  ;;  %v2453_v46 = vshll.u32 %v2348_v15, 16  ;;  %v1801_v48 = vshrl.u32 %v1708_v56, 16  ;;  %v1804_v18 = vshll.u32 %v1708_v56, 16 }
 0x309   : > { %3614 = vmatpush.bf16.xpose.msrb.mxu3 %v3308_v40  ;;  %v2449_v22 = vrot.slane %v2447_v53, 4  ;;  %v1810_v30 = vshll.u32 %v1709_v31, 16  ;;  %v1814_v21 = vshrl.u32 %v1709_v31, 16  ;;  %v3244_v52 = vpack.c.b16 %v3216_v14, %v3215_v1 }
 0x30a   : > { %v2441_v27 = vrot.slane %v2440_v58, 4  ;;  %v2455_v29 = vrot.slane %v2453_v46, 5  ;;  %v1803_v24 = vrot.slane %v1801_v48, 4  ;;  %v1806_v3 = vrot.slane %v1804_v18, 5 }
 0x30b   : > { %v2450_v62 = vor.u32 %v2449_v22, %v2445_v9  ;;  %v1812_v13 = vrot.slane %v1810_v30, 5  ;;  %v1816_v2 = vrot.slane %v1814_v21, 4  ;;  %3601 = vmatpush.bf16.xpose.msrb.mxu2 %v3244_v52  ;;  %v1820_v39 = vshll.u32 %v1738_v19, 16  ;;  %v5082_v21 = vld [vmem:[#allocation2 + $0x34] sm:$0xf] }
 0x30c   : > { %v2446_v15 = vsel %vm4793_vm1, %v2441_v27, %v2445_v9  ;;  %v3913_v7 = vrot.slane %v2138_v47, 9  ;;  %v2216_v41 = vrot.slane %v1709_v31, 5  ;;  %v1807_v40 = vor.u32 %v1806_v3, %v1803_v24  ;;  %v4173_v3 = vld [vmem:[#allocation2 + $0x18] sm:$0xff] }
 0x30d   : > { %v2451_v63 = vrot.slane %v2450_v62, 4  ;;  %v3423_v56 = vunpack.c.l.b16 %v2446_v15  ;;  %v1817_v53 = vor.u32 %v1816_v2, %v1812_v13  ;;  %v1822_v1 = vrot.slane %v1820_v39, 5  ;;  %v1706_v62 = vld [vmem:[#allocation2 + $0x18] sm:$0xf] }
 0x30e   : > { %3629 = vmatpush.bf16.xpose.msra.mxu0 %v4174_v34  ;;  %v2217_v14 = vsel %vm4784_vm0, %v3913_v7, %v2216_v41  ;;  %v2218_v58 = vrot.slane %v2216_v41, 4  ;;  %v2219_v46 = vrot.slane %v1738_v19, 5  ;;  %v1808_v9 = vrot.slane %v1807_v40, 4  ;;  %v1707_v41 = vld [vmem:[#allocation2 + $0x1c] sm:$0xf] }
 0x30f   : > { %v2456_v48 = vsel %vm4793_vm1, %v2451_v63, %v2455_v29  ;;  %v1818_v22 = vrot.slane %v1817_v53, 4  ;;  %v3277_v47 = vunpack.c.l.b16 %v2217_v14  ;;  %v2410_v34 = vshrl.u32 %v2317_v36, 16  ;;  %v5088_v29 = vld [vmem:[#allocation2 + $0x38] sm:$0x1] }
 0x310   : > { %v3424_v31 = vunpack.c.l.b16 %v2456_v48  ;;  %v2220_v30 = vsel %vm4784_vm0, %v2218_v58, %v2219_v46  ;;  %v1813_v52 = vsel %vm4793_vm1, %v1808_v9, %v1812_v13  ;;  %v2413_v24 = vshll.u32 %v2317_v36, 16  ;;  %v1737_v58 = vld [vmem:[#allocation2 + $0x20] sm:$0x1] }
 0x311   : > { %v1823_v19 = vsel %vm4793_vm1, %v1818_v22, %v1822_v1  ;;  %v3278_v27 = vunpack.c.l.b16 %v2220_v30  ;;  %v3213_v15 = vunpack.c.l.b16 %v1813_v52  ;;  %v2412_v7 = vrot.slane %v2410_v34, 4 }
 0x312   : > { %v3452_v2 = vpack.c.b16 %v3424_v31, %v3423_v56  ;;  %v3214_v39 = vunpack.c.l.b16 %v1823_v19  ;;  %v2415_v40 = vrot.slane %v2413_v24, 5  ;;  %v2419_v53 = vshll.u32 %v5082_v21, 16  ;;  %v2137_v31 = vld [vmem:[#allocation2 + $0x18] sm:$0xe] }
 0x313   : > { %v3307_v63 = vpack.c.b16 %v3278_v27, %v3277_v47  ;;  %v2423_v13 = vshrl.u32 %v5082_v21, 16  ;;  %v2429_v1 = vshll.u32 %v5088_v29, 16  ;;  %v1777_v46 = vshrl.u32 %v1706_v62, 16 }
 0x314   : > { %s4193_s15 = spop %4192  ;;  %3640 = vmatpush.bf16.xpose.msra.mxu1 %v3452_v2  ;;  %v3243_v14 = vpack.c.b16 %v3214_v39, %v3213_v15  ;;  %v1780_v36 = vshll.u32 %v1706_v62, 16  ;;  %v2416_v48 = vor.u32 %v2415_v40, %v2412_v7  ;;  %v2421_v56 = vrot.slane %v2419_v53, 5 }
 0x315   : > { %v5078_v18 = vstv %s4193_s15  ;;  %3615 = vmatpush.bf16.xpose.msrb.mxu3 %v3307_v63  ;;  %v2425_v9 = vrot.slane %v2423_v13, 4  ;;  %v1786_v22 = vshll.u32 %v1707_v41, 16  ;;  %v2431_v47 = vrot.slane %v2429_v1, 5  ;;  %v2315_v63 = vld [vmem:[#allocation2 + $0x24] sm:$0xf] }
 0x316   : > { %3630 = vmatpush.bf16.xpose.msra.mxu0 %v4173_v3  ;;  %3602 = vmatpush.bf16.xpose.msrb.mxu2 %v3243_v14  ;;  %v1779_v30 = vrot.slane %v1777_v46, 4  ;;  %v1782_v34 = vrot.slane %v1780_v36, 5  ;;  %v1790_v52 = vshrl.u32 %v1707_v41, 16  ;;  %v2417_v19 = vrot.slane %v2416_v48, 4 }
 0x317   : > { %v2426_v27 = vor.u32 %v2425_v9, %v2421_v56  ;;  %v1788_v24 = vrot.slane %v1786_v22, 5  ;;  %v1796_v2 = vshll.u32 %v1737_v58, 16  ;;  %v3912_v7 = vrot.slane %v2137_v31, 9  ;;  %v5101_v22 = vld [vmem:[#allocation2 + $0x28] sm:$0xf] }
 0x318   : > { %v1783_v62 = vor.u32 %v1782_v34, %v1779_v30  ;;  %v1792_v39 = vrot.slane %v1790_v52, 4  ;;  %v2422_v3 = vsel %vm4793_vm1, %v2417_v19, %v2421_v56  ;;  %v2209_v36 = vrot.slane %v1707_v41, 5 }
 0x319   : > { %v2427_v40 = vrot.slane %v2426_v27, 4  ;;  %v1798_v13 = vrot.slane %v1796_v2, 5  ;;  %v3421_v14 = vunpack.c.l.b16 %v2422_v3  ;;  %v2212_v9 = vrot.slane %v1737_v58, 5  ;;  %v5107_v27 = vld [vmem:[#allocation2 + $0x2c] sm:$0x1] }
 0x31a   : > { %v1784_v1 = vrot.slane %v1783_v62, 4  ;;  %v1793_v46 = vor.u32 %v1792_v39, %v1788_v24  ;;  %v2386_v30 = vshrl.u32 %v2315_v63, 16  ;;  %v2389_v31 = vshll.u32 %v2315_v63, 16  ;;  %5781 = vst [vmem:[#allocation16_spill] sm:$0xff] %v5107_v27 }
 0x31b   : > { %v2432_v48 = vsel %vm4793_vm1, %v2427_v40, %v2431_v47  ;;  %v2210_v19 = vsel %vm4784_vm0, %v3912_v7, %v2209_v36  ;;  %v2211_v41 = vrot.slane %v2209_v36, 4  ;;  %v1704_v47 = vld [vmem:[#allocation2 + $0xc] sm:$0xf]  ;;  %v2395_v40 = vshll.u32 %v5101_v22, 16 }
 0x31c   : > { %s4195_s16 = spop %4194  ;;  %v3422_v34 = vunpack.c.l.b16 %v2432_v48  ;;  %v1789_v56 = vsel %vm4793_vm1, %v1784_v1, %v1788_v24  ;;  %v1794_v52 = vrot.slane %v1793_v46, 4  ;;  %v3275_v62 = vunpack.c.l.b16 %v2210_v19  ;;  %v1705_v46 = vld [vmem:[#allocation2 + $0x10] sm:$0xf] }
 0x31d   : > { %v5093_v15 = vstv %s4195_s16  ;;  %s4197_s17 = spop %4196  ;;  %v3211_v2 = vunpack.c.l.b16 %v1789_v56  ;;  %v2388_v39 = vrot.slane %v2386_v30, 4  ;;  %v2391_v63 = vrot.slane %v2389_v31, 5 }
 0x31e   : > { %v5097_v53 = vstv %s4197_s17  ;;  %v3451_v58 = vpack.c.b16 %v3422_v34, %v3421_v14  ;;  %v1799_v3 = vsel %vm4793_vm1, %v1794_v52, %v1798_v13  ;;  %v2213_v24 = vsel %vm4784_vm0, %v2211_v41, %v2212_v9  ;;  %v1736_v14 = vld [vmem:[#allocation2 + $0x14] sm:$0x1]  ;;  %s3793_s17 = scalar_lea.hbm %s5743_s6, %s4189_s14 }
 0x31f   : > { %v3212_v48 = vunpack.c.l.b16 %v1799_v3  ;;  %v2399_v7 = vshrl.u32 %v5101_v22, 16  ;;  %v2405_v1 = vshll.u32 %v5107_v27, 16  ;;  %v3276_v36 = vunpack.c.l.b16 %v2213_v24  ;;  %s3797_s19 = sshll.u32 %s3793_s17, 4  ;;  %s3798_s19 = int_to_ptr.hbm [resolvable:$true] %s3797_s19 }
 0x320   : > { %3641 = vmatpush.bf16.xpose.msra.mxu1 %v3451_v58  ;;  %v2392_v30 = vor.u32 %v2391_v63, %v2388_v39  ;;  %v2397_v56 = vrot.slane %v2395_v40, 5  ;;  %v1753_v34 = vshrl.u32 %v1704_v47, 16  ;;  %v1756_v52 = vshll.u32 %v1704_v47, 16  ;;  %s4267_s26 = sshra.s32 %s3798_s19, 4  ;;  %s4268_s26 = int_to_ptr.hbm [resolvable:$true] %s4267_s26 }
 0x321   : > { %v3242_v19 = vpack.c.b16 %v3212_v48, %v3211_v2  ;;  %v2401_v13 = vrot.slane %v2399_v7, 4  ;;  %v2407_v31 = vrot.slane %v2405_v1, 5  ;;  %v3306_v3 = vpack.c.b16 %v3276_v36, %v3275_v62  ;;  %v2313_v62 = vld [vmem:[#allocation2 + $0x18] sm:$0xf]  ;;  %s4269_s28 = scalar_lea.hbm %s4268_s26, 16  ;;  %p4274_p0 = scmp.lt.s32.totalorder %s4268_s26, %s5743_s6 }
 0x322   : > { %v2393_v25 = vrot.slane %v2392_v30, 4  ;;  %v1755_v26 = vrot.slane %v1753_v34, 4  ;;  %v1762_v9 = vshll.u32 %v1705_v46, 16  ;;  %v1758_v28 = vrot.slane %v1756_v52, 5  ;;  %v5120_v34 = vld [vmem:[#allocation2 + $0x1c] sm:$0xf]  ;;  %p4270_p11 = scmp.ne.s32.totalorder %s4268_s26, %s4269_s28  ;;  %p4275_p1 = scmp.lt.s32.totalorder %s4273_s9, %s4269_s28 }
 0x323   : > { %3603 = vmatpush.bf16.xpose.msrb.mxu2 %v3242_v19  ;;  %v2402_v41 = vor.u32 %v2401_v13, %v2397_v56  ;;  %v1766_v17 = vshrl.u32 %v1705_v46, 16  ;;  %v1772_v27 = vshll.u32 %v1736_v14, 16  ;;  %3616 = vmatpush.bf16.xpose.msrb.mxu3 %v3306_v3  ;;  %v3911_v63 = vrot.slane %v2136_v32, 9 }
 0x324   : > { %v2398_v39 = vsel %vm4793_vm1, %v2393_v25, %v2397_v56  ;;  %v1764_v58 = vrot.slane %v1762_v9, 5  ;;  %v2202_v2 = vrot.slane %v1705_v46, 5  ;;  %v1759_v47 = vor.u32 %v1758_v28, %v1755_v26  ;;  %p4271_p12 = pnand %p4270_p11, %p4394_p5  ;;  %p4276_p2 = por %p4275_p1, %p4274_p0 }
 0x325   : > { %v2403_v40 = vrot.slane %v2402_v41, 4  ;;  %v3419_v48 = vunpack.c.l.b16 %v2398_v39  ;;  %v1768_v24 = vrot.slane %v1766_v17, 4  ;;  %v1774_v7 = vrot.slane %v1772_v27, 5 }
 0x326   : > { %v2203_v1 = vsel %vm4784_vm0, %v3911_v63, %v2202_v2  ;;  %v2204_v36 = vrot.slane %v2202_v2, 4  ;;  %v2205_v30 = vrot.slane %v1736_v14, 5  ;;  %v1760_v25 = vrot.slane %v1759_v47, 4  ;;  %v5128_v14 = vld [vmem:[#allocation2 + $0x20] sm:$0x1]  ;;  %v3877_v2 = vld [vmem:[%s5741_s4 + $0x90] sm:$0xff]  ;;  %p4272_p13 = pneg %p4271_p12 }
 0x327   : > { %v2408_v19 = vsel %vm4793_vm1, %v2403_v40, %v2407_v31  ;;  %v1769_v56 = vor.u32 %v1768_v24, %v1764_v58  ;;  %v3273_v32 = vunpack.c.l.b16 %v2203_v1  ;;  %v2362_v26 = vshrl.u32 %v2313_v62, 16  ;;  %v3868_v31 = vld [vmem:[%s5741_s4 + $0x48] sm:$0xff]  ;;  %v3869_v40 = vld [vmem:[%s5741_s4 + $0x50] sm:$0xff] }
 0x328   : > { %v3420_v46 = vunpack.c.l.b16 %v2408_v19  ;;  %v2206_v28 = vsel %vm4784_vm0, %v2204_v36, %v2205_v30  ;;  %v2365_v17 = vshll.u32 %v2313_v62, 16  ;;  %v1765_v27 = vsel %vm4793_vm1, %v1760_v25, %v1764_v58  ;;  %v3886_v58 = vld [vmem:[%s5741_s4 + $0xd8] sm:$0xff]  ;;  %p4277_p3 = pnand %p4276_p2, %p4272_p13 }
 0x329   : > { %v1770_v13 = vrot.slane %v1769_v56, 4  ;;  %v3274_v52 = vunpack.c.l.b16 %v2206_v28  ;;  %v2371_v3 = vshll.u32 %v5120_v34, 16  ;;  %v3209_v41 = vunpack.c.l.b16 %v1765_v27  ;;  %v3878_v25 = vld [vmem:[%s5741_s4 + $0x98] sm:$0xff]  ;;  %v3887_v56 = vld [vmem:[%s5741_s4 + $0xe0] sm:$0xff] }
 0x32a   : > { %v3450_v9 = vpack.c.b16 %v3420_v46, %v3419_v48  ;;  %v2364_v39 = vrot.slane %v2362_v26, 4  ;;  %v2367_v63 = vrot.slane %v2365_v17, 5  ;;  %v2375_v62 = vshrl.u32 %v5120_v34, 16  ;;  %v962_v26 = vld [vmem:[%s5741_s4 + $0x10] sm:$0xff]  ;;  %v3870_v17 = vld [vmem:[%s5741_s4 + $0x58] sm:$0xff] }
 0x32b   : > { %v1775_v47 = vsel %vm4793_vm1, %v1770_v13, %v1774_v7  ;;  %v3305_v24 = vpack.c.b16 %v3274_v52, %v3273_v32  ;;  %v2373_v48 = vrot.slane %v2371_v3, 5  ;;  %v2381_v30 = vshll.u32 %v5128_v14, 16 }
 0x32c   : > { %3642 = vmatpush.bf16.xpose.msra.mxu1 %v3450_v9  ;;  %v3210_v1 = vunpack.c.l.b16 %v1775_v47  ;;  %v2368_v36 = vor.u32 %v2367_v63, %v2364_v39  ;;  %v997_v19 = vmul.f32 %v3868_v31, %v5078_v18  ;;  %v2377_v7 = vrot.slane %v2375_v62, 4  ;;  %v3879_v31 = vld [vmem:[%s5741_s4 + $0xa0] sm:$0xff]  ;;  %v3880_v62 = vld [vmem:[%s5741_s4 + $0xa8] sm:$0xff] }
 0x32d   : > { %3617 = vmatpush.bf16.xpose.msrb.mxu3 %v3305_v24  ;;  %v1030_v32 = vmul.f32 %v3877_v2, %v5093_v15  ;;  %v1063_v46 = vmul.f32 %v3886_v58, %v5097_v53  ;;  %v998_v28 = vmul.f32 %v3869_v40, %v5078_v18  ;;  %v2383_v52 = vrot.slane %v2381_v30, 5  ;;  %v3888_v58 = vld [vmem:[%s5741_s4 + $0xe8] sm:$0xff]  ;;  %v3871_v24 = vld [vmem:[%s5741_s4 + $0x60] sm:$0xff] }
 0x32e   : > { %v3241_v27 = vpack.c.b16 %v3210_v1, %v3209_v41  ;;  %v2369_v13 = vrot.slane %v2368_v36, 4  ;;  %v1006_v3 = vadd.f32 %v997_v19, %v4923_v20  ;;  %v2378_v9 = vor.u32 %v2377_v7, %v2373_v48  ;;  %v963_v41 = vld [vmem:[%s5741_s4 + $0x18] sm:$0xff] }
 0x32f   : > { %v1007_v39 = vadd.f32 %v998_v28, %v5000_v55  ;;  %v1031_v63 = vmul.f32 %v3878_v25, %v5093_v15  ;;  %v1064_v2 = vmul.f32 %v3887_v56, %v5097_v53  ;;  %v975_v47 = vmul.f32 %v4863_v16, %v962_v26  ;;  %v2752_v28 = vld [vmem:[#allocation2 + $0x6c] sm:$0xe] }
 0x330   : > { %3604 = vmatpush.bf16.xpose.msrb.mxu2 %v3241_v27  ;;  %v2374_v20 = vsel %vm4793_vm1, %v2369_v13, %v2373_v48  ;;  %v1039_v40 = vadd.f32 %v1030_v32, %v1006_v3  ;;  %v999_v55 = vmul.f32 %v3870_v17, %v5078_v18  ;;  %v2379_v1 = vrot.slane %v2378_v9, 4  ;;  %v3889_v48 = vld [vmem:[%s5741_s4 + $0xf0] sm:$0xff] }
 0x331   : > { %v3417_v36 = vunpack.c.l.b16 %v2374_v20  ;;  %v1040_v30 = vadd.f32 %v1031_v63, %v1007_v39  ;;  %v1032_v19 = vmul.f32 %v3879_v31, %v5093_v15  ;;  %v1065_v7 = vmul.f32 %v3888_v58, %v5097_v53  ;;  %v769_v39 = vld [vmem:[#allocation2 + $0xbc] sm:$0x1]  ;;  %v4249_v20 = vld [vmem:[#allocation2 + $0x70] sm:$0xf] }
 0x332   : > { %v1072_v25 = vadd.f32 %v1063_v46, %v1039_v40  ;;  %v1008_v56 = vadd.f32 %v999_v55, %v975_v47  ;;  %v976_v32 = vmul.f32 %v4863_v16, %v963_v41  ;;  %v2384_v26 = vsel %vm4793_vm1, %v2379_v1, %v2383_v52  ;;  %v1120_v47 = vld [vmem:[#allocation2 + $0xb4] sm:$0xf] }
 0x333   : > { %v1073_v17 = vadd.f32 %v1064_v2, %v1040_v30  ;;  %v1000_v27 = vmul.f32 %v3871_v24, %v5078_v18  ;;  %v1033_v13 = vmul.f32 %v3880_v62, %v5093_v15  ;;  %v3418_v3 = vunpack.c.l.b16 %v2384_v26  ;;  %v5208_v1 = vld [vmem:[#allocation2 + $0xb4] sm:$0xe]  ;;  %v2751_v30 = vld [vmem:[#allocation2 + $0x60] sm:$0xe] }
 0x334   : > { %v5196_v31 = vpack.c.bf16 %v1072_v25, %v1072_v25  ;;  %v1041_v9 = vadd.f32 %v1032_v19, %v1008_v56  ;;  %v1066_v46 = vmul.f32 %v3889_v48, %v5097_v53  ;;  %v3934_v41 = vrot.slane %v2752_v28, 9 }
 0x335   : > { %v5199_v63 = vpack.c.bf16 %v1073_v17, %v1073_v17  ;;  %v1009_v58 = vadd.f32 %v1000_v27, %v976_v32  ;;  %v2860_v40 = vrot.slane %v4249_v20, 5  ;;  %v3449_v52 = vpack.c.b16 %v3418_v3, %v3417_v36  ;;  %v762_v32 = vld [vmem:[#allocation2 + $0xb0] sm:$0x1] }
 0x336   : > { %3553 = vmatmul.bf16.vlgmr.msra.gmra.mxu2 %v5196_v31  ;;  %v1074_v2 = vadd.f32 %v1065_v7, %v1041_v9  ;;  %v2863_v55 = vrot.slane %v5002_v50, 5  ;;  %v5782_v24 = vrot.slane %v4442_v12, 4  ;;  %v5783_v50 = vrot.slane %v4756_v5, 4 }
 0x337   : > { %3566 = vmatmul.bf16.vlgmr.msra.gmra.mxu3 %v5199_v63  ;;  %v1042_v19 = vadd.f32 %v1033_v13, %v1009_v58  ;;  %v2861_v36 = vsel %vm4784_vm0, %v3934_v41, %v2860_v40  ;;  %v2862_v48 = vrot.slane %v2860_v40, 4  ;;  %3643 = vmatpush.bf16.xpose.msra.mxu1 %v3449_v52  ;;  %v1502_v56 = vshrl.u32 %v1120_v47, 16  ;;  %v1118_v13 = vld [vmem:[#allocation2 + $0xa8] sm:$0xf] }
 0x338   : > { %v593_v62 = vsel %vm4724_vm10, %v5782_v24, %v4837_v61  ;;  %v770_v12 = vsel %vm4751_vm11, %v5783_v50, %v769_v39  ;;  %v5218_v25 = vpack.c.bf16 %v1074_v2, %v1074_v2  ;;  %v3495_v61 = vunpack.c.l.b16 %v2861_v36  ;;  %v5225_v58 = vld [vmem:[#allocation2 + $0xa8] sm:$0xe] }
 0x339   : > { %768 = vst.msk [vmem:[#allocation2 + $0xb8] sm:$0xf] %vm661_vm2, %v593_v62  ;;  %v1505_v7 = vshll.u32 %v1120_v47, 16  ;;  %v1075_v28 = vadd.f32 %v1066_v46, %v1042_v19  ;;  %v2864_v26 = vsel %vm4784_vm0, %v2862_v48, %v2863_v55  ;;  %v3910_v17 = vrot.slane %v5208_v1, 9  ;;  %v3872_v2 = vld [vmem:[%s5741_s4 + $0x68] sm:$0xff] }
 0x33a   : > { %771 = vst [vmem:[#allocation2 + $0xbc] sm:$0x1] %v770_v12  ;;  %v3933_v27 = vrot.slane %v2751_v30, 9  ;;  %3579 = vmatmul.bf16.vlgmr.msrb.gmra.mxu0 %v5218_v25  ;;  %v3496_v5 = vunpack.c.l.b16 %v2864_v26  ;;  %v1504_v3 = vrot.slane %v1502_v56, 4  ;;  %v2853_v39 = vrot.slane %v5007_v42, 5  ;;  %v964_v42 = vld [vmem:[%s5741_s4 + $0x20] sm:$0xff] }
 0x33b   : > { %v1507_v9 = vrot.slane %v1505_v7, 5  ;;  %v5227_v41 = vpack.c.bf16 %v1075_v28, %v1075_v28  ;;  %v2856_v46 = vrot.slane %v5015_v60, 5  ;;  %v5784_v20 = vrot.slane %v4438_v10, 4 }
 0x33c   : > { %v5785_v47 = vrot.slane %v4719_v59, 4  ;;  %v3520_v60 = vpack.c.b16 %v3496_v5, %v3495_v61  ;;  %v2854_v10 = vsel %vm4784_vm0, %v3933_v27, %v2853_v39  ;;  %v2855_v24 = vrot.slane %v2853_v39, 4 }
 0x33d   : > { %v576_v40 = vsel %vm4724_vm10, %v5784_v20, %v4746_v49  ;;  %v1508_v55 = vor.u32 %v1507_v9, %v1504_v3  ;;  %3592 = vmatmul.bf16.vlgmr.msrb.gmra.mxu1 %v5227_v41  ;;  %v3493_v59 = vunpack.c.l.b16 %v2854_v10  ;;  %v1478_v49 = vshrl.u32 %v1118_v13, 16  ;;  %v3881_v10 = vld [vmem:[%s5741_s4 + $0xb0] sm:$0xff] }
 0x33e   : > { %v763_v52 = vsel %vm4751_vm11, %v5785_v47, %v762_v32  ;;  %761 = vst.msk [vmem:[#allocation2 + $0xac] sm:$0xf] %vm661_vm2, %v576_v40  ;;  %v1481_v62 = vshll.u32 %v1118_v13, 16  ;;  %v3909_v1 = vrot.slane %v5225_v58, 9  ;;  %3649 = vmatpush.bf16.xpose.msra.mxu2 %v3520_v60  ;;  %v2857_v48 = vsel %vm4784_vm0, %v2855_v24, %v2856_v46 }
 0x33f   : > { %764 = vst [vmem:[#allocation2 + $0xb0] sm:$0x1] %v763_v52  ;;  %v1509_v36 = vrot.slane %v1508_v55, 4  ;;  %v977_v50 = vmul.f32 %v4863_v16, %v964_v42  ;;  %v1001_v12 = vmul.f32 %v3872_v2, %v5078_v18  ;;  %v3494_v28 = vunpack.c.l.b16 %v2857_v48 }
 0x340   : > { %v4156_v30 = vld [vmem:[#allocation2 + $0xb4] sm:$0xff]  ;;  %v1480_v13 = vrot.slane %v1478_v49, 4  ;;  %v1483_v5 = vrot.slane %v1481_v62, 5 }
 0x341   : > { %v1121_v19 = vld [vmem:[#allocation2 + $0xb8] sm:$0xf]  ;;  %v1137_v61 = vld [vmem:[#allocation2 + $0xbc] sm:$0x1]  ;;  %3662 = vmatpush.bf16.xpose.msra.mxu3 %v4156_v30  ;;  %v3519_v40 = vpack.c.b16 %v3494_v28, %v3493_v59  ;;  %v1010_v55 = vadd.f32 %v1001_v12, %v977_v50  ;;  %v1034_v50 = vmul.f32 %v3881_v10, %v5093_v15 }
 0x342   : > { %v1511_v56 = vshll.u32 %v1121_v19, 16  ;;  %v1515_v7 = vshrl.u32 %v1121_v19, 16  ;;  %v1699_v32 = vrot.slane %v1121_v19, 5  ;;  %v1521_v26 = vshll.u32 %v1137_v61, 16  ;;  %v3890_v12 = vld [vmem:[%s5741_s4 + $0xf8] sm:$0xff] }
 0x343   : > { %v1702_v27 = vrot.slane %v1137_v61, 5  ;;  %v1484_v47 = vor.u32 %v1483_v5, %v1480_v13  ;;  %v965_v5 = vld [vmem:[%s5741_s4 + $0x28] sm:$0xff] }
 0x344   : > { %v1513_v3 = vrot.slane %v1511_v56, 5  ;;  %v1517_v9 = vrot.slane %v1515_v7, 4  ;;  %v1700_v39 = vsel %vm4784_vm0, %v3910_v17, %v1699_v32  ;;  %v1701_v58 = vrot.slane %v1699_v32, 4 }
 0x345   : > { %v1523_v46 = vrot.slane %v1521_v26, 5  ;;  %v3095_v20 = vunpack.c.l.b16 %v1700_v39  ;;  %v1119_v60 = vld [vmem:[#allocation2 + $0xac] sm:$0xf]  ;;  %v1485_v30 = vrot.slane %v1484_v47, 4  ;;  %v1043_v47 = vadd.f32 %v1034_v50, %v1010_v55  ;;  %v3875_v50 = vld [vmem:[%s5741_s4 + $0x80] sm:$0xff] }
 0x346   : > { %v1514_v52 = vsel %vm4793_vm1, %v1509_v36, %v1513_v3  ;;  %v1518_v42 = vor.u32 %v1517_v9, %v1513_v3  ;;  %v1703_v2 = vsel %vm4784_vm0, %v1701_v58, %v1702_v27  ;;  %v4155_v49 = vld [vmem:[#allocation2 + $0xa8] sm:$0xff]  ;;  %v1136_v62 = vld [vmem:[#allocation2 + $0xb0] sm:$0x1]  ;;  %v1487_v59 = vshll.u32 %v1119_v60, 16  ;;  %3650 = vmatpush.bf16.xpose.msra.mxu2 %v3519_v40 }
 0x347   : > { %v3031_v24 = vunpack.c.l.b16 %v1514_v52  ;;  %v3096_v17 = vunpack.c.l.b16 %v1703_v2  ;;  %v1491_v48 = vshrl.u32 %v1119_v60, 16  ;;  %v1497_v61 = vshll.u32 %v1136_v62, 16  ;;  %v3873_v3 = vld [vmem:[%s5741_s4 + $0x70] sm:$0xff] }
 0x348   : > { %v1519_v19 = vrot.slane %v1518_v42, 4  ;;  %v1692_v36 = vrot.slane %v1119_v60, 5  ;;  %v1489_v7 = vrot.slane %v1487_v59, 5  ;;  %v1695_v32 = vrot.slane %v1136_v62, 5  ;;  %v3891_v42 = vld [vmem:[%s5741_s4 + $0x100] sm:$0xff]  ;;  %v966_v2 = vld [vmem:[%s5741_s4 + $0x30] sm:$0xff] }
 0x349   : > { %v3112_v56 = vpack.c.b16 %v3096_v17, %v3095_v20  ;;  %v1493_v26 = vrot.slane %v1491_v48, 4  ;;  %v1499_v27 = vrot.slane %v1497_v61, 5  ;;  %3663 = vmatpush.bf16.xpose.msra.mxu3 %v4155_v49  ;;  %v1067_v52 = vmul.f32 %v3890_v12, %v5097_v53  ;;  %v3874_v60 = vld [vmem:[%s5741_s4 + $0x78] sm:$0xff]  ;;  %v3883_v62 = vld [vmem:[%s5741_s4 + $0xc0] sm:$0xff]  ;;  %v3884_v12 = vld [vmem:[%s5741_s4 + $0xc8] sm:$0xff] }
 0x34a   : > { %v1524_v28 = vsel %vm4793_vm1, %v1519_v19, %v1523_v46  ;;  %v1693_v13 = vsel %vm4784_vm0, %v3909_v1, %v1692_v36  ;;  %v1490_v39 = vsel %vm4793_vm1, %v1485_v30, %v1489_v7  ;;  %v1694_v58 = vrot.slane %v1692_v36, 4  ;;  %v3882_v1 = vld [vmem:[%s5741_s4 + $0xb8] sm:$0xff] }
 0x34b   : > { %v3032_v9 = vunpack.c.l.b16 %v1524_v28  ;;  %3688 = vmatpush.bf16.xpose.msrb.mxu1 %v3112_v56  ;;  %v3093_v46 = vunpack.c.l.b16 %v1693_v13  ;;  %v1494_v20 = vor.u32 %v1493_v26, %v1489_v7  ;;  %v5282_v40 = vunpack.c.l.b16 %v1490_v39  ;;  %v967_v61 = vld [vmem:[%s5741_s4 + $0x38] sm:$0xff]  ;;  %v3893_v28 = vld [vmem:[%s5741_s4 + $0x110] sm:$0xff] }
 0x34c   : > { %v1696_v17 = vsel %vm4784_vm0, %v1694_v58, %v1695_v32  ;;  %v978_v55 = vmul.f32 %v4863_v16, %v965_v5  ;;  %v1002_v49 = vmul.f32 %v3873_v3, %v5078_v18  ;;  %v1076_v19 = vadd.f32 %v1067_v52, %v1043_v47 }
 0x34d   : > { %v3048_v10 = vpack.c.b16 %v3032_v9, %v3031_v24  ;;  %v1495_v30 = vrot.slane %v1494_v20, 4  ;;  %v3094_v59 = vunpack.c.l.b16 %v1696_v17  ;;  %v1035_v48 = vmul.f32 %v3882_v1, %v5093_v15  ;;  %v3892_v24 = vld [vmem:[%s5741_s4 + $0x108] sm:$0xff]  ;;  %v2750_v9 = vld [vmem:[#allocation2 + $0x54] sm:$0xe] }
 0x34e   : > { %v1011_v36 = vadd.f32 %v1002_v49, %v978_v55  ;;  %v1068_v56 = vmul.f32 %v3891_v42, %v5097_v53  ;;  %v979_v7 = vmul.f32 %v4863_v16, %v966_v2  ;;  %v1003_v32 = vmul.f32 %v3874_v60, %v5078_v18  ;;  %v1116_v2 = vld [vmem:[#allocation2 + $0x9c] sm:$0xf] }
 0x34f   : > { %3675 = vmatpush.bf16.xpose.msrb.mxu0 %v3048_v10  ;;  %v1500_v26 = vsel %vm4793_vm1, %v1495_v30, %v1499_v27  ;;  %v3111_v13 = vpack.c.b16 %v3094_v59, %v3093_v46  ;;  %v5322_v5 = vpack.c.bf16 %v1076_v19, %v1076_v19  ;;  %v1036_v3 = vmul.f32 %v3883_v62, %v5093_v15  ;;  %v755_v46 = vld [vmem:[#allocation2 + $0xa4] sm:$0x1]  ;;  %v4250_v62 = vld [vmem:[#allocation2 + $0x58] sm:$0xf]  ;;  %v4251_v59 = vld [vmem:[#allocation2 + $0x5c] sm:$0x1] }
 0x350   : > { %v3030_v39 = vunpack.c.l.b16 %v1500_v26  ;;  %v1044_v58 = vadd.f32 %v1035_v48, %v1011_v36  ;;  %v1012_v1 = vadd.f32 %v1003_v32, %v979_v7  ;;  %v1069_v20 = vmul.f32 %v3892_v24, %v5097_v53 }
 0x351   : > { %3605 = vmatmul.bf16.vlgmr.msrb.gmra.mxu2 %v5322_v5  ;;  %v980_v47 = vmul.f32 %v4863_v16, %v967_v61  ;;  %v1004_v52 = vmul.f32 %v3875_v50, %v5078_v18  ;;  %v1037_v42 = vmul.f32 %v3884_v12, %v5093_v15  ;;  %v1070_v27 = vmul.f32 %v3893_v28, %v5097_v53  ;;  %v5337_v61 = vld [vmem:[#allocation2 + $0x9c] sm:$0xe]  ;;  %v2749_v50 = vld [vmem:[#allocation2 + $0x48] sm:$0xe] }
 0x352   : > { %v3047_v60 = vpack.c.b16 %v3030_v39, %v5282_v40  ;;  %v1077_v10 = vadd.f32 %v1068_v56, %v1044_v58  ;;  %v1045_v17 = vadd.f32 %v1036_v3, %v1012_v1  ;;  %v3932_v55 = vrot.slane %v2750_v9, 9  ;;  %v744_v9 = vld [vmem:[#allocation2 + $0x90] sm:$0xf]  ;;  %v748_v39 = vld [vmem:[#allocation2 + $0x98] sm:$0x1] }
 0x353   : > { %3689 = vmatpush.bf16.xpose.msrb.mxu1 %v3111_v13  ;;  %v1013_v49 = vadd.f32 %v1004_v52, %v980_v47  ;;  %v2846_v30 = vrot.slane %v4250_v62, 5  ;;  %v2849_v19 = vrot.slane %v4251_v59, 5  ;;  %v5786_v48 = vrot.slane %v4574_v37, 4  ;;  %v2748_v52 = vld [vmem:[#allocation2 + $0x3c] sm:$0xe] }
 0x354   : > { %v5339_v36 = vpack.c.bf16 %v1077_v10, %v1077_v10  ;;  %v1078_v40 = vadd.f32 %v1069_v20, %v1045_v17  ;;  %v5787_v56 = vrot.slane %v4710_v44, 4  ;;  %v1454_v32 = vshrl.u32 %v1116_v2, 16 }
 0x355   : > { %v559_v24 = vsel %vm4724_vm10, %v5786_v48, %v4737_v38  ;;  %v1046_v12 = vadd.f32 %v1037_v42, %v1013_v49  ;;  %v2847_v37 = vsel %vm4784_vm0, %v3932_v55, %v2846_v30  ;;  %v2848_v28 = vrot.slane %v2846_v30, 4 }
 0x356   : > { %754 = vst.msk [vmem:[#allocation2 + $0xa0] sm:$0xf] %vm661_vm2, %v559_v24  ;;  %v756_v7 = vsel %vm4751_vm11, %v5787_v56, %v755_v46  ;;  %v1457_v38 = vshll.u32 %v1116_v2, 16  ;;  %3618 = vmatmul.bf16.vlgmr.msrb.gmra.mxu3 %v5339_v36  ;;  %v5349_v26 = vpack.c.bf16 %v1078_v40, %v1078_v40  ;;  %v3491_v13 = vunpack.c.l.b16 %v2847_v37  ;;  %v5790_v24 = vld [vmem:[#allocation9_spill] sm:$0xff] }
 0x357   : > { %757 = vst [vmem:[#allocation2 + $0xa4] sm:$0x1] %v756_v7  ;;  %3676 = vmatpush.bf16.xpose.msrb.mxu0 %v3047_v60  ;;  %v1456_v3 = vrot.slane %v1454_v32, 4  ;;  %v3908_v44 = vrot.slane %v5337_v61, 9  ;;  %v1079_v58 = vadd.f32 %v1070_v27, %v1046_v12  ;;  %v2850_v1 = vsel %vm4784_vm0, %v2848_v28, %v2849_v19  ;;  %v737_v27 = vld [vmem:[#allocation2 + $0x84] sm:$0xf] }
 0x358   : > { %v1459_v20 = vrot.slane %v1457_v38, 5  ;;  %v3931_v47 = vrot.slane %v2749_v50, 9  ;;  %3631 = vmatmul.bf16.vlgmr.msra.gmra.mxu0 %v5349_v26  ;;  %v3492_v42 = vunpack.c.l.b16 %v2850_v1  ;;  %v2839_v46 = vrot.slane %v5043_v8, 5  ;;  %v5792_v40 = vld [vmem:[#allocation13_spill] sm:$0xff] }
 0x359   : > { %v2842_v2 = vrot.slane %v5049_v51, 5  ;;  %v5788_v60 = vrot.slane %v4701_v35, 4  ;;  %v5362_v17 = vpack.c.bf16 %v1079_v58, %v1079_v58  ;;  %v745_v49 = vsel %vm4457_vm3, %v4717_v57, %v744_v9 }
 0x35a   : > { %v1460_v55 = vor.u32 %v1459_v20, %v1456_v3  ;;  %v5789_v8 = vrot.slane %v4707_v43, 4  ;;  %v3518_v62 = vpack.c.b16 %v3492_v42, %v3491_v13  ;;  %v2840_v35 = vsel %vm4784_vm0, %v3931_v47, %v2839_v46  ;;  %746 = vst [vmem:[#allocation2 + $0x90] sm:$0xf] %v745_v49 }
 0x35b   : > { %v542_v10 = vsel %vm4724_vm10, %v5788_v60, %v4731_v11  ;;  %v2841_v11 = vrot.slane %v2839_v46, 4  ;;  %v3930_v30 = vrot.slane %v2748_v52, 9  ;;  %3644 = vmatmul.bf16.vlgmr.msra.gmra.mxu1 %v5362_v17  ;;  %v3489_v57 = vunpack.c.l.b16 %v2840_v35 }
 0x35c   : > { %747 = vst.msk [vmem:[#allocation2 + $0x94] sm:$0xf] %vm661_vm2, %v542_v10  ;;  %v749_v51 = vsel %vm4751_vm11, %v5789_v8, %v748_v39  ;;  %v1461_v48 = vrot.slane %v1460_v55, 4  ;;  %v5791_v43 = vrot.slane %v5790_v24, 4  ;;  %v738_v56 = vsel %vm4457_vm3, %v5792_v40, %v737_v27  ;;  %3651 = vmatpush.bf16.xpose.msra.mxu2 %v3518_v62 }
 0x35d   : > { %v4154_v59 = vld [vmem:[#allocation2 + $0x9c] sm:$0xff]  ;;  %750 = vst [vmem:[#allocation2 + $0x98] sm:$0x1] %v749_v51  ;;  %v2843_v37 = vsel %vm4784_vm0, %v2841_v11, %v2842_v2  ;;  %v2832_v3 = vrot.slane %v5060_v0, 5 }
 0x35e   : > { %v1117_v19 = vld [vmem:[#allocation2 + $0xa0] sm:$0xf]  ;;  %v525_v61 = vsel %vm4724_vm10, %v5791_v43, %v4699_v33  ;;  %v1135_v7 = vld [vmem:[#allocation2 + $0xa4] sm:$0x1]  ;;  %3664 = vmatpush.bf16.xpose.msra.mxu3 %v4154_v59  ;;  %v3490_v13 = vunpack.c.l.b16 %v2843_v37  ;;  %739 = vst [vmem:[#allocation2 + $0x84] sm:$0xf] %v738_v56 }
 0x35f   : > { %v1463_v32 = vshll.u32 %v1117_v19, 16  ;;  %v1467_v50 = vshrl.u32 %v1117_v19, 16  ;;  %v1685_v12 = vrot.slane %v1117_v19, 5  ;;  %v1473_v28 = vshll.u32 %v1135_v7, 16  ;;  %740 = vst.msk [vmem:[#allocation2 + $0x88] sm:$0xf] %vm661_vm2, %v525_v61 }
 0x360   : > { %v1688_v38 = vrot.slane %v1135_v7, 5  ;;  %v3517_v47 = vpack.c.b16 %v3490_v13, %v3489_v57  ;;  %v5391_v52 = vsel %vm4784_vm0, %v3930_v30, %v2832_v3  ;;  %v2834_v60 = vrot.slane %v2832_v3, 4  ;;  %v741_v37 = vld [vmem:[#allocation2 + $0x8c] sm:$0x1]  ;;  %v4252_v3 = vld [vmem:[#allocation2 + $0x44] sm:$0x1] }
 0x361   : > { %v1465_v33 = vrot.slane %v1463_v32, 5  ;;  %v1469_v9 = vrot.slane %v1467_v50, 4  ;;  %v1686_v39 = vsel %vm4784_vm0, %v3908_v44, %v1685_v12  ;;  %v1687_v58 = vrot.slane %v1685_v12, 4  ;;  %v1114_v55 = vld [vmem:[#allocation2 + $0x90] sm:$0xf] }
 0x362   : > { %v1475_v1 = vrot.slane %v1473_v28, 5  ;;  %v3091_v20 = vunpack.c.l.b16 %v1686_v39  ;;  %v1430_v35 = vshrl.u32 %v1114_v55, 16  ;;  %v1433_v11 = vshll.u32 %v1114_v55, 16  ;;  %v1537_v24 = vld [vmem:[#allocation2 + $0x90] sm:$0xe] }
 0x363   : > { %v1466_v42 = vsel %vm4793_vm1, %v1461_v48, %v1465_v33  ;;  %v1470_v0 = vor.u32 %v1469_v9, %v1465_v33  ;;  %v1689_v46 = vsel %vm4784_vm0, %v1687_v58, %v1688_v38  ;;  %v1115_v2 = vld [vmem:[#allocation2 + $0x94] sm:$0xf]  ;;  %v3907_v56 = vrot.slane %v1537_v24, 9 }
 0x364   : > { %v3027_v44 = vunpack.c.l.b16 %v1466_v42  ;;  %v3092_v10 = vunpack.c.l.b16 %v1689_v46  ;;  %v4153_v27 = vld [vmem:[#allocation2 + $0x90] sm:$0xff]  ;;  %v1439_v49 = vshll.u32 %v1115_v2, 16  ;;  %v1443_v8 = vshrl.u32 %v1115_v2, 16  ;;  %v1134_v62 = vld [vmem:[#allocation2 + $0x98] sm:$0x1]  ;;  %3652 = vmatpush.bf16.xpose.msra.mxu2 %v3517_v47 }
 0x365   : > { %v1471_v51 = vrot.slane %v1470_v0, 4  ;;  %v1678_v30 = vrot.slane %v1115_v2, 5  ;;  %v1449_v57 = vshll.u32 %v1134_v62, 16  ;;  %v1432_v61 = vrot.slane %v1430_v35, 4  ;;  %v1112_v9 = vld [vmem:[#allocation2 + $0x84] sm:$0xf] }
 0x366   : > { %v3110_v59 = vpack.c.b16 %v3092_v10, %v3091_v20  ;;  %v1441_v19 = vrot.slane %v1439_v49, 5  ;;  %v1445_v48 = vrot.slane %v1443_v8, 4  ;;  %v1435_v40 = vrot.slane %v1433_v11, 5  ;;  %3665 = vmatpush.bf16.xpose.msra.mxu3 %v4153_v27  ;;  %v1113_v47 = vld [vmem:[#allocation2 + $0x88] sm:$0xf]  ;;  %v5793_v2 = vld [vmem:[#allocation10_spill] sm:$0xff] }
 0x367   : > { %v1476_v43 = vsel %vm4793_vm1, %v1471_v51, %v1475_v1  ;;  %v1451_v50 = vrot.slane %v1449_v57, 5  ;;  %v1680_v12 = vrot.slane %v1678_v30, 4  ;;  %v1679_v38 = vsel %vm4784_vm0, %v3907_v56, %v1678_v30  ;;  %v1536_v8 = vld [vmem:[#allocation2 + $0x84] sm:$0xe]  ;;  %v2747_v30 = vld [vmem:[#allocation2 + $0x30] sm:$0xe] }
 0x368   : > { %v3028_v7 = vunpack.c.l.b16 %v1476_v43  ;;  %3690 = vmatpush.bf16.xpose.msrb.mxu1 %v3110_v59  ;;  %v1446_v32 = vor.u32 %v1445_v48, %v1441_v19  ;;  %v1436_v28 = vor.u32 %v1435_v40, %v1432_v61  ;;  %v1681_v13 = vrot.slane %v1134_v62, 5  ;;  %v4152_v35 = vld [vmem:[#allocation2 + $0x84] sm:$0xff] }
 0x369   : > { %v2835_v33 = vrot.slane %v4252_v3, 5  ;;  %v3089_v1 = vunpack.c.l.b16 %v1679_v38  ;;  %v3487_v20 = vunpack.c.l.b16 %v5391_v52  ;;  %v5794_v10 = vrot.slane %v5793_v2, 4  ;;  %v5795_v38 = vld [vmem:[#allocation12_spill] sm:$0xff] }
 0x36a   : > { %v3046_v39 = vpack.c.b16 %v3028_v7, %v3027_v44  ;;  %v1447_v58 = vrot.slane %v1446_v32, 4  ;;  %v1437_v42 = vrot.slane %v1436_v28, 4  ;;  %v1682_v0 = vsel %vm4784_vm0, %v1680_v12, %v1681_v13  ;;  %v5796_v13 = vld [vmem:[#allocation7_spill] sm:$0xff] }
 0x36b   : > { %v2836_v46 = vsel %vm4784_vm0, %v2834_v60, %v2835_v33  ;;  %v742_v27 = vsel %vm4751_vm11, %v5794_v10, %v741_v37  ;;  %v3090_v55 = vunpack.c.l.b16 %v1682_v0  ;;  %v1406_v52 = vshrl.u32 %v1112_v9, 16 }
 0x36c   : > { %3677 = vmatpush.bf16.xpose.msrb.mxu0 %v3046_v39  ;;  %v1452_v44 = vsel %vm4793_vm1, %v1447_v58, %v1451_v50  ;;  %v3488_v49 = vunpack.c.l.b16 %v2836_v46  ;;  %743 = vst [vmem:[#allocation2 + $0x8c] sm:$0x1] %v742_v27  ;;  %v1442_v51 = vsel %vm4793_vm1, %v1437_v42, %v1441_v19  ;;  %v1409_v60 = vshll.u32 %v1112_v9, 16  ;;  %v730_v46 = vld [vmem:[#allocation2 + $0x78] sm:$0xf] }
 0x36d   : > { %v3026_v62 = vunpack.c.l.b16 %v1452_v44  ;;  %v1415_v11 = vshll.u32 %v1113_v47, 16  ;;  %v3025_v59 = vunpack.c.l.b16 %v1442_v51  ;;  %v3109_v48 = vpack.c.b16 %v3090_v55, %v3089_v1  ;;  %v734_v44 = vld [vmem:[#allocation2 + $0x80] sm:$0x1]  ;;  %v5799_v51 = vld [vmem:[#allocation8_spill] sm:$0xff] }
 0x36e   : > { %v3516_v57 = vpack.c.b16 %v3488_v49, %v3487_v20  ;;  %v1408_v24 = vrot.slane %v1406_v52, 4  ;;  %v1411_v43 = vrot.slane %v1409_v60, 5  ;;  %v1419_v40 = vshrl.u32 %v1113_v47, 16  ;;  %3666 = vmatpush.bf16.xpose.msra.mxu3 %v4152_v35  ;;  %v2746_v60 = vld [vmem:[#allocation2 + $0x24] sm:$0xe] }
 0x36f   : > { %v1417_v61 = vrot.slane %v1415_v11, 5  ;;  %v3906_v56 = vrot.slane %v1536_v8, 9  ;;  %v3045_v7 = vpack.c.b16 %v3026_v62, %v3025_v59  ;;  %v1671_v32 = vrot.slane %v1113_v47, 5  ;;  %v5798_v8 = vld [vmem:[#allocation11_spill] sm:$0xff] }
 0x370   : > { %3691 = vmatpush.bf16.xpose.msrb.mxu1 %v3109_v48  ;;  %3653 = vmatpush.bf16.xpose.msra.mxu2 %v3516_v57  ;;  %v3929_v50 = vrot.slane %v2747_v30, 9  ;;  %v2825_v19 = vrot.slane %v5082_v21, 5  ;;  %v1412_v12 = vor.u32 %v1411_v43, %v1408_v24  ;;  %v1421_v37 = vrot.slane %v1419_v40, 4  ;;  %v1108_v57 = vld [vmem:[#allocation2 + $0x6c] sm:$0xf] }
 0x371   : > { %v2828_v28 = vrot.slane %v5088_v29, 5  ;;  %v5797_v3 = vshll.u32 %v5796_v13, 16  ;;  %v1672_v9 = vsel %vm4784_vm0, %v3906_v56, %v1671_v32  ;;  %v1673_v39 = vrot.slane %v1671_v32, 4 }
 0x372   : > { %v2826_v58 = vsel %vm4784_vm0, %v3929_v50, %v2825_v19  ;;  %v2827_v1 = vrot.slane %v2825_v19, 4  ;;  %v1413_v47 = vrot.slane %v1412_v12, 4  ;;  %v1422_v21 = vor.u32 %v1421_v37, %v1417_v61  ;;  %v5802_v19 = vld [vmem:[#allocation16_spill] sm:$0xff] }
 0x373   : > { %v499_v33 = vor.u32 %v5797_v3, %v5795_v38  ;;  %v1133_v20 = vld [vmem:[#allocation2 + $0x8c] sm:$0x1]  ;;  %v3087_v42 = vunpack.c.l.b16 %v1672_v9  ;;  %v3485_v0 = vunpack.c.l.b16 %v2826_v58  ;;  %v500_v27 = vrot.slane %v5795_v38, 4  ;;  %v5448_v38 = vld [vmem:[#allocation2 + $0x74] sm:$0x1] }
 0x374   : > { %3678 = vmatpush.bf16.xpose.msrb.mxu0 %v3045_v7  ;;  %v1425_v29 = vshll.u32 %v1133_v20, 16  ;;  %v1674_v2 = vrot.slane %v1133_v20, 5  ;;  %v2829_v10 = vsel %vm4784_vm0, %v2827_v1, %v2828_v28  ;;  %v1418_v55 = vsel %vm4793_vm1, %v1413_v47, %v1417_v61  ;;  %v5441_v7 = vld [vmem:[#allocation2 + $0x70] sm:$0xf]  ;;  %v1534_v1 = vld [vmem:[#allocation2 + $0x6c] sm:$0xe] }
 0x375   : > { %v1423_v49 = vrot.slane %v1422_v21, 4  ;;  %v3486_v52 = vunpack.c.l.b16 %v2829_v10  ;;  %v5800_v62 = vshll.u32 %v5799_v51, 16  ;;  %v3023_v30 = vunpack.c.l.b16 %v1418_v55 }
 0x376   : > { %v1427_v11 = vrot.slane %v1425_v29, 5  ;;  %v1675_v59 = vsel %vm4784_vm0, %v1673_v39, %v1674_v2  ;;  %v731_v48 = vsel %vm4457_vm3, %v499_v33, %v730_v46  ;;  %v5801_v40 = vrot.slane %v5798_v8, 4 }
 0x377   : > { %v507_v35 = vor.u32 %v5800_v62, %v5798_v8  ;;  %v3088_v24 = vunpack.c.l.b16 %v1675_v59  ;;  %v3515_v43 = vpack.c.b16 %v3486_v52, %v3485_v0  ;;  %732 = vst [vmem:[#allocation2 + $0x78] sm:$0xf] %v731_v48  ;;  %v3928_v23 = vrot.slane %v2746_v60, 9  ;;  %v5803_v62 = vld [vmem:[#allocation15_spill] sm:$0xff] }
 0x378   : > { %v735_v56 = vsel %vm4751_vm11, %v5801_v40, %v734_v44  ;;  %v1428_v32 = vsel %vm4793_vm1, %v1423_v49, %v1427_v11  ;;  %v2818_v50 = vrot.slane %v5101_v22, 5  ;;  %v2821_v12 = vrot.slane %v5802_v19, 5 }
 0x379   : > { %v508_v61 = vsel %vm4724_vm10, %v500_v27, %v507_v35  ;;  %v3024_v37 = vunpack.c.l.b16 %v1428_v32  ;;  %v3108_v28 = vpack.c.b16 %v3088_v24, %v3087_v42  ;;  %3654 = vmatpush.bf16.xpose.msra.mxu2 %v3515_v43  ;;  %736 = vst [vmem:[#allocation2 + $0x80] sm:$0x1] %v735_v56  ;;  %v1358_v13 = vshrl.u32 %v1108_v57, 16  ;;  %v5804_v35 = vld [vmem:[#allocation6_spill] sm:$0xff] }
 0x37a   : > { %733 = vst.msk [vmem:[#allocation2 + $0x7c] sm:$0xf] %vm661_vm2, %v508_v61  ;;  %v1361_v3 = vshll.u32 %v1108_v57, 16  ;;  %v2819_v33 = vsel %vm4784_vm0, %v3928_v23, %v2818_v50  ;;  %v2820_v9 = vrot.slane %v2818_v50, 4  ;;  %v1367_v39 = vshll.u32 %v5441_v7, 16 }
 0x37b   : > { %v1371_v58 = vshrl.u32 %v5441_v7, 16  ;;  %v3044_v22 = vpack.c.b16 %v3024_v37, %v3023_v30  ;;  %3692 = vmatpush.bf16.xpose.msrb.mxu1 %v3108_v28  ;;  %v3483_v20 = vunpack.c.l.b16 %v2819_v33  ;;  %v1360_v47 = vrot.slane %v1358_v13, 4 }
 0x37c   : > { %v1363_v21 = vrot.slane %v1361_v3, 5  ;;  %v2822_v42 = vsel %vm4784_vm0, %v2820_v9, %v2821_v12  ;;  %v1369_v0 = vrot.slane %v1367_v39, 5  ;;  %v1377_v29 = vshll.u32 %v5448_v38, 16  ;;  %v2745_v39 = vld [vmem:[#allocation2 + $0x18] sm:$0xe] }
 0x37d   : > { %v1373_v46 = vrot.slane %v1371_v58, 4  ;;  %3679 = vmatpush.bf16.xpose.msrb.mxu0 %v3044_v22  ;;  %v3484_v2 = vunpack.c.l.b16 %v2822_v42  ;;  %v3904_v27 = vrot.slane %v1534_v1, 9  ;;  %v1657_v44 = vrot.slane %v5441_v7, 5  ;;  %v4150_v42 = vld [vmem:[#allocation2 + $0x6c] sm:$0xff] }
 0x37e   : > { %v1364_v10 = vor.u32 %v1363_v21, %v1360_v47  ;;  %v1110_v55 = vld [vmem:[#allocation2 + $0x78] sm:$0xf]  ;;  %v1379_v8 = vrot.slane %v1377_v29, 5  ;;  %v1660_v51 = vrot.slane %v5448_v38, 5  ;;  %v5805_v60 = vrot.slane %v5804_v35, 4 }
 0x37f   : > { %v1535_v49 = vld [vmem:[#allocation2 + $0x78] sm:$0xe]  ;;  %v1374_v52 = vor.u32 %v1373_v46, %v1369_v0  ;;  %v1382_v48 = vshrl.u32 %v1110_v55, 16  ;;  %v1385_v57 = vshll.u32 %v1110_v55, 16  ;;  %v3514_v43 = vpack.c.b16 %v3484_v2, %v3483_v20 }
 0x380   : > { %v610_v11 = vsel %vm4724_vm10, %v5805_v60, %v5803_v62  ;;  %v3905_v24 = vrot.slane %v1535_v49, 9  ;;  %v1132_v61 = vld [vmem:[#allocation2 + $0x80] sm:$0x1]  ;;  %v1365_v32 = vrot.slane %v1364_v10, 4  ;;  %v1658_v46 = vsel %vm4784_vm0, %v3904_v27, %v1657_v44 }
 0x381   : > { %v4151_v30 = vld [vmem:[#allocation2 + $0x78] sm:$0xff]  ;;  %v1384_v23 = vrot.slane %v1382_v48, 4  ;;  %v1387_v50 = vrot.slane %v1385_v57, 5  ;;  %v1401_v19 = vshll.u32 %v1132_v61, 16  ;;  %v1667_v12 = vrot.slane %v1132_v61, 5  ;;  %3655 = vmatpush.bf16.xpose.msra.mxu2 %v3514_v43 }
 0x382   : > { %v1111_v59 = vld [vmem:[#allocation2 + $0x7c] sm:$0xf]  ;;  %3667 = vmatpush.bf16.xpose.msra.mxu3 %v4151_v30  ;;  %775 = vst.msk [vmem:[#allocation2 + $0xc4] sm:$0xf] %vm661_vm2, %v610_v11  ;;  %v1370_v9 = vsel %vm4793_vm1, %v1365_v32, %v1369_v0  ;;  %v1375_v22 = vrot.slane %v1374_v52, 4  ;;  %v1659_v29 = vrot.slane %v1657_v44, 4  ;;  %v3083_v0 = vunpack.c.l.b16 %v1658_v46 }
 0x383   : > { %v1391_v40 = vshll.u32 %v1111_v59, 16  ;;  %v1395_v56 = vshrl.u32 %v1111_v59, 16  ;;  %v1664_v7 = vrot.slane %v1111_v59, 5  ;;  %v1388_v13 = vor.u32 %v1387_v50, %v1384_v23  ;;  %v1106_v49 = vld [vmem:[#allocation2 + $0x60] sm:$0xf] }
 0x384   : > { %v1403_v3 = vrot.slane %v1401_v19, 5  ;;  %v5471_v20 = vunpack.c.l.b16 %v1370_v9  ;;  %v1380_v10 = vsel %vm4793_vm1, %v1375_v22, %v1379_v8  ;;  %v3927_v55 = vrot.slane %v2745_v39, 9  ;;  %v1107_v8 = vld [vmem:[#allocation2 + $0x64] sm:$0xf]  ;;  %v1734_v9 = vld [vmem:[#allocation2 + $0xc0] sm:$0xf] }
 0x385   : > { %v1393_v6 = vrot.slane %v1391_v40, 5  ;;  %v1397_v37 = vrot.slane %v1395_v56, 4  ;;  %v1665_v28 = vsel %vm4784_vm0, %v3905_v24, %v1664_v7  ;;  %v1666_v38 = vrot.slane %v1664_v7, 4  ;;  %v1130_v24 = vld [vmem:[#allocation2 + $0x68] sm:$0x1] }
 0x386   : > { %v3085_v33 = vunpack.c.l.b16 %v1665_v28  ;;  %v1389_v47 = vrot.slane %v1388_v13, 4  ;;  %v5479_v35 = vunpack.c.l.b16 %v1380_v10  ;;  %v1661_v60 = vsel %vm4784_vm0, %v1659_v29, %v1660_v51  ;;  %v1533_v7 = vld [vmem:[#allocation2 + $0x60] sm:$0xe] }
 0x387   : > { %v1398_v58 = vor.u32 %v1397_v37, %v1393_v6  ;;  %v1668_v1 = vsel %vm4784_vm0, %v1666_v38, %v1667_v12  ;;  %v3084_v11 = vunpack.c.l.b16 %v1661_v60  ;;  %v2811_v30 = vrot.slane %v5120_v34, 5  ;;  %v4149_v38 = vld [vmem:[#allocation2 + $0x60] sm:$0xff] }
 0x388   : > { %v3086_v21 = vunpack.c.l.b16 %v1668_v1  ;;  %v1394_v62 = vsel %vm4793_vm1, %v1389_v47, %v1393_v6  ;;  %v3042_v48 = vpack.c.b16 %v5479_v35, %v5471_v20  ;;  %v2814_v57 = vrot.slane %v5128_v14, 5  ;;  %v776_v14 = vld [vmem:[#allocation2 + $0xc8] sm:$0x1]  ;;  %v4171_v20 = vld [vmem:[#allocation2 + $0xb4] sm:$0xff] }
 0x389   : > { %v1399_v2 = vrot.slane %v1398_v58, 4  ;;  %v3021_v44 = vunpack.c.l.b16 %v1394_v62  ;;  %v1334_v43 = vshrl.u32 %v1106_v49, 16  ;;  %v3106_v61 = vpack.c.b16 %v3084_v11, %v3083_v0  ;;  %v4172_v47 = vld [vmem:[#allocation2 + $0xc0] sm:$0xff]  ;;  %v1732_v35 = vld [vmem:[#allocation2 + $0xb4] sm:$0xf] }
 0x38a   : > { %v3107_v52 = vpack.c.b16 %v3086_v21, %v3085_v33  ;;  %3668 = vmatpush.bf16.xpose.msra.mxu3 %v4150_v42  ;;  %v2812_v51 = vsel %vm4784_vm0, %v3927_v55, %v2811_v30  ;;  %v2813_v40 = vrot.slane %v2811_v30, 4  ;;  %v1337_v56 = vshll.u32 %v1106_v49, 16  ;;  %v1735_v21 = vld [vmem:[#allocation2 + $0xc4] sm:$0xf]  ;;  %v2151_v30 = vld [vmem:[#allocation2 + $0xc0] sm:$0xe] }
 0x38b   : > { %v1404_v27 = vsel %vm4793_vm1, %v1399_v2, %v1403_v3  ;;  %v3481_v34 = vunpack.c.l.b16 %v2812_v51  ;;  %v1336_v23 = vrot.slane %v1334_v43, 4  ;;  %v1343_v50 = vshll.u32 %v1107_v8, 16  ;;  %v5806_v2 = vld [vmem:[#allocation14_spill] sm:$0xff] }
 0x38c   : > { %v3022_v59 = vunpack.c.l.b16 %v1404_v27  ;;  %3693 = vmatpush.bf16.xpose.msrb.mxu1 %v3107_v52  ;;  %v2815_v19 = vsel %vm4784_vm0, %v2813_v40, %v2814_v57  ;;  %v1339_v12 = vrot.slane %v1337_v56, 5  ;;  %v1347_v6 = vshrl.u32 %v1107_v8, 16  ;;  %v3876_v56 = vld [vmem:[%s5741_s4 + $0x88] sm:$0xff] }
 0x38d   : > { %v1353_v37 = vshll.u32 %v1130_v24, 16  ;;  %v3482_v28 = vunpack.c.l.b16 %v2815_v19  ;;  %v1345_v13 = vrot.slane %v1343_v50, 5  ;;  %v3903_v3 = vrot.slane %v1533_v7, 9  ;;  %v3885_v7 = vld [vmem:[%s5741_s4 + $0xd0] sm:$0xff] }
 0x38e   : > { %v3043_v32 = vpack.c.b16 %v3022_v59, %v3021_v44  ;;  %v1650_v33 = vrot.slane %v1107_v8, 5  ;;  %v1340_v39 = vor.u32 %v1339_v12, %v1336_v23  ;;  %v1349_v58 = vrot.slane %v1347_v6, 4 }
 0x38f   : > { %v1355_v1 = vrot.slane %v1353_v37, 5  ;;  %v1653_v22 = vrot.slane %v1130_v24, 5  ;;  %v3513_v42 = vpack.c.b16 %v3482_v28, %v3481_v34  ;;  %v5807_v10 = vrot.slane %v5806_v2, 4  ;;  %v968_v24 = vld [vmem:[%s5741_s4 + $0x40] sm:$0xff]  ;;  %v4188_v37 = vld [vmem:[#allocation2 + $0xcc] sm:$0xff]  ;;  %v3894_v28 = vld [vmem:[%s5741_s4 + $0x118] sm:$0xff] }
 0x390   : > { %3680 = vmatpush.bf16.xpose.msrb.mxu0 %v3043_v32  ;;  %v1651_v46 = vsel %vm4784_vm0, %v3903_v3, %v1650_v33  ;;  %v1652_v29 = vrot.slane %v1650_v33, 4  ;;  %v1341_v55 = vrot.slane %v1340_v39, 4  ;;  %v1350_v49 = vor.u32 %v1349_v58, %v1345_v13 }
 0x391   : > { %v777_v0 = vsel %vm4751_vm11, %v5807_v10, %v776_v14  ;;  %v3081_v62 = vunpack.c.l.b16 %v1651_v46  ;;  %v2113_v52 = vshrl.u32 %v1734_v9, 16  ;;  %3656 = vmatpush.bf16.xpose.msra.mxu2 %v3513_v42  ;;  %v2116_v27 = vshll.u32 %v1734_v9, 16 }
 0x392   : > { %778 = vst [vmem:[#allocation2 + $0xc8] sm:$0x1] %v777_v0  ;;  %v1654_v60 = vsel %vm4784_vm0, %v1652_v29, %v1653_v22  ;;  %v2122_v44 = vshll.u32 %v1735_v21, 16  ;;  %v2126_v11 = vshrl.u32 %v1735_v21, 16  ;;  %3669 = vmatpush.bf16.xpose.msra.mxu3 %v4149_v38  ;;  %v1346_v8 = vsel %vm4793_vm1, %v1341_v55, %v1345_v13 }
 0x393   : > { %v1351_v45 = vrot.slane %v1350_v49, 4  ;;  %v3082_v59 = vunpack.c.l.b16 %v1654_v60  ;;  %v2115_v57 = vrot.slane %v2113_v52, 4  ;;  %v3017_v43 = vunpack.c.l.b16 %v1346_v8  ;;  %v1730_v8 = vld [vmem:[#allocation2 + $0xa8] sm:$0xf] }
 0x394   : > { %3694 = vmatpush.bf16.xpose.msrb.mxu1 %v3106_v61  ;;  %v2118_v61 = vrot.slane %v2116_v27, 5  ;;  %v2124_v51 = vrot.slane %v2122_v44, 5  ;;  %v2128_v40 = vrot.slane %v2126_v11, 4  ;;  %v3926_v23 = vrot.slane %v2151_v30, 9 }
 0x395   : > { %v1356_v32 = vsel %vm4793_vm1, %v1351_v45, %v1355_v1  ;;  %v3105_v34 = vpack.c.b16 %v3082_v59, %v3081_v62  ;;  %v2307_v50 = vrot.slane %v1735_v21, 5  ;;  %v981_v14 = vmul.f32 %v4863_v16, %v968_v24  ;;  %v2150_v62 = vld [vmem:[#allocation2 + $0xb4] sm:$0xe] }
 0x396   : > { %v3018_v19 = vunpack.c.l.b16 %v1356_v32  ;;  %v2119_v12 = vor.u32 %v2118_v61, %v2115_v57  ;;  %v2129_v6 = vor.u32 %v2128_v40, %v2124_v51  ;;  %v1005_v3 = vmul.f32 %v3876_v56, %v5078_v18  ;;  %v1750_v18 = vld [vmem:[#allocation2 + $0xbc] sm:$0x1]  ;;  %v1731_v32 = vld [vmem:[#allocation2 + $0xac] sm:$0xf] }
 0x397   : > { %v2308_v38 = vsel %vm4784_vm0, %v3926_v23, %v2307_v50  ;;  %v2309_v13 = vrot.slane %v2307_v50, 4  ;;  %v1038_v33 = vmul.f32 %v3885_v7, %v5093_v15  ;;  %v1071_v42 = vmul.f32 %v3894_v28, %v5097_v53  ;;  %v4170_v7 = vld [vmem:[#allocation2 + $0xa8] sm:$0xff] }
 0x398   : > { %3681 = vmatpush.bf16.xpose.msrb.mxu0 %v3042_v48  ;;  %v1733_v48 = vld [vmem:[#allocation2 + $0xb8] sm:$0xf]  ;;  %v3041_v9 = vpack.c.b16 %v3018_v19, %v3017_v43  ;;  %v2120_v58 = vrot.slane %v2119_v12, 4  ;;  %v2130_v1 = vrot.slane %v2129_v6, 4  ;;  %v3303_v16 = vunpack.c.l.b16 %v2308_v38  ;;  %v4187_v43 = vld [vmem:[#allocation2 + $0xc0] sm:$0xff] }
 0x399   : > { %3701 = vmatpush.bf16.xpose.msrb.mxu2 %v4172_v47  ;;  %v1751_v39 = vld [vmem:[#allocation2 + $0xc8] sm:$0x1]  ;;  %v1014_v21 = vadd.f32 %v1005_v3, %v981_v14  ;;  %3670 = vmatmul.bf16.vlgmr.msra.gmra.mxu3 %v5196_v31  ;;  %v2089_v15 = vshrl.u32 %v1732_v35, 16  ;;  %v2092_v29 = vshll.u32 %v1732_v35, 16  ;;  %v2098_v2 = vshll.u32 %v1733_v48, 16 }
 0x39a   : > { %v2132_v22 = vshll.u32 %v1751_v39, 16  ;;  %v2310_v47 = vrot.slane %v1751_v39, 5  ;;  %v2125_v46 = vsel %vm4793_vm1, %v2120_v58, %v2124_v51  ;;  %v2102_v11 = vshrl.u32 %v1733_v48, 16  ;;  %v1749_v14 = vld [vmem:[#allocation2 + $0xb0] sm:$0x1] }
 0x39b   : > { %v3239_v0 = vunpack.c.l.b16 %v2125_v46  ;;  %v1047_v49 = vadd.f32 %v1038_v33, %v1014_v21  ;;  %v2091_v52 = vrot.slane %v2089_v15, 4  ;;  %v2094_v60 = vrot.slane %v2092_v29, 5  ;;  %v1728_v46 = vld [vmem:[#allocation2 + $0x9c] sm:$0xf] }
 0x39c   : > { %3695 = vmatpush.bf16.xpose.msrb.mxu1 %v3105_v34  ;;  %v2134_v10 = vrot.slane %v2132_v22, 5  ;;  %v2311_v55 = vsel %vm4784_vm0, %v2309_v13, %v2310_v47  ;;  %v2100_v27 = vrot.slane %v2098_v2, 5  ;;  %v2108_v30 = vshll.u32 %v1750_v18, 16 }
 0x39d   : > { %v3304_v53 = vunpack.c.l.b16 %v2311_v55  ;;  %v1080_v44 = vadd.f32 %v1071_v42, %v1047_v49  ;;  %v2095_v57 = vor.u32 %v2094_v60, %v2091_v52  ;;  %v3925_v24 = vrot.slane %v2150_v62, 9 }
 0x39e   : > { %v2135_v31 = vsel %vm4793_vm1, %v2130_v1, %v2134_v10  ;;  %v2104_v51 = vrot.slane %v2102_v11, 4  ;;  %v2110_v40 = vrot.slane %v2108_v30, 5  ;;  %v2300_v56 = vrot.slane %v1733_v48, 5  ;;  %v1729_v10 = vld [vmem:[#allocation2 + $0xa0] sm:$0xf] }
 0x39f   : > { %v3240_v45 = vunpack.c.l.b16 %v2135_v31  ;;  %v3320_v59 = vpack.c.b16 %v3304_v53, %v3303_v16  ;;  %v5533_v61 = vpack.c.bf16 %v1080_v44, %v1080_v44  ;;  %v2096_v23 = vrot.slane %v2095_v57, 4  ;;  %v4186_v53 = vld [vmem:[#allocation2 + $0xb4] sm:$0xff]  ;;  %v1748_v31 = vld [vmem:[#allocation2 + $0xa4] sm:$0x1] }
 0x3a0   : > { %3682 = vmatpush.bf16.xpose.msrb.mxu0 %v3041_v9  ;;  %v2303_v50 = vrot.slane %v1750_v18, 5  ;;  %v2065_v19 = vshrl.u32 %v1730_v8, 16  ;;  %v2105_v12 = vor.u32 %v2104_v51, %v2100_v27  ;;  %v2301_v6 = vsel %vm4784_vm0, %v3925_v24, %v2300_v56 }
 0x3a1   : > { %3702 = vmatpush.bf16.xpose.msrb.mxu2 %v4171_v20  ;;  %v3256_v34 = vpack.c.b16 %v3240_v45, %v3239_v0  ;;  %v2068_v28 = vshll.u32 %v1730_v8, 16  ;;  %v2101_v38 = vsel %vm4793_vm1, %v2096_v23, %v2100_v27  ;;  %v3301_v13 = vunpack.c.l.b16 %v2301_v6  ;;  %v2149_v20 = vld [vmem:[#allocation2 + $0xa8] sm:$0xe] }
 0x3a2   : > { %3657 = vmatmul.bf16.vlgmr.msra.gmra.mxu2 %v5533_v61  ;;  %v2067_v3 = vrot.slane %v2065_v19, 4  ;;  %v2074_v33 = vshll.u32 %v1731_v32, 16  ;;  %v2106_v35 = vrot.slane %v2105_v12, 4  ;;  %v3237_v48 = vunpack.c.l.b16 %v2101_v38  ;;  %v1727_v38 = vld [vmem:[#allocation2 + $0x94] sm:$0xf] }
 0x3a3   : > { %3696 = vmatmul.bf16.vlgmr.msrb.gmra.mxu1 %v5218_v25  ;;  %3714 = vmatpush.bf16.xpose.msrb.mxu3 %v3256_v34  ;;  %v2070_v9 = vrot.slane %v2068_v28, 5  ;;  %v2078_v1 = vshrl.u32 %v1731_v32, 16  ;;  %v2084_v16 = vshll.u32 %v1749_v14, 16  ;;  %v3924_v21 = vrot.slane %v2149_v20, 9  ;;  %v1726_v34 = vld [vmem:[#allocation2 + $0x90] sm:$0xf] }
 0x3a4   : > { %3740 = vmatpush.bf16.xpose.msra.mxu1 %v4188_v37  ;;  %v2302_v37 = vrot.slane %v2300_v56, 4  ;;  %v2076_v58 = vrot.slane %v2074_v33, 5  ;;  %v2111_v22 = vsel %vm4793_vm1, %v2106_v35, %v2110_v40  ;;  %v2293_v42 = vrot.slane %v1731_v32, 5 }
 0x3a5   : > { %v2071_v47 = vor.u32 %v2070_v9, %v2067_v3  ;;  %v3238_v18 = vunpack.c.l.b16 %v2111_v22  ;;  %v2080_v29 = vrot.slane %v2078_v1, 4  ;;  %v2086_v2 = vrot.slane %v2084_v16, 5  ;;  %v1747_v1 = vld [vmem:[#allocation2 + $0x98] sm:$0x1] }
 0x3a6   : > { %v2304_v25 = vsel %vm4784_vm0, %v2302_v37, %v2303_v50  ;;  %v2294_v55 = vsel %vm4784_vm0, %v3924_v21, %v2293_v42  ;;  %v2295_v49 = vrot.slane %v2293_v42, 4  ;;  %v2296_v62 = vrot.slane %v1749_v14, 5  ;;  %v2147_v42 = vld [vmem:[#allocation2 + $0x90] sm:$0xe] }
 0x3a7   : > { %v3302_v39 = vunpack.c.l.b16 %v2304_v25  ;;  %3683 = vmatmul.bf16.vlgmr.msrb.gmra.mxu0 %v5199_v63  ;;  %v2072_v0 = vrot.slane %v2071_v47, 4  ;;  %v4169_v63 = vld [vmem:[#allocation2 + $0x9c] sm:$0xff]  ;;  %v3255_v52 = vpack.c.b16 %v3238_v18, %v3237_v48  ;;  %v2081_v60 = vor.u32 %v2080_v29, %v2076_v58 }
 0x3a8   : > { %3727 = vmatpush.bf16.xpose.msra.mxu0 %v3320_v59  ;;  %v3299_v27 = vunpack.c.l.b16 %v2294_v55  ;;  %v2041_v44 = vshrl.u32 %v1728_v46, 16  ;;  %v2297_v30 = vsel %vm4784_vm0, %v2295_v49, %v2296_v62  ;;  %v2044_v8 = vshll.u32 %v1728_v46, 16  ;;  %v2148_v59 = vld [vmem:[#allocation2 + $0x9c] sm:$0xe]  ;;  %v1724_v49 = vld [vmem:[#allocation2 + $0x84] sm:$0xf] }
 0x3a9   : > { %3703 = vmatpush.bf16.xpose.msrb.mxu2 %v4170_v7  ;;  %v3319_v15 = vpack.c.b16 %v3302_v39, %v3301_v13  ;;  %v2077_v11 = vsel %vm4793_vm1, %v2072_v0, %v2076_v58  ;;  %v2050_v45 = vshll.u32 %v1729_v10, 16  ;;  %v2082_v57 = vrot.slane %v2081_v60, 4  ;;  %v4185_v39 = vld [vmem:[#allocation2 + $0xa8] sm:$0xff]  ;;  %v4168_v58 = vld [vmem:[#allocation2 + $0x90] sm:$0xff] }
 0x3aa   : > { %v3235_v24 = vunpack.c.l.b16 %v2077_v11  ;;  %v2043_v51 = vrot.slane %v2041_v44, 4  ;;  %v2046_v40 = vrot.slane %v2044_v8, 5  ;;  %v2054_v7 = vshrl.u32 %v1729_v10, 16  ;;  %v1725_v8 = vld [vmem:[#allocation2 + $0x88] sm:$0xf] }
 0x3ab   : > { %3715 = vmatpush.bf16.xpose.msrb.mxu3 %v3255_v52  ;;  %v2052_v56 = vrot.slane %v2050_v45, 5  ;;  %v2060_v32 = vshll.u32 %v1748_v31, 16  ;;  %v2087_v23 = vsel %vm4793_vm1, %v2082_v57, %v2086_v2  ;;  %v3923_v19 = vrot.slane %v2148_v59, 9 }
 0x3ac   : > { %3741 = vmatpush.bf16.xpose.msra.mxu1 %v4187_v43  ;;  %v3300_v43 = vunpack.c.l.b16 %v2297_v30  ;;  %v2286_v12 = vrot.slane %v1729_v10, 5  ;;  %v3236_v6 = vunpack.c.l.b16 %v2087_v23  ;;  %v2047_v37 = vor.u32 %v2046_v40, %v2043_v51  ;;  %v4184_v40 = vld [vmem:[#allocation2 + $0x9c] sm:$0xff] }
 0x3ad   : > { %v2056_v14 = vrot.slane %v2054_v7, 4  ;;  %v2062_v28 = vrot.slane %v2060_v32, 5  ;;  %v2289_v33 = vrot.slane %v1748_v31, 5  ;;  %v2017_v20 = vshrl.u32 %v1726_v34, 16  ;;  %v4167_v32 = vld [vmem:[#allocation2 + $0x84] sm:$0xff] }
 0x3ae   : > { %v3318_v50 = vpack.c.b16 %v3300_v43, %v3299_v27  ;;  %v2287_v13 = vsel %vm4784_vm0, %v3923_v19, %v2286_v12  ;;  %v2288_v3 = vrot.slane %v2286_v12, 4  ;;  %v3254_v35 = vpack.c.b16 %v3236_v6, %v3235_v24 }
 0x3af   : > { %v2048_v48 = vrot.slane %v2047_v37, 4  ;;  %v2057_v25 = vor.u32 %v2056_v14, %v2052_v56  ;;  %v3297_v9 = vunpack.c.l.b16 %v2287_v13  ;;  %v2019_v22 = vrot.slane %v2017_v20, 4  ;;  %v2146_v14 = vld [vmem:[#allocation2 + $0x84] sm:$0xe] }
 0x3b0   : > { %3728 = vmatpush.bf16.xpose.msra.mxu0 %v3319_v15  ;;  %v2290_v16 = vsel %vm4784_vm0, %v2288_v3, %v2289_v33  ;;  %v2020_v47 = vshll.u32 %v1726_v34, 16  ;;  %v2026_v21 = vshll.u32 %v1727_v38, 16  ;;  %v2030_v29 = vshrl.u32 %v1727_v38, 16  ;;  %v1746_v34 = vld [vmem:[#allocation2 + $0x8c] sm:$0x1] }
 0x3b1   : > { %3704 = vmatpush.bf16.xpose.msrb.mxu2 %v4169_v63  ;;  %v2053_v46 = vsel %vm4793_vm1, %v2048_v48, %v2052_v56  ;;  %v2058_v18 = vrot.slane %v2057_v25, 4  ;;  %v3298_v15 = vunpack.c.l.b16 %v2290_v16  ;;  %v2036_v55 = vshll.u32 %v1747_v1, 16  ;;  %v1722_v25 = vld [vmem:[#allocation2 + $0x78] sm:$0xf] }
 0x3b2   : > { %v3233_v2 = vunpack.c.l.b16 %v2053_v46  ;;  %v2022_v10 = vrot.slane %v2020_v47, 5  ;;  %v2028_v0 = vrot.slane %v2026_v21, 5  ;;  %v2032_v63 = vrot.slane %v2030_v29, 4  ;;  %v1745_v29 = vld [vmem:[#allocation2 + $0x80] sm:$0x1] }
 0x3b3   : > { %3716 = vmatpush.bf16.xpose.msrb.mxu3 %v3254_v35  ;;  %v2063_v62 = vsel %vm4793_vm1, %v2058_v18, %v2062_v28  ;;  %v3922_v52 = vrot.slane %v2147_v42, 9  ;;  %v2038_v31 = vrot.slane %v2036_v55, 5  ;;  %v2279_v44 = vrot.slane %v1727_v38, 5  ;;  %v1723_v42 = vld [vmem:[#allocation2 + $0x7c] sm:$0xf] }
 0x3b4   : > { %3742 = vmatpush.bf16.xpose.msra.mxu1 %v4186_v53  ;;  %v3317_v53 = vpack.c.b16 %v3298_v15, %v3297_v9  ;;  %v3234_v60 = vunpack.c.l.b16 %v2063_v62  ;;  %v2023_v27 = vor.u32 %v2022_v10, %v2019_v22  ;;  %v2033_v11 = vor.u32 %v2032_v63, %v2028_v0  ;;  %v2145_v62 = vld [vmem:[#allocation2 + $0x78] sm:$0xe]  ;;  %v4183_v63 = vld [vmem:[#allocation2 + $0x90] sm:$0xff] }
 0x3b5   : > { %v2282_v30 = vrot.slane %v1747_v1, 5  ;;  %v1993_v45 = vshrl.u32 %v1724_v49, 16  ;;  %v1996_v59 = vshll.u32 %v1724_v49, 16  ;;  %v2280_v43 = vsel %vm4784_vm0, %v3922_v52, %v2279_v44  ;;  %v4166_v52 = vld [vmem:[#allocation2 + $0x78] sm:$0xff] }
 0x3b6   : > { %v3253_v57 = vpack.c.b16 %v3234_v60, %v3233_v2  ;;  %v2024_v24 = vrot.slane %v2023_v27, 4  ;;  %v2281_v51 = vrot.slane %v2279_v44, 4  ;;  %v2034_v56 = vrot.slane %v2033_v11, 4 }
 0x3b7   : > { %v3295_v7 = vunpack.c.l.b16 %v2280_v43  ;;  %v1995_v23 = vrot.slane %v1993_v45, 4  ;;  %v2002_v6 = vshll.u32 %v1725_v8, 16  ;;  %v2006_v37 = vshrl.u32 %v1725_v8, 16  ;;  %v1720_v45 = vld [vmem:[#allocation2 + $0x6c] sm:$0xf] }
 0x3b8   : > { %3729 = vmatpush.bf16.xpose.msra.mxu0 %v3318_v50  ;;  %v1998_v50 = vrot.slane %v1996_v59, 5  ;;  %v2029_v19 = vsel %vm4793_vm1, %v2024_v24, %v2028_v0  ;;  %v2283_v12 = vsel %vm4784_vm0, %v2281_v51, %v2282_v30  ;;  %v2039_v28 = vsel %vm4793_vm1, %v2034_v56, %v2038_v31 }
 0x3b9   : > { %3705 = vmatpush.bf16.xpose.msrb.mxu2 %v4168_v58  ;;  %v3231_v38 = vunpack.c.l.b16 %v2029_v19  ;;  %v3296_v13 = vunpack.c.l.b16 %v2283_v12  ;;  %v3232_v33 = vunpack.c.l.b16 %v2039_v28  ;;  %v2004_v20 = vrot.slane %v2002_v6, 5  ;;  %v5581_v12 = vpop.f32.mrf.mxu0 }
 0x3ba   : > { %v1999_v3 = vor.u32 %v1998_v50, %v1995_v23  ;;  %v2008_v35 = vrot.slane %v2006_v37, 4  ;;  %v2012_v48 = vshll.u32 %v1746_v34, 16  ;;  %v3921_v58 = vrot.slane %v2146_v14, 9  ;;  %v5583_v6 = vpop.f32.mrf.mxu1 }
 0x3bb   : > { %3717 = vmatpush.bf16.xpose.msrb.mxu3 %v3253_v57  ;;  %v3316_v9 = vpack.c.b16 %v3296_v13, %v3295_v7  ;;  %v2272_v1 = vrot.slane %v1725_v8, 5  ;;  %v3252_v16 = vpack.c.b16 %v3232_v33, %v3231_v38  ;;  %v2275_v21 = vrot.slane %v1746_v34, 5  ;;  %v1744_v33 = vld [vmem:[#allocation2 + $0x74] sm:$0x1] }
 0x3bc   : > { %3743 = vmatpush.bf16.xpose.msra.mxu1 %v4185_v39  ;;  %v2000_v39 = vrot.slane %v1999_v3, 4  ;;  %v2009_v22 = vor.u32 %v2008_v35, %v2004_v20  ;;  %v2014_v47 = vrot.slane %v2012_v48, 5  ;;  %v1969_v2 = vshrl.u32 %v1722_v25, 16 }
 0x3bd   : > { %v2273_v18 = vsel %vm4784_vm0, %v3921_v58, %v2272_v1  ;;  %v2274_v15 = vrot.slane %v2272_v1, 4  ;;  %v1972_v49 = vshll.u32 %v1722_v25, 16  ;;  %v1978_v27 = vshll.u32 %v1723_v42, 16  ;;  %v2144_v58 = vld [vmem:[#allocation2 + $0x6c] sm:$0xe] }
 0x3be   : > { %v2005_v46 = vsel %vm4793_vm1, %v2000_v39, %v2004_v20  ;;  %v2010_v10 = vrot.slane %v2009_v22, 4  ;;  %v3293_v55 = vunpack.c.l.b16 %v2273_v18  ;;  %v1971_v60 = vrot.slane %v1969_v2, 4  ;;  %v2343_v2 = vld [vmem:[#allocation2 + $0xcc] sm:$0xf] }
 0x3bf   : > { %v5574_v0 = vunpack.c.l.b16 %v2005_v46  ;;  %v1982_v31 = vshrl.u32 %v1723_v42, 16  ;;  %v1974_v30 = vrot.slane %v1972_v49, 5  ;;  %v1988_v8 = vshll.u32 %v1745_v29, 16 }
 0x3c0   : > { %3730 = vmatpush.bf16.xpose.msra.mxu0 %v3317_v53  ;;  %v2276_v53 = vsel %vm4784_vm0, %v2274_v15, %v2275_v21  ;;  %v2015_v44 = vsel %vm4793_vm1, %v2010_v10, %v2014_v47  ;;  %v1980_v57 = vrot.slane %v1978_v27, 5  ;;  %v3920_v43 = vrot.slane %v2145_v62, 9  ;;  %v4182_v47 = vld [vmem:[#allocation2 + $0x84] sm:$0xff]  ;;  %v4165_v21 = vld [vmem:[#allocation2 + $0x6c] sm:$0xff] }
 0x3c1   : > { %3706 = vmatpush.bf16.xpose.msrb.mxu2 %v4167_v32  ;;  %v3294_v11 = vunpack.c.l.b16 %v2276_v53  ;;  %v3230_v59 = vunpack.c.l.b16 %v2015_v44  ;;  %v1984_v24 = vrot.slane %v1982_v31, 4  ;;  %v1990_v56 = vrot.slane %v1988_v8, 5  ;;  %v1721_v32 = vld [vmem:[#allocation2 + $0x70] sm:$0xf]  ;;  %v5597_v8 = vpop.f32.mrf.mxu3 }
 0x3c2   : > { %v2265_v7 = vrot.slane %v1723_v42, 5  ;;  %v2268_v50 = vrot.slane %v1745_v29, 5  ;;  %v1945_v19 = vshrl.u32 %v1720_v45, 16  ;;  %v1948_v38 = vshll.u32 %v1720_v45, 16  ;;  %v2344_v62 = vld [vmem:[#allocation2 + $0xd0] sm:$0xf] }
 0x3c3   : > { %3718 = vmatpush.bf16.xpose.msrb.mxu3 %v3252_v16  ;;  %v3315_v51 = vpack.c.b16 %v3294_v11, %v3293_v55  ;;  %v3251_v34 = vpack.c.b16 %v3230_v59, %v5574_v0  ;;  %v1985_v23 = vor.u32 %v1984_v24, %v1980_v57  ;;  %v1954_v35 = vshll.u32 %v1721_v32, 16  ;;  %v2360_v24 = vld [vmem:[#allocation2 + $0xd4] sm:$0x1] }
 0x3c4   : > { %3744 = vmatpush.bf16.xpose.msra.mxu1 %v4184_v40  ;;  %v1975_v40 = vor.u32 %v1974_v30, %v1971_v60  ;;  %v2266_v14 = vsel %vm4784_vm0, %v3920_v43, %v2265_v7  ;;  %v2267_v28 = vrot.slane %v2265_v7, 4  ;;  %v1947_v20 = vrot.slane %v1945_v19, 4  ;;  %v5595_v30 = vpop.f32.mrf.mxu2 }
 0x3c5   : > { %v1986_v13 = vrot.slane %v1985_v23, 4  ;;  %v3291_v3 = vunpack.c.l.b16 %v2266_v14  ;;  %v1958_v39 = vshrl.u32 %v1721_v32, 16  ;;  %v1956_v42 = vrot.slane %v1954_v35, 5 }
 0x3c6   : > { %v1976_v37 = vrot.slane %v1975_v40, 4  ;;  %v2269_v25 = vsel %vm4784_vm0, %v2267_v28, %v2268_v50  ;;  %v1964_v29 = vshll.u32 %v1744_v33, 16  ;;  %v3919_v0 = vrot.slane %v2144_v58, 9  ;;  %v3582_v40 = vpop.f32.mrf.mxu0  ;;  %v2341_v28 = vld [vmem:[#allocation2 + $0xc0] sm:$0xf] }
 0x3c7   : > { %v1991_v1 = vsel %vm4793_vm1, %v1986_v13, %v1990_v56  ;;  %v3292_v22 = vunpack.c.l.b16 %v2269_v25  ;;  %v1960_v15 = vrot.slane %v1958_v39, 4  ;;  %v2258_v55 = vrot.slane %v1721_v32, 5  ;;  %v3595_v56 = vpop.f32.mrf.mxu1  ;;  %v4181_v13 = vld [vmem:[#allocation2 + $0x78] sm:$0xff]  ;;  %v2342_v39 = vld [vmem:[#allocation2 + $0xc4] sm:$0xf] }
 0x3c8   : > { %3731 = vmatpush.bf16.xpose.msra.mxu0 %v3316_v9  ;;  %v1981_v48 = vsel %vm4793_vm1, %v1976_v37, %v1980_v57  ;;  %v1950_v9 = vrot.slane %v1948_v38, 5  ;;  %v3228_v46 = vunpack.c.l.b16 %v1991_v1  ;;  %v2261_v49 = vrot.slane %v1744_v33, 5  ;;  %v2340_v56 = vld [vmem:[#allocation2 + $0xb8] sm:$0xf] }
 0x3c9   : > { %3707 = vmatpush.bf16.xpose.msrb.mxu2 %v4166_v52  ;;  %v3227_v16 = vunpack.c.l.b16 %v1981_v48  ;;  %v3314_v10 = vpack.c.b16 %v3292_v22, %v3291_v3  ;;  %v1961_v52 = vor.u32 %v1960_v15, %v1956_v42  ;;  %v1966_v60 = vrot.slane %v1964_v29, 5 }
 0x3ca   : > { %v1951_v18 = vor.u32 %v1950_v9, %v1947_v20  ;;  %v2259_v27 = vsel %vm4784_vm0, %v3919_v0, %v2258_v55  ;;  %v2260_v31 = vrot.slane %v2258_v55, 4  ;;  %v2722_v44 = vshrl.u32 %v2343_v2, 16  ;;  %v2759_v0 = vld [vmem:[#allocation2 + $0xc0] sm:$0xe] }
 0x3cb   : > { %3719 = vmatpush.bf16.xpose.msrb.mxu3 %v3251_v34  ;;  %v3250_v53 = vpack.c.b16 %v3228_v46, %v3227_v16  ;;  %v2725_v11 = vshll.u32 %v2343_v2, 16  ;;  %v1962_v59 = vrot.slane %v1961_v52, 4  ;;  %v3289_v57 = vunpack.c.l.b16 %v2259_v27  ;;  %v2359_v46 = vld [vmem:[#allocation2 + $0xc8] sm:$0x1] }
 0x3cc   : > { %3745 = vmatpush.bf16.xpose.msra.mxu1 %v4183_v63  ;;  %v1952_v63 = vrot.slane %v1951_v18, 4  ;;  %v2731_v43 = vshll.u32 %v2344_v62, 16  ;;  %v2262_v32 = vsel %vm4784_vm0, %v2260_v31, %v2261_v49  ;;  %v2724_v34 = vrot.slane %v2722_v44, 4  ;;  %v3556_v55 = vpop.f32.mrf.mxu2  ;;  %v3569_v49 = vpop.f32.mrf.mxu3 }
 0x3cd   : > { %v2727_v23 = vrot.slane %v2725_v11, 5  ;;  %v1967_v50 = vsel %vm4793_vm1, %v1962_v59, %v1966_v60  ;;  %v3290_v19 = vunpack.c.l.b16 %v2262_v32  ;;  %v2735_v14 = vshrl.u32 %v2344_v62, 16  ;;  %v2337_v49 = vld [vmem:[#allocation2 + $0xa8] sm:$0xf] }
 0x3ce   : > { %v1957_v45 = vsel %vm4793_vm1, %v1952_v63, %v1956_v42  ;;  %v2733_v37 = vrot.slane %v2731_v43, 5  ;;  %v3226_v38 = vunpack.c.l.b16 %v1967_v50  ;;  %v2741_v33 = vshll.u32 %v2360_v24, 16 }
 0x3cf   : > { %v5601_v7 = vunpack.c.l.b16 %v1957_v45  ;;  %v2728_v3 = vor.u32 %v2727_v23, %v2724_v34  ;;  %v3313_v35 = vpack.c.b16 %v3290_v19, %v3289_v57  ;;  %v2737_v48 = vrot.slane %v2735_v14, 4  ;;  %v2339_v57 = vld [vmem:[#allocation2 + $0xb4] sm:$0xf]  ;;  %v2358_v14 = vld [vmem:[#allocation2 + $0xbc] sm:$0x1] }
 0x3d0   : > { %3732 = vmatpush.bf16.xpose.msra.mxu0 %v3315_v51  ;;  %v2760_v51 = vld [vmem:[#allocation2 + $0xcc] sm:$0xe]  ;;  %v2916_v25 = vrot.slane %v2344_v62, 5  ;;  %v2919_v9 = vrot.slane %v2360_v24, 5  ;;  %v2743_v16 = vrot.slane %v2741_v33, 5  ;;  %v2698_v22 = vshrl.u32 %v2341_v28, 16 }
 0x3d1   : > { %3708 = vmatpush.bf16.xpose.msrb.mxu2 %v4165_v21  ;;  %v3942_v20 = vrot.slane %v2760_v51, 9  ;;  %v3249_v58 = vpack.c.b16 %v3226_v38, %v5601_v7  ;;  %v2729_v1 = vrot.slane %v2728_v3, 4  ;;  %v2701_v18 = vshll.u32 %v2341_v28, 16 }
 0x3d2   : > { %v2918_v42 = vrot.slane %v2916_v25, 4  ;;  %v2700_v2 = vrot.slane %v2698_v22, 4  ;;  %v2711_v27 = vshrl.u32 %v2342_v39, 16  ;;  %v2717_v31 = vshll.u32 %v2359_v46, 16 }
 0x3d3   : > { %3720 = vmatpush.bf16.xpose.msrb.mxu3 %v3250_v53  ;;  %v2917_v21 = vsel %vm4784_vm0, %v3942_v20, %v2916_v25  ;;  %v2734_v15 = vsel %vm4793_vm1, %v2729_v1, %v2733_v37  ;;  %v2703_v52 = vrot.slane %v2701_v18, 5  ;;  %v3941_v45 = vrot.slane %v2759_v0, 9 }
 0x3d4   : > { %3746 = vmatpush.bf16.xpose.msra.mxu1 %v4182_v47  ;;  %v2738_v47 = vor.u32 %v2737_v48, %v2733_v37  ;;  %v3511_v29 = vunpack.c.l.b16 %v2917_v21  ;;  %v3447_v53 = vunpack.c.l.b16 %v2734_v15  ;;  %v2920_v63 = vsel %vm4784_vm0, %v2918_v42, %v2919_v9  ;;  %v5626_v1 = vpop.f32.mrf.mxu2 }
 0x3d5   : > { %v3512_v60 = vunpack.c.l.b16 %v2920_v63  ;;  %v2704_v11 = vor.u32 %v2703_v52, %v2700_v2  ;;  %v2909_v59 = vrot.slane %v2342_v39, 5  ;;  %v2713_v51 = vrot.slane %v2711_v27, 4  ;;  %v5619_v38 = vpop.f32.mrf.mxu0 }
 0x3d6   : > { %v2739_v62 = vrot.slane %v2738_v47, 4  ;;  %v2719_v40 = vrot.slane %v2717_v31, 5  ;;  %v2912_v23 = vrot.slane %v2359_v46, 5  ;;  %v2674_v28 = vshrl.u32 %v2339_v57, 16 }
 0x3d7   : > { %v3528_v43 = vpack.c.b16 %v3512_v60, %v3511_v29  ;;  %v2705_v7 = vrot.slane %v2704_v11, 4  ;;  %v2910_v32 = vsel %vm4784_vm0, %v3941_v45, %v2909_v59  ;;  %v2911_v34 = vrot.slane %v2909_v59, 4  ;;  %v5634_v29 = vpop.xlane.xlu2 %958  ;;  %v2338_v60 = vld [vmem:[#allocation2 + $0xac] sm:$0xf] }
 0x3d8   : > { %3733 = vmatpush.bf16.xpose.msra.mxu0 %v3314_v10  ;;  %3709 = vmatmul.bf16.vlgmr.msrb.gmra.mxu2 %v5227_v41  ;;  %v2707_v10 = vshll.u32 %v2342_v39, 16  ;;  %v2744_v44 = vsel %vm4793_vm1, %v2739_v62, %v2743_v16  ;;  %v3509_v37 = vunpack.c.l.b16 %v2910_v32  ;;  %v2677_v33 = vshll.u32 %v2339_v57, 16  ;;  %v5628_v47 = vpop.f32.mrf.mxu1 }
 0x3d9   : > { %v3448_v24 = vunpack.c.l.b16 %v2744_v44  ;;  %v2913_v3 = vsel %vm4784_vm0, %v2911_v34, %v2912_v23  ;;  %v2683_v20 = vshll.u32 %v2340_v56, 16  ;;  %v2676_v39 = vrot.slane %v2674_v28, 4  ;;  %v5632_v15 = vpop.f32.mrf.mxu3  ;;  %v2335_v23 = vld [vmem:[#allocation2 + $0x9c] sm:$0xf] }
 0x3da   : > { %v2709_v41 = vrot.slane %v2707_v10, 5  ;;  %v3510_v9 = vunpack.c.l.b16 %v2913_v3  ;;  %v2693_v22 = vshll.u32 %v2358_v14, 16  ;;  %v2902_v18 = vrot.slane %v2340_v56, 5 }
 0x3db   : > { %v3464_v50 = vpack.c.b16 %v3448_v24, %v3447_v53  ;;  %3721 = vmatpush.bf16.xpose.msrb.mxu3 %v3249_v58  ;;  %v2679_v58 = vrot.slane %v2677_v33, 5  ;;  %v2685_v16 = vrot.slane %v2683_v20, 5  ;;  %v2905_v63 = vrot.slane %v2358_v14, 5 }
 0x3dc   : > { %3747 = vmatpush.bf16.xpose.msra.mxu1 %v4181_v13  ;;  %v2714_v19 = vor.u32 %v2713_v51, %v2709_v41  ;;  %v2710_v13 = vsel %vm4793_vm1, %v2705_v7, %v2709_v41  ;;  %v3527_v42 = vpack.c.b16 %v3510_v9, %v3509_v37  ;;  %v2695_v55 = vrot.slane %v2693_v22, 5  ;;  %v2357_v51 = vld [vmem:[#allocation2 + $0xb0] sm:$0x1] }
 0x3dd   : > { %3753 = vmatpush.bf16.xpose.msra.mxu2 %v3464_v50  ;;  %v3445_v25 = vunpack.c.l.b16 %v2710_v13  ;;  %v2680_v10 = vor.u32 %v2679_v58, %v2676_v39  ;;  %v2904_v53 = vrot.slane %v2902_v18, 4  ;;  %v3555_v52 = vadd.f32 %v5595_v30, %v5634_v29  ;;  %v3634_v57 = vpop.f32.mrf.mxu0 }
 0x3de   : > { %v2715_v48 = vrot.slane %v2714_v19, 4  ;;  %v2650_v45 = vshrl.u32 %v2337_v49, 16  ;;  %v2653_v59 = vshll.u32 %v2337_v49, 16  ;;  %v2663_v14 = vshrl.u32 %v2338_v60, 16 }
 0x3df   : > { %v2681_v27 = vrot.slane %v2680_v10, 4  ;;  %v2906_v11 = vsel %vm4784_vm0, %v2904_v53, %v2905_v63  ;;  %v2669_v33 = vshll.u32 %v2357_v51, 16  ;;  %v2898_v9 = vrot.slane %v2357_v51, 5  ;;  %v2333_v51 = vld [vmem:[#allocation2 + $0x90] sm:$0xf] }
 0x3e0   : > { %3734 = vmatpush.bf16.xpose.msra.mxu0 %v3313_v35  ;;  %v2758_v35 = vld [vmem:[#allocation2 + $0xb4] sm:$0xe]  ;;  %v2720_v21 = vsel %vm4793_vm1, %v2715_v48, %v2719_v40  ;;  %v3508_v30 = vunpack.c.l.b16 %v2906_v11  ;;  %v2659_v40 = vshll.u32 %v2338_v60, 16  ;;  %v2652_v32 = vrot.slane %v2650_v45, 4  ;;  %v3647_v28 = vpop.f32.mrf.mxu1 }
 0x3e1   : > { %v3940_v46 = vrot.slane %v2758_v35, 9  ;;  %v3446_v2 = vunpack.c.l.b16 %v2720_v21  ;;  %v2686_v24 = vsel %vm4793_vm1, %v2681_v27, %v2685_v16  ;;  %v2655_v34 = vrot.slane %v2653_v59, 5  ;;  %v3621_v35 = vpop.f32.mrf.mxu3 }
 0x3e2   : > { %3722 = vmatmul.bf16.vlgmr.msrb.gmra.mxu3 %v5322_v5  ;;  %v3443_v7 = vunpack.c.l.b16 %v2686_v24  ;;  %v2661_v37 = vrot.slane %v2659_v40, 5  ;;  %v2665_v48 = vrot.slane %v2663_v14, 4  ;;  %v2626_v39 = vshrl.u32 %v2335_v23, 16 }
 0x3e3   : > { %3748 = vmatmul.bf16.vlgmr.msra.gmra.mxu1 %v5349_v26  ;;  %3766 = vmatpush.bf16.xpose.msra.mxu3 %v3528_v43  ;;  %v2687_v26 = vshrl.u32 %v2340_v56, 16  ;;  %v2903_v62 = vsel %vm4784_vm0, %v3940_v46, %v2902_v18  ;;  %v3463_v41 = vpack.c.b16 %v3446_v2, %v3445_v25  ;;  %v2757_v56 = vld [vmem:[#allocation2 + $0xa8] sm:$0xe]  ;;  %v2656_v3 = vor.u32 %v2655_v34, %v2652_v32  ;;  %v2356_v18 = vld [vmem:[#allocation2 + $0xa4] sm:$0x1] }
 0x3e4   : > { %v3507_v44 = vunpack.c.l.b16 %v2903_v62  ;;  %v3939_v20 = vrot.slane %v2757_v56, 9  ;;  %v2895_v25 = vrot.slane %v2338_v60, 5  ;;  %v2629_v22 = vshll.u32 %v2335_v23, 16  ;;  %v2756_v62 = vld [vmem:[#allocation2 + $0x9c] sm:$0xe] }
 0x3e5   : > { %v2689_v0 = vrot.slane %v2687_v26, 4  ;;  %3754 = vmatpush.bf16.xpose.msra.mxu2 %v3463_v41  ;;  %v2671_v26 = vrot.slane %v2669_v33, 5  ;;  %v2666_v21 = vor.u32 %v2665_v48, %v2661_v37  ;;  %v2628_v2 = vrot.slane %v2626_v39, 4  ;;  %v2334_v34 = vld [vmem:[#allocation2 + $0x94] sm:$0xf] }
 0x3e6   : > { %v3526_v19 = vpack.c.b16 %v3508_v30, %v3507_v44  ;;  %v2897_v46 = vrot.slane %v2895_v25, 4  ;;  %v2645_v44 = vshll.u32 %v2356_v18, 16  ;;  %v3938_v45 = vrot.slane %v2756_v62, 9 }
 0x3e7   : > { %3735 = vmatmul.bf16.vlgmr.msra.gmra.mxu0 %v5339_v36  ;;  %v2690_v31 = vor.u32 %v2689_v0, %v2685_v16  ;;  %v3568_v36 = vadd.f32 %v5597_v8, %v3555_v52  ;;  %v3608_v8 = vpop.f32.mrf.mxu2  ;;  %v2657_v16 = vrot.slane %v2656_v3, 4  ;;  %v2667_v53 = vrot.slane %v2666_v21, 4 }
 0x3e8   : > { %v2899_v52 = vsel %vm4784_vm0, %v2897_v46, %v2898_v9  ;;  %v2647_v30 = vrot.slane %v2645_v44, 5  ;;  %v2891_v32 = vrot.slane %v2356_v18, 5  ;;  %v2602_v3 = vshrl.u32 %v2333_v51, 16  ;;  %v2332_v18 = vld [vmem:[#allocation2 + $0x88] sm:$0xf] }
 0x3e9   : > { %v2691_v43 = vrot.slane %v2690_v31, 4  ;;  %v3581_v5 = vadd.f32 %v5581_v12, %v3568_v36  ;;  %v2336_v12 = vld [vmem:[#allocation2 + $0xa0] sm:$0xf]  ;;  %v2662_v10 = vsel %vm4793_vm1, %v2657_v16, %v2661_v37  ;;  %v3506_v41 = vunpack.c.l.b16 %v2899_v52  ;;  %v2355_v37 = vld [vmem:[#allocation2 + $0x98] sm:$0x1] }
 0x3ea   : > { %v2635_v49 = vshll.u32 %v2336_v12, 16  ;;  %v3441_v63 = vunpack.c.l.b16 %v2662_v10  ;;  %v2639_v60 = vshrl.u32 %v2336_v12, 16  ;;  %v2672_v11 = vsel %vm4793_vm1, %v2667_v53, %v2671_v26 }
 0x3eb   : > { %3767 = vmatpush.bf16.xpose.msra.mxu3 %v3527_v42  ;;  %v2696_v50 = vsel %vm4793_vm1, %v2691_v43, %v2695_v55  ;;  %v2896_v42 = vsel %vm4784_vm0, %v3939_v20, %v2895_v25  ;;  %v2631_v55 = vrot.slane %v2629_v22, 5  ;;  %v2888_v59 = vrot.slane %v2336_v12, 5  ;;  %v2755_v25 = vld [vmem:[#allocation2 + $0x90] sm:$0xe]  ;;  %v2331_v22 = vld [vmem:[#allocation2 + $0x84] sm:$0xf] }
 0x3ec   : > { %v3444_v13 = vunpack.c.l.b16 %v2696_v50  ;;  %v3505_v0 = vunpack.c.l.b16 %v2896_v42  ;;  %v2637_v31 = vrot.slane %v2635_v49, 5  ;;  %v2641_v36 = vrot.slane %v2639_v60, 4 }
 0x3ed   : > { %v2632_v27 = vor.u32 %v2631_v55, %v2628_v2  ;;  %v3442_v57 = vunpack.c.l.b16 %v2672_v11  ;;  %v2889_v56 = vsel %vm4784_vm0, %v3938_v45, %v2888_v59  ;;  %v2605_v35 = vshll.u32 %v2333_v51, 16  ;;  %v2754_v45 = vld [vmem:[#allocation2 + $0x84] sm:$0xe] }
 0x3ee   : > { %v3462_v58 = vpack.c.b16 %v3444_v13, %v3443_v7  ;;  %v3525_v24 = vpack.c.b16 %v3506_v41, %v3505_v0  ;;  %v2642_v40 = vor.u32 %v2641_v36, %v2637_v31  ;;  %v2890_v7 = vrot.slane %v2888_v59, 4  ;;  %v2354_v41 = vld [vmem:[#allocation2 + $0x8c] sm:$0x1] }
 0x3ef   : > { %v2633_v43 = vrot.slane %v2632_v27, 4  ;;  %v3461_v23 = vpack.c.b16 %v3442_v57, %v3441_v63  ;;  %v3503_v50 = vunpack.c.l.b16 %v2889_v56  ;;  %v2611_v48 = vshll.u32 %v2334_v34, 16  ;;  %v2329_v56 = vld [vmem:[#allocation2 + $0x78] sm:$0xf] }
 0x3f0   : > { %3755 = vmatpush.bf16.xpose.msra.mxu2 %v3462_v58  ;;  %v2643_v14 = vrot.slane %v2642_v40, 4  ;;  %v2892_v13 = vsel %vm4784_vm0, %v2890_v7, %v2891_v32  ;;  %v2604_v12 = vrot.slane %v2602_v3, 4  ;;  %v2615_v39 = vshrl.u32 %v2334_v34, 16 }
 0x3f1   : > { %v2638_v8 = vsel %vm4793_vm1, %v2633_v43, %v2637_v31  ;;  %v3504_v33 = vunpack.c.l.b16 %v2892_v13  ;;  %v2621_v58 = vshll.u32 %v2355_v37, 16  ;;  %v2607_v26 = vrot.slane %v2605_v35, 5  ;;  %v2353_v35 = vld [vmem:[#allocation2 + $0x80] sm:$0x1] }
 0x3f2   : > { %v3439_v28 = vunpack.c.l.b16 %v2638_v8  ;;  %v2648_v9 = vsel %vm4793_vm1, %v2643_v14, %v2647_v30  ;;  %v2613_v21 = vrot.slane %v2611_v48, 5  ;;  %v2617_v42 = vrot.slane %v2615_v39, 4 }
 0x3f3   : > { %3768 = vmatpush.bf16.xpose.msra.mxu3 %v3526_v19  ;;  %v3594_v19 = vadd.f32 %v5583_v6, %v3581_v5  ;;  %v3440_v6 = vunpack.c.l.b16 %v2648_v9  ;;  %v3524_v5 = vpack.c.b16 %v3504_v33, %v3503_v50  ;;  %v3937_v46 = vrot.slane %v2755_v25, 9 }
 0x3f4   : > { %v2608_v0 = vor.u32 %v2607_v26, %v2604_v12  ;;  %v2881_v55 = vrot.slane %v2334_v34, 5  ;;  %v2618_v49 = vor.u32 %v2617_v42, %v2613_v21  ;;  %v2884_v62 = vrot.slane %v2355_v37, 5  ;;  %v2753_v26 = vld [vmem:[#allocation2 + $0x78] sm:$0xe] }
 0x3f5   : > { %v3607_v20 = vadd.f32 %v5626_v1, %v3594_v19  ;;  %v2623_v1 = vrot.slane %v2621_v58, 5  ;;  %v3460_v2 = vpack.c.b16 %v3440_v6, %v3439_v28  ;;  %v2578_v53 = vshrl.u32 %v2331_v22, 16  ;;  %v2330_v28 = vld [vmem:[#allocation2 + $0x7c] sm:$0xf] }
 0x3f6   : > { %v2581_v63 = vshll.u32 %v2331_v22, 16  ;;  %v2609_v52 = vrot.slane %v2608_v0, 4  ;;  %v2883_v60 = vrot.slane %v2881_v55, 4  ;;  %v2587_v27 = vshll.u32 %v2332_v18, 16 }
 0x3f7   : > { %v3620_v16 = vadd.f32 %v5632_v15, %v3607_v20  ;;  %v2882_v15 = vsel %vm4784_vm0, %v3937_v46, %v2881_v55  ;;  %v2619_v31 = vrot.slane %v2618_v49, 4  ;;  %v2580_v11 = vrot.slane %v2578_v53, 4 }
 0x3f8   : > { %3756 = vmatpush.bf16.xpose.msra.mxu2 %v3461_v23  ;;  %v3501_v44 = vunpack.c.l.b16 %v2882_v15  ;;  %v2583_v36 = vrot.slane %v2581_v63, 5  ;;  %v2885_v59 = vsel %vm4784_vm0, %v2883_v60, %v2884_v62  ;;  %v2589_v57 = vrot.slane %v2587_v27, 5 }
 0x3f9   : > { %v5670_v10 = vadd.f32 %v5619_v38, %v3620_v16  ;;  %v2614_v38 = vsel %vm4793_vm1, %v2609_v52, %v2613_v21  ;;  %v2624_v43 = vsel %vm4793_vm1, %v2619_v31, %v2623_v1  ;;  %v3502_v51 = vunpack.c.l.b16 %v2885_v59 }
 0x3fa   : > { %v3437_v30 = vunpack.c.l.b16 %v2614_v38  ;;  %v2584_v40 = vor.u32 %v2583_v36, %v2580_v11  ;;  %v3438_v7 = vunpack.c.l.b16 %v2624_v43  ;;  %v2597_v34 = vshll.u32 %v2354_v41, 16 }
 0x3fb   : > { %3769 = vmatpush.bf16.xpose.msra.mxu3 %v3525_v24  ;;  %v2591_v24 = vshrl.u32 %v2332_v18, 16  ;;  %v3936_v23 = vrot.slane %v2754_v45, 9  ;;  %v2874_v50 = vrot.slane %v2332_v18, 5  ;;  %v2877_v19 = vrot.slane %v2354_v41, 5 }
 0x3fc   : > { %v2585_v8 = vrot.slane %v2584_v40, 4  ;;  %v2599_v14 = vrot.slane %v2597_v34, 5  ;;  %v2554_v13 = vshrl.u32 %v2329_v56, 16  ;;  %v2557_v48 = vshll.u32 %v2329_v56, 16 }
 0x3fd   : > { %v2593_v32 = vrot.slane %v2591_v24, 4  ;;  %v2875_v33 = vsel %vm4784_vm0, %v3936_v23, %v2874_v50  ;;  %v2876_v20 = vrot.slane %v2874_v50, 4  ;;  %v3459_v25 = vpack.c.b16 %v3438_v7, %v3437_v30 }
 0x3fe   : > { %v2590_v3 = vsel %vm4793_vm1, %v2585_v8, %v2589_v57  ;;  %v3523_v9 = vpack.c.b16 %v3502_v51, %v3501_v44  ;;  %v2556_v39 = vrot.slane %v2554_v13, 4  ;;  %v2559_v6 = vrot.slane %v2557_v48, 5 }
 0x3ff   : > { %v2594_v37 = vor.u32 %v2593_v32, %v2589_v57  ;;  %v2878_v58 = vsel %vm4784_vm0, %v2876_v20, %v2877_v19  ;;  %v2567_v16 = vshrl.u32 %v2330_v28, 16  ;;  %v3435_v21 = vunpack.c.l.b16 %v2590_v3 }
 0x400   : > { %3757 = vmatpush.bf16.xpose.msra.mxu2 %v3460_v2  ;;  %v3499_v42 = vunpack.c.l.b16 %v2875_v33  ;;  %v2573_v1 = vshll.u32 %v2353_v35, 16  ;;  %v3500_v46 = vunpack.c.l.b16 %v2878_v58  ;;  %v2560_v18 = vor.u32 %v2559_v6, %v2556_v39 }
 0x401   : > { %v2595_v12 = vrot.slane %v2594_v37, 4  ;;  %v2569_v0 = vrot.slane %v2567_v16, 4  ;;  %v3935_v62 = vrot.slane %v2753_v26, 9  ;;  %v2867_v53 = vrot.slane %v2330_v28, 5 }
 0x402   : > { %v2575_v49 = vrot.slane %v2573_v1, 5  ;;  %v2561_v63 = vrot.slane %v2560_v18, 4  ;;  %v2870_v15 = vrot.slane %v2353_v35, 5  ;;  %v3646_v60 = vadd.f32 %v5628_v47, %v5670_v10 }
 0x403   : > { %3770 = vmatpush.bf16.xpose.msra.mxu3 %v3524_v5  ;;  %v2563_v5 = vshll.u32 %v2330_v28, 16  ;;  %v2600_v22 = vsel %vm4793_vm1, %v2595_v12, %v2599_v14  ;;  %v2869_v41 = vrot.slane %v2867_v53, 4  ;;  %v3522_v44 = vpack.c.b16 %v3500_v46, %v3499_v42 }
 0x404   : > { %v3436_v55 = vunpack.c.l.b16 %v2600_v22  ;;  %v2868_v45 = vsel %vm4784_vm0, %v3935_v62, %v2867_v53 }
 0x405   : > { %v2565_v2 = vrot.slane %v2563_v5, 5  ;;  %v2871_v38 = vsel %vm4784_vm0, %v2869_v41, %v2870_v15  ;;  %v3497_v59 = vunpack.c.l.b16 %v2868_v45 }
 0x406   : > { %v3458_v31 = vpack.c.b16 %v3436_v55, %v3435_v21  ;;  %v3498_v57 = vunpack.c.l.b16 %v2871_v38 }
 0x407   : > { %v2570_v52 = vor.u32 %v2569_v0, %v2565_v2  ;;  %v2566_v11 = vsel %vm4793_vm1, %v2561_v63, %v2565_v2 }
 0x408   : > { %3758 = vmatpush.bf16.xpose.msra.mxu2 %v3459_v25  ;;  %v3433_v47 = vunpack.c.l.b16 %v2566_v11  ;;  %v3521_v43 = vpack.c.b16 %v3498_v57, %v3497_v59 }
 0x409   : > { %v2571_v27 = vrot.slane %v2570_v52, 4 }
 0x40b   : > { %3771 = vmatpush.bf16.xpose.msra.mxu3 %v3523_v9  ;;  %v2576_v36 = vsel %vm4793_vm1, %v2571_v27, %v2575_v49 }
 0x40c   : > { %v3434_v10 = vunpack.c.l.b16 %v2576_v36 }
 0x40e   : > { %v3457_v24 = vpack.c.b16 %v3434_v10, %v3433_v47 }
 0x410   : > { %3759 = vmatpush.bf16.xpose.msra.mxu2 %v3458_v31 }
 0x413   : > { %3772 = vmatpush.bf16.xpose.msra.mxu3 %v3522_v44 }
 0x418   : > { %3760 = vmatpush.bf16.xpose.msra.mxu2 %v3457_v24 }
 0x41b   : > { %3773 = vmatpush.bf16.xpose.msra.mxu3 %v3521_v43 }
 0x41c   : > { %v3671_v4 = vpop.f32.mrf.mxu3 }
 0x41d   : > { %v3672_v54 = vadd.f32 %v3671_v4, %v5634_v29 }
 0x41f   : > { %3761 = vmatmul.bf16.vlgmr.msra.gmra.mxu2 %v5362_v17 }
 0x420   : > { %v3697_v30 = vpop.f32.mrf.mxu1 }
 0x422   : > { %3774 = vmatmul.bf16.vlgmr.msra.gmra.mxu3 %v5533_v61 }
 0x424   : > { %v3684_v51 = vpop.f32.mrf.mxu0  ;;  %v3673_v32 = vpop.f32.mrf.mxu3 }
 0x425   : > { %v3685_v40 = vadd.f32 %v3684_v51, %v3672_v54  ;;  %v3658_v56 = vpop.f32.mrf.mxu2 }
 0x426   : > { %v3659_v7 = vadd.f32 %v3658_v56, %v3646_v60 }
 0x427   : > { %v3698_v8 = vadd.f32 %v3697_v30, %v3685_v40 }
 0x428   : > { %v3699_v34 = vpop.f32.mrf.mxu1  ;;  %3779 = vst [vmem:[%s244_s13] sm:$0xff] %v3659_v7 }
 0x42c   : > { %v3686_v23 = vpop.f32.mrf.mxu0 }
 0x42d   : > { %v3660_v17 = vpop.f32.mrf.mxu2 }
 0x45b   : > { %v3710_v61 = vpop.f32.mrf.mxu2 }
 0x45c   : > { %v3711_v50 = vadd.f32 %v3710_v61, %v3698_v8 }
 0x460   : > { %v3749_v19 = vpop.f32.mrf.mxu1 }
 0x463   : > { %v3712_v14 = vpop.f32.mrf.mxu2 }
 0x464   : > { %v3736_v37 = vpop.f32.mrf.mxu0 }
 0x465   : > { %v3723_v28 = vpop.f32.mrf.mxu3 }
 0x466   : > { %v3724_v3 = vadd.f32 %v3723_v28, %v3711_v50 }
 0x468   : > { %v3751_v29 = vpop.f32.mrf.mxu1  ;;  %v3737_v33 = vadd.f32 %v3736_v37, %v3724_v3 }
 0x46a   : > { %v3750_v20 = vadd.f32 %v3749_v19, %v3737_v33 }
 0x46c   : > { %v3738_v13 = vpop.f32.mrf.mxu0 }
 0x46d   : > { %v3725_v35 = vpop.f32.mrf.mxu3 }
 0x4a2   : > { %v3762_v48 = vpop.f32.mrf.mxu2 }
 0x4a3   : > { %v3763_v9 = vadd.f32 %v3762_v48, %v3750_v20 }
 0x4a5   : > { %v3775_v25 = vpop.f32.mrf.mxu3 }
 0x4a6   : > { %v3776_v12 = vadd.f32 %v3775_v25, %v3763_v9 }
 0x4a8   : > { %3780 = vst [vmem:[%s244_s13 + $0x8] sm:$0xff] %v3776_v12 }
 0x4a9   : > { %4280 = shalt.err (!%p4277_p3)
}
 0x4aa   : > { %4198 = dma.vmem_to_hbm [thread:$0]  (%p4394_p5), %s3796_s18, 256, %s3798_s19, %s3782_s20   ;;  %v3764_v39 = vpop.f32.mrf.mxu2 }
 0x4ad   : > { %v3777_v58 = vpop.f32.mrf.mxu3 }
 0x4ae PF: > { %p4204_p4 = scmp.ge.s32.totalorder %s4315_s24, 2  ;;  %s3809_s11 = sand.u32 1, %s4303_s21  }
 0x4af   : > { %s3810_s13 = scalar_lea.sflag [#allocation4], %s3809_s11 }
 0x4b0   : > { %p4201_p7 = pnand %p4204_p4, %p4398_p6 }
 0x4b2   : > { %p4202_p8 = pneg %p4201_p7 }
 0x4b4   : > { %4298 = dma.done.wait (%p4202_p8), %s3810_s13, 256  }
 0x4b5   : > { %4300 = vsyncadd (%p4202_p8), %s3810_s13, 4294967040  ;;  %p16_p5 = scmp.ge.s32.totalorder %s4381_s27, 4   ;;  %s5808_s21 = smov %s4307_s22 }
 0x4b6   : > { %s5809_s22 = smov %s4311_s23  ;;  %s5810_s23 = smov %s4392_s30 }
 0x4b7   : > { %s5811_s24 = smov %s4381_s27  ;;  %18 = sbr.rel (!%p16_p5) target bundleno = 3 (0x3), region = 84 }
 0x4bc   :  { %3816 = vsyncpa [#allocation4], 1 }
 0x4bd   :  { %3818 = vsyncpa [#allocation4 + $0x1], 1 }

</bundles_post_ra>
